<compile_context>
chip_gen: v5e
topology: v5e:2x2
jax: 0.10.0
libtpu: 0.0.40
codegen_flags: <defaults>
</compile_context>

<pallas_src>
import math

import jax
import jax.numpy as jnp
from jax import lax
from jax.experimental import pallas as pl
from jax.experimental.pallas import tpu as pltpu

# ------------------------------- sizes (small test config) -------------------------------
BATCH = 2           # boards per call
NJOBS = 4           # num_jobs
NOPS = 4            # num_operations (per job)
NMACH = 4           # num_machines
LAT = 32            # latent dim (pre-op == op-seq == job-seq)
NHEADS = 2          # attention heads (both transformers)
FFH = 4 * LAT       # feedforward hidden (mult=4)
SOP = NOPS + 3      # operation sequence length (job token, mach-avail, job-avail, ops)
SJOB = NJOBS + 4    # job sequence length (situation, #jobs, min-time, mach-avail, jobs)

OP_BLOCKS = ("op0",)     # num_transformer_blocks_operation_seq = 1
JOB_BLOCKS = ("job0",)   # num_transformer_blocks_job_seq       = 1


# ------------------------------- packed parameter layout ---------------------------------
def _param_shapes():
    shapes = [
        ("machine_table", (NMACH, LAT)),        # machine_idx_lookup
        ("pos_table", (NOPS, LAT)),             # operation_position_lookup
        ("job_token", (1, LAT)),                # job_token_lookup
        ("situation_token", (1, LAT)),          # situation_token_lookup
        ("opc_Wa", (LAT, LAT)),                 # operation_combined_linear (machine-emb slice)
        ("opc_Wb", (LAT, LAT)),                 # operation_combined_linear (position-emb slice)
        ("opc_Wc", (1, LAT)),                   # operation_combined_linear (proc-time slice)
        ("opc_b", (1, LAT)),
        ("mao_W", (NMACH, LAT)), ("mao_b", (1, LAT)),       # machine_availability_op_seq_linear
        ("javail_W", (1, LAT)), ("javail_b", (1, LAT)),     # job_availability_linear
        ("jemb_W", (LAT, LAT)), ("jemb_b", (1, LAT)),       # job_embedding_linear
        ("njobs_W", (1, LAT)), ("njobs_b", (1, LAT)),       # number_of_jobs_linear
        ("mintime_W", (1, LAT)), ("mintime_b", (1, LAT)),   # global_min_machine_time_linear
        ("mavail_W", (NMACH, LAT)), ("mavail_b", (1, LAT)), # machine_availability_linear
    ]
    for blk in OP_BLOCKS + JOB_BLOCKS:
        shapes += [
            (f"{blk}_Wq", (LAT, LAT)), (f"{blk}_Wk", (LAT, LAT)),
            (f"{blk}_Wv", (LAT, LAT)), (f"{blk}_Wo", (LAT, LAT)),
            (f"{blk}_ln1_g", (1, LAT)), (f"{blk}_ln1_b", (1, LAT)),
            (f"{blk}_ff1_W", (LAT, FFH)), (f"{blk}_ff1_b", (1, FFH)),
            (f"{blk}_ff2_W", (FFH, LAT)), (f"{blk}_ff2_b", (1, LAT)),
            (f"{blk}_ln2_g", (1, LAT)), (f"{blk}_ln2_b", (1, LAT)),
        ]
    return shapes


PARAM_SHAPES = _param_shapes()
_PACK_COLS = 128


def _build_layout():
    layout, off = {}, 0
    for name, (r, c) in PARAM_SHAPES:
        assert c <= _PACK_COLS
        layout[name] = (off, r, c)
        off += ((r + 7) // 8) * 8          # keep every block 8-sublane aligned
    return layout, off


_LAYOUT, _TOTAL_ROWS = _build_layout()


def pack_params(prm):
    """One flat (rows, 128) f32 buffer holding every parameter -> single DMA."""
    buf = jnp.zeros((_TOTAL_ROWS, _PACK_COLS), jnp.float32)
    for name, (off, r, c) in _LAYOUT.items():
        buf = buf.at[off:off + r, 0:c].set(prm[name])
    return buf


def _param(params_ref, name):
    off, r, c = _LAYOUT[name]
    return params_ref[off:off + r, 0:c]


# --------------------------------- shared math helpers -----------------------------------
def _gelu(x):
    # tanh-approximate GELU (EUP tanh; matches the reference implementation below).
    c = math.sqrt(2.0 / math.pi)
    return 0.5 * x * (1.0 + jnp.tanh(c * (x + 0.044715 * x * x * x)))


def _layernorm(x, g, b):
    mu = jnp.mean(x, axis=-1, keepdims=True)
    xc = x - mu
    var = jnp.mean(xc * xc, axis=-1, keepdims=True)
    return xc * lax.rsqrt(var + 1e-5) * g + b


# ------------------------------------- kernel --------------------------------------------
def _transformer_block(x, mask, prefix, p):
    """Post-LN transformer block. x: (N, T, L), mask: (N, T) with 1.0 = valid."""
    f32 = jnp.float32
    N, T, Ld = x.shape
    Dh = Ld // NHEADS
    scale = 1.0 / math.sqrt(Dh)

    x2 = x.reshape(N * T, Ld)
    q = jnp.dot(x2, p(prefix + "_Wq"), preferred_element_type=f32).reshape(N, T, Ld)
    k = jnp.dot(x2, p(prefix + "_Wk"), preferred_element_type=f32).reshape(N, T, Ld)
    v = jnp.dot(x2, p(prefix + "_Wv"), preferred_element_type=f32).reshape(N, T, Ld)
    neg = ((1.0 - mask) * -1e9)[:, None, :]                       # (N, 1, T)

    wo = p(prefix + "_Wo")
    attn = jnp.zeros((N * T, Ld), f32)
    for h in range(NHEADS):                                       # static, batched over all rows
        sl = slice(h * Dh, (h + 1) * Dh)
        s = jnp.einsum("nqd,nkd->nqk", q[:, :, sl], k[:, :, sl],
                       preferred_element_type=f32) * scale + neg  # (N, T, T)
        m = jnp.max(s, axis=-1, keepdims=True)
        e = jnp.exp(s - m)
        w = e * pl.reciprocal(jnp.sum(e, axis=-1, keepdims=True), approx=True)
        oh = jnp.einsum("nqk,nkd->nqd", w, v[:, :, sl], preferred_element_type=f32)
        # output projection accumulated per head-slice of Wo: no lane concat of heads.
        attn = attn + jnp.dot(oh.reshape(N * T, Dh), wo[sl, :], preferred_element_type=f32)

    h1 = _layernorm(x2 + attn, p(prefix + "_ln1_g"), p(prefix + "_ln1_b"))
    ff = jnp.dot(_gelu(jnp.dot(h1, p(prefix + "_ff1_W"), preferred_element_type=f32)
                       + p(prefix + "_ff1_b")),
                 p(prefix + "_ff2_W"), preferred_element_type=f32) + p(prefix + "_ff2_b")
    h2 = _layernorm(h1 + ff, p(prefix + "_ln2_g"), p(prefix + "_ln2_b"))
    return h2.reshape(N, T, Ld)


def situation_kernel(onehot_ref, proc_ref, mavail_ref, javail_ref, opmask_ref,
                     scal_ref, jobmask_ref, params_ref, out_ref):
    f32 = jnp.float32
    p = lambda name: _param(params_ref, name)

    onehot = onehot_ref[0]        # (NJOBS*NOPS, NMACH) one-hot machine index
    proc = proc_ref[0]            # (NJOBS*NOPS, 1) processing times
    mavail = mavail_ref[0]        # (NMACH, 1)
    javail = javail_ref[0]        # (NJOBS, 1)
    opmask = opmask_ref[0]        # (NJOBS, SOP)   1 = valid
    scal = scal_ref[0]            # (1, 2)         [num_jobs, min_machine_time]
    jobmask = jobmask_ref[0]      # (1, SJOB)      1 = valid

    # ---- operation embeddings: split concat-matmul (machine | position | proc-time) ----
    mach_emb = jnp.dot(onehot, p("machine_table"), preferred_element_type=f32)      # (J*P, L)
    op_emb = (jnp.dot(mach_emb, p("opc_Wa"), preferred_element_type=f32)
              + proc * p("opc_Wc")
              + p("opc_b"))                                                         # (J*P, L)
    pos_contrib = jnp.dot(p("pos_table"), p("opc_Wb"), preferred_element_type=f32)  # (P, L)
    op_emb = op_emb.reshape(NJOBS, NOPS, LAT) + pos_contrib[None, :, :]             # (J, P, L)

    # ---- per-job prefix tokens (Linear(1,L)/Linear(M,L) done on the VPU, no 1-row matmuls) ----
    job_tok = jnp.broadcast_to(p("job_token"), (NJOBS, LAT))                        # (J, L)
    mao_emb = jnp.sum(mavail * p("mao_W"), axis=0, keepdims=True) + p("mao_b")      # (1, L)
    mao_emb = jnp.broadcast_to(mao_emb, (NJOBS, LAT))
    ja_emb = javail * p("javail_W") + p("javail_b")                                 # (J, L)

    op_seq = jnp.concatenate(
        [job_tok[:, None, :], mao_emb[:, None, :], ja_emb[:, None, :], op_emb], axis=1)  # (J, SOP, L)

    x = op_seq
    for blk in OP_BLOCKS:
        x = _transformer_block(x, opmask, blk, p)                                   # (J, SOP, L)

    # ---- job sequence ----
    job_emb = jnp.dot(x[:, 0, :], p("jemb_W"), preferred_element_type=f32) + p("jemb_b")  # (J, L)
    njobs_emb = scal[:, 0:1] * p("njobs_W") + p("njobs_b")                          # (1, L)
    mintime_emb = scal[:, 1:2] * p("mintime_W") + p("mintime_b")                    # (1, L)
    mavail_emb = jnp.sum(mavail * p("mavail_W"), axis=0, keepdims=True) + p("mavail_b")   # (1, L)

    job_seq = jnp.concatenate(
        [p("situation_token"), njobs_emb, mintime_emb, mavail_emb, job_emb], axis=0)      # (SJOB, L)

    y = job_seq[None, :, :]                                                         # (1, SJOB, L)
    for blk in JOB_BLOCKS:
        y = _transformer_block(y, jobmask, blk, p)

    out_ref[...] = y    # one output slab: row 0 = situation token, rows 4: = transformed jobs


# ------------------------------------- wrapper --------------------------------------------
def situation_network(op_machine_idx, proc_times, machine_avail, job_avail,
                      ops_mask, num_jobs_scalar, min_time_scalar, job_mask, prm):
    # Wrapper-side layout plumbing only (one-hot, flatten, scalar packing, weight packing).
    onehot = jax.nn.one_hot(op_machine_idx, NMACH, dtype=jnp.float32).reshape(BATCH, NJOBS * NOPS, NMACH)
    proc = proc_times.astype(jnp.float32).reshape(BATCH, NJOBS * NOPS, 1)
    mavail = machine_avail.astype(jnp.float32).reshape(BATCH, NMACH, 1)
    javail = job_avail.astype(jnp.float32).reshape(BATCH, NJOBS, 1)
    opmask = ops_mask.astype(jnp.float32)                                    # (B, NJOBS, SOP)
    scal = jnp.concatenate([num_jobs_scalar, min_time_scalar], axis=-1).reshape(BATCH, 1, 2)
    jmask = job_mask.astype(jnp.float32).reshape(BATCH, 1, SJOB)
    packed = pack_params(prm)                                                # (_TOTAL_ROWS, 128)

    out = pl.pallas_call(
        situation_kernel,
        out_shape=jax.ShapeDtypeStruct((BATCH, SJOB, LAT), jnp.float32),
        grid=(BATCH,),
        in_specs=[
            pl.BlockSpec((1, NJOBS * NOPS, NMACH), lambda b: (b, 0, 0)),
            pl.BlockSpec((1, NJOBS * NOPS, 1), lambda b: (b, 0, 0)),
            pl.BlockSpec((1, NMACH, 1), lambda b: (b, 0, 0)),
            pl.BlockSpec((1, NJOBS, 1), lambda b: (b, 0, 0)),
            pl.BlockSpec((1, NJOBS, SOP), lambda b: (b, 0, 0)),
            pl.BlockSpec((1, 1, 2), lambda b: (b, 0, 0)),
            pl.BlockSpec((1, 1, SJOB), lambda b: (b, 0, 0)),
            pl.BlockSpec((_TOTAL_ROWS, _PACK_COLS), lambda b: (0, 0)),       # grid-resident weights
        ],
        out_specs=pl.BlockSpec((1, SJOB, LAT), lambda b: (b, 0, 0)),
        compiler_params=pltpu.CompilerParams(dimension_semantics=("parallel",)),
    )(onehot, proc, mavail, javail, opmask, scal, jmask, packed)

    situation_vector = out[:, 0, :]        # (B, L)
    jobs_transformed = out[:, 4:, :]       # (B, NJOBS, L)
    return situation_vector, jobs_transformed


# -------------------------------- parameter initialisation --------------------------------
def init_params(key):
    prm = {}
    keys = jax.random.split(key, len(PARAM_SHAPES))
    for (name, (r, c)), k in zip(PARAM_SHAPES, keys):
        if "_ln" in name and name.endswith("_g"):
            prm[name] = jnp.ones((r, c), jnp.float32)
        elif "_ln" in name and name.endswith("_b"):
            prm[name] = jnp.zeros((r, c), jnp.float32)
        else:
            scale = 0.3 / math.sqrt(r)
            prm[name] = (scale * jax.random.normal(k, (r, c))).astype(jnp.float32)
    return prm


# --------------------------------- pure-JAX reference --------------------------------------
def _ref_block(x, mask, prm, blk):
    N, T, Ld = x.shape
    Dh = Ld // NHEADS
    q = (x @ prm[f"{blk}_Wq"]).reshape(N, T, NHEADS, Dh)
    k = (x @ prm[f"{blk}_Wk"]).reshape(N, T, NHEADS, Dh)
    v = (x @ prm[f"{blk}_Wv"]).reshape(N, T, NHEADS, Dh)
    s = jnp.einsum("nqhd,nkhd->nhqk", q, k) / jnp.sqrt(jnp.float32(Dh))
    s = s + ((1.0 - mask) * -1e9)[:, None, None, :]
    w = jax.nn.softmax(s, axis=-1)
    o = jnp.einsum("nhqk,nkhd->nqhd", w, v).reshape(N, T, Ld) @ prm[f"{blk}_Wo"]
    h1 = _layernorm(x + o, prm[f"{blk}_ln1_g"][0], prm[f"{blk}_ln1_b"][0])
    ff = _gelu(h1 @ prm[f"{blk}_ff1_W"] + prm[f"{blk}_ff1_b"][0]) @ prm[f"{blk}_ff2_W"] + prm[f"{blk}_ff2_b"][0]
    return _layernorm(h1 + ff, prm[f"{blk}_ln2_g"][0], prm[f"{blk}_ln2_b"][0])


def reference_forward(op_machine_idx, proc_times, machine_avail, job_avail,
                      ops_mask, num_jobs_scalar, min_time_scalar, job_mask, prm):
    Bn = op_machine_idx.shape[0]
    mach_emb = prm["machine_table"][op_machine_idx]                              # (B,J,P,L) gather
    pos_emb = jnp.broadcast_to(prm["pos_table"][None, None], (Bn, NJOBS, NOPS, LAT))
    comb = jnp.concatenate([mach_emb, pos_emb, proc_times[..., None]], axis=-1)  # (B,J,P,2L+1)
    opc_W = jnp.concatenate([prm["opc_Wa"], prm["opc_Wb"], prm["opc_Wc"]], axis=0)
    op_emb = comb @ opc_W + prm["opc_b"][0]

    job_tok = jnp.broadcast_to(prm["job_token"][0], (Bn, NJOBS, 1, LAT))
    mao = machine_avail @ prm["mao_W"] + prm["mao_b"][0]                         # (B, L)
    mao = jnp.broadcast_to(mao[:, None, None, :], (Bn, NJOBS, 1, LAT))
    ja = job_avail[:, :, None] * prm["javail_W"][0] + prm["javail_b"][0]         # (B, J, L)

    op_seq = jnp.concatenate([job_tok, mao, ja[:, :, None, :], op_emb], axis=2)  # (B,J,SOP,L)
    x = op_seq.reshape(Bn * NJOBS, SOP, LAT)
    m = ops_mask.reshape(Bn * NJOBS, SOP)
    for blk in OP_BLOCKS:
        x = _ref_block(x, m, prm, blk)

    job_emb = (x[:, 0, :] @ prm["jemb_W"] + prm["jemb_b"][0]).reshape(Bn, NJOBS, LAT)
    njobs_emb = num_jobs_scalar * prm["njobs_W"][0] + prm["njobs_b"][0]          # (B, L)
    mintime_emb = min_time_scalar * prm["mintime_W"][0] + prm["mintime_b"][0]    # (B, L)
    mavail_emb = machine_avail @ prm["mavail_W"] + prm["mavail_b"][0]            # (B, L)
    sit = jnp.broadcast_to(prm["situation_token"][0], (Bn, LAT))

    job_seq = jnp.concatenate([sit[:, None], njobs_emb[:, None], mintime_emb[:, None],
                               mavail_emb[:, None], job_emb], axis=1)            # (B, SJOB, L)
    y = job_seq
    for blk in JOB_BLOCKS:
        y = _ref_block(y, job_mask, prm, blk)
    return y[:, 0, :], y[:, 4:, :]


# --------------------------------------- main ----------------------------------------------
if __name__ == "__main__":
    key = jax.random.PRNGKey(0)
    ks = jax.random.split(key, 6)
    op_machine_idx = jax.random.randint(ks[0], (BATCH, NJOBS, NOPS), 0, NMACH)
    proc_times = jax.random.uniform(ks[1], (BATCH, NJOBS, NOPS), jnp.float32)
    machine_avail = jax.random.uniform(ks[2], (BATCH, NMACH), jnp.float32)
    job_avail = (jax.random.uniform(ks[3], (BATCH, NJOBS), jnp.float32) > 0.3).astype(jnp.float32)
    num_jobs_scalar = jnp.full((BATCH, 1), NJOBS / 10.0, jnp.float32)
    min_time_scalar = jax.random.uniform(ks[4], (BATCH, 1), jnp.float32)

    ops_mask = jnp.ones((BATCH, NJOBS, SOP), jnp.float32)       # 1 = valid (first 3 tokens always valid)
    ops_mask = ops_mask.at[0, 2, SOP - 1].set(0.0)
    ops_mask = ops_mask.at[1, 3, SOP - 2:].set(0.0)
    job_mask = jnp.ones((BATCH, SJOB), jnp.float32)             # 1 = valid (first 4 tokens always valid)
    job_mask = job_mask.at[1, SJOB - 1].set(0.0)

    prm = init_params(jax.random.PRNGKey(42))

    sit_vec, jobs_tr = situation_network(op_machine_idx, proc_times, machine_avail, job_avail,
                                         ops_mask, num_jobs_scalar, min_time_scalar, job_mask, prm)
    sit_vec, jobs_tr = jax.block_until_ready((sit_vec, jobs_tr))

    ref_sit, ref_jobs = reference_forward(op_machine_idx, proc_times, machine_avail, job_avail,
                                          ops_mask, num_jobs_scalar, min_time_scalar, job_mask, prm)

    assert sit_vec.shape == (BATCH, LAT) and jobs_tr.shape == (BATCH, NJOBS, LAT)
    assert bool(jnp.allclose(sit_vec, ref_sit, atol=2e-2, rtol=2e-2))
    assert bool(jnp.allclose(jobs_tr, ref_jobs, atol=2e-2, rtol=2e-2))
    print("KERNEL_OK")
</pallas_src>

<mosaic_0001>
module attributes {stable_mosaic.version = 11 : i64} {
  func.func @situation_kernel(%arg0: i32, %arg1: memref<1x16x4xf32, #tpu.memory_space<vmem>>, %arg2: memref<1x16x1xf32, #tpu.memory_space<vmem>>, %arg3: memref<1x4x1xf32, #tpu.memory_space<vmem>>, %arg4: memref<1x4x1xf32, #tpu.memory_space<vmem>>, %arg5: memref<1x4x7xf32, #tpu.memory_space<vmem>>, %arg6: memref<1x1x2xf32, #tpu.memory_space<vmem>>, %arg7: memref<1x1x8xf32, #tpu.memory_space<vmem>>, %arg8: memref<904x128xf32, #tpu.memory_space<vmem>>, %arg9: memref<1x8x32xf32, #tpu.memory_space<vmem>>) attributes {dimension_semantics = [#tpu.dimension_semantics<parallel>], iteration_bounds = array<i64: 2>, scalar_prefetch = 0 : i64, scratch_operands = 0 : i64, tpu.core_type = #tpu.core_type<tc>, window_params = [{transform_indices = @transform_0, window_bounds = array<i64: 1, 16, 4>}, {transform_indices = @transform_1, window_bounds = array<i64: 1, 16, 1>}, {transform_indices = @transform_2, window_bounds = array<i64: 1, 4, 1>}, {transform_indices = @transform_3, window_bounds = array<i64: 1, 4, 1>}, {transform_indices = @transform_4, window_bounds = array<i64: 1, 4, 7>}, {transform_indices = @transform_5, window_bounds = array<i64: 1, 1, 2>}, {transform_indices = @transform_6, window_bounds = array<i64: 1, 1, 8>}, {pipeline_mode = #tpu.pipeline_mode<synchronous>, transform_indices = @transform_7, window_bounds = array<i64: 904, 128>}, {transform_indices = @transform_8, window_bounds = array<i64: 1, 8, 32>}]} {
    %c0 = arith.constant 0 : index
    %c0_0 = arith.constant 0 : index
    %c0_1 = arith.constant 0 : index
    %0 = vector.load %arg1[%c0, %c0_0, %c0_1] : memref<1x16x4xf32, #tpu.memory_space<vmem>>, vector<1x16x4xf32>
    %1 = vector.shape_cast %0 : vector<1x16x4xf32> to vector<16x4xf32>
    %c0_2 = arith.constant 0 : index
    %c0_3 = arith.constant 0 : index
    %c0_4 = arith.constant 0 : index
    %2 = vector.load %arg2[%c0_2, %c0_3, %c0_4] : memref<1x16x1xf32, #tpu.memory_space<vmem>>, vector<1x16x1xf32>
    %3 = vector.shape_cast %2 : vector<1x16x1xf32> to vector<16x1xf32>
    %c0_5 = arith.constant 0 : index
    %c0_6 = arith.constant 0 : index
    %c0_7 = arith.constant 0 : index
    %4 = vector.load %arg3[%c0_5, %c0_6, %c0_7] : memref<1x4x1xf32, #tpu.memory_space<vmem>>, vector<1x4x1xf32>
    %5 = vector.shape_cast %4 : vector<1x4x1xf32> to vector<4x1xf32>
    %c0_8 = arith.constant 0 : index
    %c0_9 = arith.constant 0 : index
    %c0_10 = arith.constant 0 : index
    %6 = vector.load %arg4[%c0_8, %c0_9, %c0_10] : memref<1x4x1xf32, #tpu.memory_space<vmem>>, vector<1x4x1xf32>
    %7 = vector.shape_cast %6 : vector<1x4x1xf32> to vector<4x1xf32>
    %c0_11 = arith.constant 0 : index
    %c0_12 = arith.constant 0 : index
    %c0_13 = arith.constant 0 : index
    %8 = vector.load %arg5[%c0_11, %c0_12, %c0_13] : memref<1x4x7xf32, #tpu.memory_space<vmem>>, vector<1x4x7xf32>
    %9 = vector.shape_cast %8 : vector<1x4x7xf32> to vector<4x7xf32>
    %c0_14 = arith.constant 0 : index
    %c0_15 = arith.constant 0 : index
    %c0_16 = arith.constant 0 : index
    %10 = vector.load %arg6[%c0_14, %c0_15, %c0_16] : memref<1x1x2xf32, #tpu.memory_space<vmem>>, vector<1x1x2xf32>
    %11 = vector.shape_cast %10 : vector<1x1x2xf32> to vector<1x2xf32>
    %c0_17 = arith.constant 0 : index
    %c0_18 = arith.constant 0 : index
    %c0_19 = arith.constant 0 : index
    %12 = vector.load %arg7[%c0_17, %c0_18, %c0_19] : memref<1x1x8xf32, #tpu.memory_space<vmem>>, vector<1x1x8xf32>
    %13 = vector.shape_cast %12 : vector<1x1x8xf32> to vector<1x8xf32>
    %c0_20 = arith.constant 0 : index
    %c0_21 = arith.constant 0 : index
    %14 = vector.load %arg8[%c0_20, %c0_21] : memref<904x128xf32, #tpu.memory_space<vmem>>, vector<4x32xf32>
    %cst = arith.constant dense<0.000000e+00> : vector<16x32xf32>
    %15 = tpu.matmul %1, %14, %cst {dimension_numbers = #tpu.dot_dimension_numbers<[1], [0], [0], [1], [0, 0, 1, 1], [], []>} : vector<16x4xf32>, vector<4x32xf32>, vector<16x32xf32> -> vector<16x32xf32>
    %c32 = arith.constant 32 : index
    %c0_22 = arith.constant 0 : index
    %16 = vector.load %arg8[%c32, %c0_22] : memref<904x128xf32, #tpu.memory_space<vmem>>, vector<32x32xf32>
    %cst_23 = arith.constant dense<0.000000e+00> : vector<16x32xf32>
    %17 = tpu.matmul %15, %16, %cst_23 {dimension_numbers = #tpu.dot_dimension_numbers<[1], [0], [0], [1], [0, 0, 1, 1], [], []>} : vector<16x32xf32>, vector<32x32xf32>, vector<16x32xf32> -> vector<16x32xf32>
    %c96 = arith.constant 96 : index
    %c0_24 = arith.constant 0 : index
    %18 = vector.load %arg8[%c96, %c0_24] : memref<904x128xf32, #tpu.memory_space<vmem>>, vector<1x32xf32>
    %19 = vector.broadcast %3 : vector<16x1xf32> to vector<16x32xf32>
    %20 = vector.broadcast %18 : vector<1x32xf32> to vector<16x32xf32>
    %21 = arith.mulf %19, %20 : vector<16x32xf32>
    %22 = arith.addf %17, %21 : vector<16x32xf32>
    %c104 = arith.constant 104 : index
    %c0_25 = arith.constant 0 : index
    %23 = vector.load %arg8[%c104, %c0_25] : memref<904x128xf32, #tpu.memory_space<vmem>>, vector<1x32xf32>
    %24 = vector.broadcast %23 : vector<1x32xf32> to vector<16x32xf32>
    %25 = arith.addf %22, %24 : vector<16x32xf32>
    %c8 = arith.constant 8 : index
    %c0_26 = arith.constant 0 : index
    %26 = vector.load %arg8[%c8, %c0_26] : memref<904x128xf32, #tpu.memory_space<vmem>>, vector<4x32xf32>
    %c64 = arith.constant 64 : index
    %c0_27 = arith.constant 0 : index
    %27 = vector.load %arg8[%c64, %c0_27] : memref<904x128xf32, #tpu.memory_space<vmem>>, vector<32x32xf32>
    %cst_28 = arith.constant dense<0.000000e+00> : vector<4x32xf32>
    %28 = tpu.matmul %26, %27, %cst_28 {dimension_numbers = #tpu.dot_dimension_numbers<[1], [0], [0], [1], [0, 0, 1, 1], [], []>} : vector<4x32xf32>, vector<32x32xf32>, vector<4x32xf32> -> vector<4x32xf32>
    %29 = vector.shape_cast %25 : vector<16x32xf32> to vector<4x4x32xf32>
    %30 = vector.shape_cast %28 : vector<4x32xf32> to vector<1x4x32xf32>
    %31 = vector.broadcast %30 : vector<1x4x32xf32> to vector<4x4x32xf32>
    %32 = arith.addf %29, %31 : vector<4x4x32xf32>
    %c16 = arith.constant 16 : index
    %c0_29 = arith.constant 0 : index
    %33 = vector.load %arg8[%c16, %c0_29] : memref<904x128xf32, #tpu.memory_space<vmem>>, vector<1x32xf32>
    %34 = vector.shape_cast %33 : vector<1x32xf32> to vector<1x32xf32>
    %35 = vector.broadcast %34 : vector<1x32xf32> to vector<4x32xf32>
    %c112 = arith.constant 112 : index
    %c0_30 = arith.constant 0 : index
    %36 = vector.load %arg8[%c112, %c0_30] : memref<904x128xf32, #tpu.memory_space<vmem>>, vector<4x32xf32>
    %37 = vector.broadcast %5 : vector<4x1xf32> to vector<4x32xf32>
    %38 = arith.mulf %37, %36 : vector<4x32xf32>
    %cst_31 = arith.constant dense<0.000000e+00> : vector<32xf32>
    %39 = vector.multi_reduction <add>, %38, %cst_31 [0] : vector<4x32xf32> to vector<32xf32>
    %40 = vector.shape_cast %39 : vector<32xf32> to vector<1x32xf32>
    %c120 = arith.constant 120 : index
    %c0_32 = arith.constant 0 : index
    %41 = vector.load %arg8[%c120, %c0_32] : memref<904x128xf32, #tpu.memory_space<vmem>>, vector<1x32xf32>
    %42 = arith.addf %40, %41 : vector<1x32xf32>
    %43 = vector.shape_cast %42 : vector<1x32xf32> to vector<1x32xf32>
    %44 = vector.broadcast %43 : vector<1x32xf32> to vector<4x32xf32>
    %c128 = arith.constant 128 : index
    %c0_33 = arith.constant 0 : index
    %45 = vector.load %arg8[%c128, %c0_33] : memref<904x128xf32, #tpu.memory_space<vmem>>, vector<1x32xf32>
    %46 = vector.broadcast %7 : vector<4x1xf32> to vector<4x32xf32>
    %47 = vector.broadcast %45 : vector<1x32xf32> to vector<4x32xf32>
    %48 = arith.mulf %46, %47 : vector<4x32xf32>
    %c136 = arith.constant 136 : index
    %c0_34 = arith.constant 0 : index
    %49 = vector.load %arg8[%c136, %c0_34] : memref<904x128xf32, #tpu.memory_space<vmem>>, vector<1x32xf32>
    %50 = vector.broadcast %49 : vector<1x32xf32> to vector<4x32xf32>
    %51 = arith.addf %48, %50 : vector<4x32xf32>
    %52 = vector.shape_cast %35 : vector<4x32xf32> to vector<4x1x32xf32>
    %53 = vector.shape_cast %44 : vector<4x32xf32> to vector<4x1x32xf32>
    %54 = vector.shape_cast %51 : vector<4x32xf32> to vector<4x1x32xf32>
    %55 = tpu.concatenate %52, %53, %54, %32 in 1 : vector<4x1x32xf32>, vector<4x1x32xf32>, vector<4x1x32xf32>, vector<4x4x32xf32> -> vector<4x7x32xf32>
    %56 = vector.shape_cast %55 : vector<4x7x32xf32> to vector<28x32xf32>
    %c232 = arith.constant 232 : index
    %c0_35 = arith.constant 0 : index
    %57 = vector.load %arg8[%c232, %c0_35] : memref<904x128xf32, #tpu.memory_space<vmem>>, vector<32x32xf32>
    %cst_36 = arith.constant dense<0.000000e+00> : vector<28x32xf32>
    %58 = tpu.matmul %56, %57, %cst_36 {dimension_numbers = #tpu.dot_dimension_numbers<[1], [0], [0], [1], [0, 0, 1, 1], [], []>} : vector<28x32xf32>, vector<32x32xf32>, vector<28x32xf32> -> vector<28x32xf32>
    %59 = vector.shape_cast %58 : vector<28x32xf32> to vector<4x7x32xf32>
    %c264 = arith.constant 264 : index
    %c0_37 = arith.constant 0 : index
    %60 = vector.load %arg8[%c264, %c0_37] : memref<904x128xf32, #tpu.memory_space<vmem>>, vector<32x32xf32>
    %cst_38 = arith.constant dense<0.000000e+00> : vector<28x32xf32>
    %61 = tpu.matmul %56, %60, %cst_38 {dimension_numbers = #tpu.dot_dimension_numbers<[1], [0], [0], [1], [0, 0, 1, 1], [], []>} : vector<28x32xf32>, vector<32x32xf32>, vector<28x32xf32> -> vector<28x32xf32>
    %62 = vector.shape_cast %61 : vector<28x32xf32> to vector<4x7x32xf32>
    %c296 = arith.constant 296 : index
    %c0_39 = arith.constant 0 : index
    %63 = vector.load %arg8[%c296, %c0_39] : memref<904x128xf32, #tpu.memory_space<vmem>>, vector<32x32xf32>
    %cst_40 = arith.constant dense<0.000000e+00> : vector<28x32xf32>
    %64 = tpu.matmul %56, %63, %cst_40 {dimension_numbers = #tpu.dot_dimension_numbers<[1], [0], [0], [1], [0, 0, 1, 1], [], []>} : vector<28x32xf32>, vector<32x32xf32>, vector<28x32xf32> -> vector<28x32xf32>
    %65 = vector.shape_cast %64 : vector<28x32xf32> to vector<4x7x32xf32>
    %cst_41 = arith.constant 1.000000e+00 : f32
    %66 = vector.broadcast %cst_41 : f32 to vector<4x7xf32>
    %67 = arith.subf %66, %9 : vector<4x7xf32>
    %cst_42 = arith.constant -1.000000e+09 : f32
    %68 = vector.broadcast %cst_42 : f32 to vector<4x7xf32>
    %69 = arith.mulf %67, %68 : vector<4x7xf32>
    %70 = vector.shape_cast %69 : vector<4x7xf32> to vector<4x1x7xf32>
    %c328 = arith.constant 328 : index
    %c0_43 = arith.constant 0 : index
    %71 = vector.load %arg8[%c328, %c0_43] : memref<904x128xf32, #tpu.memory_space<vmem>>, vector<32x32xf32>
    %cst_44 = arith.constant 0.000000e+00 : f32
    %72 = vector.broadcast %cst_44 : f32 to vector<28x32xf32>
    %73 = vector.extract_strided_slice %59 {offsets = [0, 0, 0], sizes = [4, 7, 16], strides = [1, 1, 1]} : vector<4x7x32xf32> to vector<4x7x16xf32>
    %74 = vector.extract_strided_slice %62 {offsets = [0, 0, 0], sizes = [4, 7, 16], strides = [1, 1, 1]} : vector<4x7x32xf32> to vector<4x7x16xf32>
    "tpu.trace_start"() <{level = 10 : i32, message = "nqd,nkd->nqk"}> : () -> ()
    %cst_45 = arith.constant dense<0.000000e+00> : vector<4x7x7xf32>
    %75 = tpu.matmul %73, %74, %cst_45 {dimension_numbers = #tpu.dot_dimension_numbers<[2], [2], [1], [1], [0, 0, 0, 1, 1, 1], [0], [0]>} : vector<4x7x16xf32>, vector<4x7x16xf32>, vector<4x7x7xf32> -> vector<4x7x7xf32>
    "tpu.trace_stop"() : () -> ()
    %cst_46 = arith.constant 2.500000e-01 : f32
    %76 = vector.broadcast %cst_46 : f32 to vector<4x7x7xf32>
    %77 = arith.mulf %75, %76 : vector<4x7x7xf32>
    %78 = vector.broadcast %70 : vector<4x1x7xf32> to vector<4x7x7xf32>
    %79 = arith.addf %77, %78 : vector<4x7x7xf32>
    %cst_47 = arith.constant dense<0xFF800000> : vector<4x7xf32>
    %80 = vector.multi_reduction <maximumf>, %79, %cst_47 [2] : vector<4x7x7xf32> to vector<4x7xf32>
    %81 = vector.shape_cast %80 : vector<4x7xf32> to vector<4x7x1xf32>
    %82 = vector.broadcast %81 : vector<4x7x1xf32> to vector<4x7x7xf32>
    %83 = arith.subf %79, %82 : vector<4x7x7xf32>
    %84 = math.exp %83 : vector<4x7x7xf32>
    %cst_48 = arith.constant dense<0.000000e+00> : vector<4x7xf32>
    %85 = vector.multi_reduction <add>, %84, %cst_48 [2] : vector<4x7x7xf32> to vector<4x7xf32>
    %86 = vector.shape_cast %85 : vector<4x7xf32> to vector<4x7x1xf32>
    %87 = tpu.reciprocal %86 {approx = true} : vector<4x7x1xf32> -> vector<4x7x1xf32>
    %88 = vector.broadcast %87 : vector<4x7x1xf32> to vector<4x7x7xf32>
    %89 = arith.mulf %84, %88 : vector<4x7x7xf32>
    %90 = vector.extract_strided_slice %65 {offsets = [0, 0, 0], sizes = [4, 7, 16], strides = [1, 1, 1]} : vector<4x7x32xf32> to vector<4x7x16xf32>
    "tpu.trace_start"() <{level = 10 : i32, message = "nqk,nkd->nqd"}> : () -> ()
    %cst_49 = arith.constant dense<0.000000e+00> : vector<4x7x16xf32>
    %91 = tpu.matmul %89, %90, %cst_49 {dimension_numbers = #tpu.dot_dimension_numbers<[2], [1], [1], [2], [0, 0, 0, 1, 1, 2], [0], [0]>} : vector<4x7x7xf32>, vector<4x7x16xf32>, vector<4x7x16xf32> -> vector<4x7x16xf32>
    "tpu.trace_stop"() : () -> ()
    %92 = vector.shape_cast %91 : vector<4x7x16xf32> to vector<28x16xf32>
    %93 = vector.extract_strided_slice %71 {offsets = [0, 0], sizes = [16, 32], strides = [1, 1]} : vector<32x32xf32> to vector<16x32xf32>
    %cst_50 = arith.constant dense<0.000000e+00> : vector<28x32xf32>
    %94 = tpu.matmul %92, %93, %cst_50 {dimension_numbers = #tpu.dot_dimension_numbers<[1], [0], [0], [1], [0, 0, 1, 1], [], []>} : vector<28x16xf32>, vector<16x32xf32>, vector<28x32xf32> -> vector<28x32xf32>
    %95 = arith.addf %72, %94 : vector<28x32xf32>
    %96 = vector.extract_strided_slice %59 {offsets = [0, 0, 16], sizes = [4, 7, 16], strides = [1, 1, 1]} : vector<4x7x32xf32> to vector<4x7x16xf32>
    %97 = vector.extract_strided_slice %62 {offsets = [0, 0, 16], sizes = [4, 7, 16], strides = [1, 1, 1]} : vector<4x7x32xf32> to vector<4x7x16xf32>
    "tpu.trace_start"() <{level = 10 : i32, message = "nqd,nkd->nqk"}> : () -> ()
    %cst_51 = arith.constant dense<0.000000e+00> : vector<4x7x7xf32>
    %98 = tpu.matmul %96, %97, %cst_51 {dimension_numbers = #tpu.dot_dimension_numbers<[2], [2], [1], [1], [0, 0, 0, 1, 1, 1], [0], [0]>} : vector<4x7x16xf32>, vector<4x7x16xf32>, vector<4x7x7xf32> -> vector<4x7x7xf32>
    "tpu.trace_stop"() : () -> ()
    %cst_52 = arith.constant 2.500000e-01 : f32
    %99 = vector.broadcast %cst_52 : f32 to vector<4x7x7xf32>
    %100 = arith.mulf %98, %99 : vector<4x7x7xf32>
    %101 = vector.broadcast %70 : vector<4x1x7xf32> to vector<4x7x7xf32>
    %102 = arith.addf %100, %101 : vector<4x7x7xf32>
    %cst_53 = arith.constant dense<0xFF800000> : vector<4x7xf32>
    %103 = vector.multi_reduction <maximumf>, %102, %cst_53 [2] : vector<4x7x7xf32> to vector<4x7xf32>
    %104 = vector.shape_cast %103 : vector<4x7xf32> to vector<4x7x1xf32>
    %105 = vector.broadcast %104 : vector<4x7x1xf32> to vector<4x7x7xf32>
    %106 = arith.subf %102, %105 : vector<4x7x7xf32>
    %107 = math.exp %106 : vector<4x7x7xf32>
    %cst_54 = arith.constant dense<0.000000e+00> : vector<4x7xf32>
    %108 = vector.multi_reduction <add>, %107, %cst_54 [2] : vector<4x7x7xf32> to vector<4x7xf32>
    %109 = vector.shape_cast %108 : vector<4x7xf32> to vector<4x7x1xf32>
    %110 = tpu.reciprocal %109 {approx = true} : vector<4x7x1xf32> -> vector<4x7x1xf32>
    %111 = vector.broadcast %110 : vector<4x7x1xf32> to vector<4x7x7xf32>
    %112 = arith.mulf %107, %111 : vector<4x7x7xf32>
    %113 = vector.extract_strided_slice %65 {offsets = [0, 0, 16], sizes = [4, 7, 16], strides = [1, 1, 1]} : vector<4x7x32xf32> to vector<4x7x16xf32>
    "tpu.trace_start"() <{level = 10 : i32, message = "nqk,nkd->nqd"}> : () -> ()
    %cst_55 = arith.constant dense<0.000000e+00> : vector<4x7x16xf32>
    %114 = tpu.matmul %112, %113, %cst_55 {dimension_numbers = #tpu.dot_dimension_numbers<[2], [1], [1], [2], [0, 0, 0, 1, 1, 2], [0], [0]>} : vector<4x7x7xf32>, vector<4x7x16xf32>, vector<4x7x16xf32> -> vector<4x7x16xf32>
    "tpu.trace_stop"() : () -> ()
    %115 = vector.shape_cast %114 : vector<4x7x16xf32> to vector<28x16xf32>
    %116 = vector.extract_strided_slice %71 {offsets = [16, 0], sizes = [16, 32], strides = [1, 1]} : vector<32x32xf32> to vector<16x32xf32>
    %cst_56 = arith.constant dense<0.000000e+00> : vector<28x32xf32>
    %117 = tpu.matmul %115, %116, %cst_56 {dimension_numbers = #tpu.dot_dimension_numbers<[1], [0], [0], [1], [0, 0, 1, 1], [], []>} : vector<28x16xf32>, vector<16x32xf32>, vector<28x32xf32> -> vector<28x32xf32>
    %118 = arith.addf %95, %117 : vector<28x32xf32>
    %119 = arith.addf %56, %118 : vector<28x32xf32>
    %c360 = arith.constant 360 : index
    %c0_57 = arith.constant 0 : index
    %120 = vector.load %arg8[%c360, %c0_57] : memref<904x128xf32, #tpu.memory_space<vmem>>, vector<1x32xf32>
    %c368 = arith.constant 368 : index
    %c0_58 = arith.constant 0 : index
    %121 = vector.load %arg8[%c368, %c0_58] : memref<904x128xf32, #tpu.memory_space<vmem>>, vector<1x32xf32>
    %cst_59 = arith.constant dense<0.000000e+00> : vector<28xf32>
    %122 = vector.multi_reduction <add>, %119, %cst_59 [1] : vector<28x32xf32> to vector<28xf32>
    %123 = vector.shape_cast %122 : vector<28xf32> to vector<28x1xf32>
    %cst_60 = arith.constant 3.200000e+01 : f32
    %124 = vector.broadcast %cst_60 : f32 to vector<28x1xf32>
    %125 = arith.divf %123, %124 : vector<28x1xf32>
    %126 = vector.broadcast %125 : vector<28x1xf32> to vector<28x32xf32>
    %127 = arith.subf %119, %126 : vector<28x32xf32>
    %128 = arith.mulf %127, %127 : vector<28x32xf32>
    %cst_61 = arith.constant dense<0.000000e+00> : vector<28xf32>
    %129 = vector.multi_reduction <add>, %128, %cst_61 [1] : vector<28x32xf32> to vector<28xf32>
    %130 = vector.shape_cast %129 : vector<28xf32> to vector<28x1xf32>
    %cst_62 = arith.constant 3.200000e+01 : f32
    %131 = vector.broadcast %cst_62 : f32 to vector<28x1xf32>
    %132 = arith.divf %130, %131 : vector<28x1xf32>
    %cst_63 = arith.constant 9.99999974E-6 : f32
    %133 = vector.broadcast %cst_63 : f32 to vector<28x1xf32>
    %134 = arith.addf %132, %133 : vector<28x1xf32>
    %135 = math.rsqrt %134 : vector<28x1xf32>
    %136 = vector.broadcast %135 : vector<28x1xf32> to vector<28x32xf32>
    %137 = arith.mulf %127, %136 : vector<28x32xf32>
    %138 = vector.broadcast %120 : vector<1x32xf32> to vector<28x32xf32>
    %139 = arith.mulf %137, %138 : vector<28x32xf32>
    %140 = vector.broadcast %121 : vector<1x32xf32> to vector<28x32xf32>
    %141 = arith.addf %139, %140 : vector<28x32xf32>
    %c376 = arith.constant 376 : index
    %c0_64 = arith.constant 0 : index
    %142 = vector.load %arg8[%c376, %c0_64] : memref<904x128xf32, #tpu.memory_space<vmem>>, vector<32x128xf32>
    %cst_65 = arith.constant dense<0.000000e+00> : vector<28x128xf32>
    %143 = tpu.matmul %141, %142, %cst_65 {dimension_numbers = #tpu.dot_dimension_numbers<[1], [0], [0], [1], [0, 0, 1, 1], [], []>} : vector<28x32xf32>, vector<32x128xf32>, vector<28x128xf32> -> vector<28x128xf32>
    %c408 = arith.constant 408 : index
    %c0_66 = arith.constant 0 : index
    %144 = vector.load %arg8[%c408, %c0_66] : memref<904x128xf32, #tpu.memory_space<vmem>>, vector<1x128xf32>
    %145 = vector.broadcast %144 : vector<1x128xf32> to vector<28x128xf32>
    %146 = arith.addf %143, %145 : vector<28x128xf32>
    %cst_67 = arith.constant 5.000000e-01 : f32
    %147 = vector.broadcast %cst_67 : f32 to vector<28x128xf32>
    %148 = arith.mulf %147, %146 : vector<28x128xf32>
    %cst_68 = arith.constant 4.471500e-02 : f32
    %149 = vector.broadcast %cst_68 : f32 to vector<28x128xf32>
    %150 = arith.mulf %149, %146 : vector<28x128xf32>
    %151 = arith.mulf %150, %146 : vector<28x128xf32>
    %152 = arith.mulf %151, %146 : vector<28x128xf32>
    %153 = arith.addf %146, %152 : vector<28x128xf32>
    %cst_69 = arith.constant 0.797884583 : f32
    %154 = vector.broadcast %cst_69 : f32 to vector<28x128xf32>
    %155 = arith.mulf %154, %153 : vector<28x128xf32>
    %156 = math.tanh %155 : vector<28x128xf32>
    %cst_70 = arith.constant 1.000000e+00 : f32
    %157 = vector.broadcast %cst_70 : f32 to vector<28x128xf32>
    %158 = arith.addf %157, %156 : vector<28x128xf32>
    %159 = arith.mulf %148, %158 : vector<28x128xf32>
    %c416 = arith.constant 416 : index
    %c0_71 = arith.constant 0 : index
    %160 = vector.load %arg8[%c416, %c0_71] : memref<904x128xf32, #tpu.memory_space<vmem>>, vector<128x32xf32>
    %cst_72 = arith.constant dense<0.000000e+00> : vector<28x32xf32>
    %161 = tpu.matmul %159, %160, %cst_72 {dimension_numbers = #tpu.dot_dimension_numbers<[1], [0], [0], [1], [0, 0, 1, 1], [], []>} : vector<28x128xf32>, vector<128x32xf32>, vector<28x32xf32> -> vector<28x32xf32>
    %c544 = arith.constant 544 : index
    %c0_73 = arith.constant 0 : index
    %162 = vector.load %arg8[%c544, %c0_73] : memref<904x128xf32, #tpu.memory_space<vmem>>, vector<1x32xf32>
    %163 = vector.broadcast %162 : vector<1x32xf32> to vector<28x32xf32>
    %164 = arith.addf %161, %163 : vector<28x32xf32>
    %165 = arith.addf %141, %164 : vector<28x32xf32>
    %c552 = arith.constant 552 : index
    %c0_74 = arith.constant 0 : index
    %166 = vector.load %arg8[%c552, %c0_74] : memref<904x128xf32, #tpu.memory_space<vmem>>, vector<1x32xf32>
    %c560 = arith.constant 560 : index
    %c0_75 = arith.constant 0 : index
    %167 = vector.load %arg8[%c560, %c0_75] : memref<904x128xf32, #tpu.memory_space<vmem>>, vector<1x32xf32>
    %cst_76 = arith.constant dense<0.000000e+00> : vector<28xf32>
    %168 = vector.multi_reduction <add>, %165, %cst_76 [1] : vector<28x32xf32> to vector<28xf32>
    %169 = vector.shape_cast %168 : vector<28xf32> to vector<28x1xf32>
    %cst_77 = arith.constant 3.200000e+01 : f32
    %170 = vector.broadcast %cst_77 : f32 to vector<28x1xf32>
    %171 = arith.divf %169, %170 : vector<28x1xf32>
    %172 = vector.broadcast %171 : vector<28x1xf32> to vector<28x32xf32>
    %173 = arith.subf %165, %172 : vector<28x32xf32>
    %174 = arith.mulf %173, %173 : vector<28x32xf32>
    %cst_78 = arith.constant dense<0.000000e+00> : vector<28xf32>
    %175 = vector.multi_reduction <add>, %174, %cst_78 [1] : vector<28x32xf32> to vector<28xf32>
    %176 = vector.shape_cast %175 : vector<28xf32> to vector<28x1xf32>
    %cst_79 = arith.constant 3.200000e+01 : f32
    %177 = vector.broadcast %cst_79 : f32 to vector<28x1xf32>
    %178 = arith.divf %176, %177 : vector<28x1xf32>
    %cst_80 = arith.constant 9.99999974E-6 : f32
    %179 = vector.broadcast %cst_80 : f32 to vector<28x1xf32>
    %180 = arith.addf %178, %179 : vector<28x1xf32>
    %181 = math.rsqrt %180 : vector<28x1xf32>
    %182 = vector.broadcast %181 : vector<28x1xf32> to vector<28x32xf32>
    %183 = arith.mulf %173, %182 : vector<28x32xf32>
    %184 = vector.broadcast %166 : vector<1x32xf32> to vector<28x32xf32>
    %185 = arith.mulf %183, %184 : vector<28x32xf32>
    %186 = vector.broadcast %167 : vector<1x32xf32> to vector<28x32xf32>
    %187 = arith.addf %185, %186 : vector<28x32xf32>
    %188 = vector.shape_cast %187 : vector<28x32xf32> to vector<4x7x32xf32>
    %189 = vector.extract_strided_slice %188 {offsets = [0, 0, 0], sizes = [4, 1, 32], strides = [1, 1, 1]} : vector<4x7x32xf32> to vector<4x1x32xf32>
    %190 = vector.shape_cast %189 : vector<4x1x32xf32> to vector<4x32xf32>
    %c144 = arith.constant 144 : index
    %c0_81 = arith.constant 0 : index
    %191 = vector.load %arg8[%c144, %c0_81] : memref<904x128xf32, #tpu.memory_space<vmem>>, vector<32x32xf32>
    %cst_82 = arith.constant dense<0.000000e+00> : vector<4x32xf32>
    %192 = tpu.matmul %190, %191, %cst_82 {dimension_numbers = #tpu.dot_dimension_numbers<[1], [0], [0], [1], [0, 0, 1, 1], [], []>} : vector<4x32xf32>, vector<32x32xf32>, vector<4x32xf32> -> vector<4x32xf32>
    %c176 = arith.constant 176 : index
    %c0_83 = arith.constant 0 : index
    %193 = vector.load %arg8[%c176, %c0_83] : memref<904x128xf32, #tpu.memory_space<vmem>>, vector<1x32xf32>
    %194 = vector.broadcast %193 : vector<1x32xf32> to vector<4x32xf32>
    %195 = arith.addf %192, %194 : vector<4x32xf32>
    %196 = vector.extract_strided_slice %11 {offsets = [0, 0], sizes = [1, 1], strides = [1, 1]} : vector<1x2xf32> to vector<1x1xf32>
    %c184 = arith.constant 184 : index
    %c0_84 = arith.constant 0 : index
    %197 = vector.load %arg8[%c184, %c0_84] : memref<904x128xf32, #tpu.memory_space<vmem>>, vector<1x32xf32>
    %198 = vector.broadcast %196 : vector<1x1xf32> to vector<1x32xf32>
    %199 = arith.mulf %198, %197 : vector<1x32xf32>
    %c192 = arith.constant 192 : index
    %c0_85 = arith.constant 0 : index
    %200 = vector.load %arg8[%c192, %c0_85] : memref<904x128xf32, #tpu.memory_space<vmem>>, vector<1x32xf32>
    %201 = arith.addf %199, %200 : vector<1x32xf32>
    %202 = vector.extract_strided_slice %11 {offsets = [0, 1], sizes = [1, 1], strides = [1, 1]} : vector<1x2xf32> to vector<1x1xf32>
    %c200 = arith.constant 200 : index
    %c0_86 = arith.constant 0 : index
    %203 = vector.load %arg8[%c200, %c0_86] : memref<904x128xf32, #tpu.memory_space<vmem>>, vector<1x32xf32>
    %204 = vector.broadcast %202 : vector<1x1xf32> to vector<1x32xf32>
    %205 = arith.mulf %204, %203 : vector<1x32xf32>
    %c208 = arith.constant 208 : index
    %c0_87 = arith.constant 0 : index
    %206 = vector.load %arg8[%c208, %c0_87] : memref<904x128xf32, #tpu.memory_space<vmem>>, vector<1x32xf32>
    %207 = arith.addf %205, %206 : vector<1x32xf32>
    %c216 = arith.constant 216 : index
    %c0_88 = arith.constant 0 : index
    %208 = vector.load %arg8[%c216, %c0_88] : memref<904x128xf32, #tpu.memory_space<vmem>>, vector<4x32xf32>
    %209 = vector.broadcast %5 : vector<4x1xf32> to vector<4x32xf32>
    %210 = arith.mulf %209, %208 : vector<4x32xf32>
    %cst_89 = arith.constant dense<0.000000e+00> : vector<32xf32>
    %211 = vector.multi_reduction <add>, %210, %cst_89 [0] : vector<4x32xf32> to vector<32xf32>
    %212 = vector.shape_cast %211 : vector<32xf32> to vector<1x32xf32>
    %c224 = arith.constant 224 : index
    %c0_90 = arith.constant 0 : index
    %213 = vector.load %arg8[%c224, %c0_90] : memref<904x128xf32, #tpu.memory_space<vmem>>, vector<1x32xf32>
    %214 = arith.addf %212, %213 : vector<1x32xf32>
    %c24 = arith.constant 24 : index
    %c0_91 = arith.constant 0 : index
    %215 = vector.load %arg8[%c24, %c0_91] : memref<904x128xf32, #tpu.memory_space<vmem>>, vector<1x32xf32>
    %216 = tpu.concatenate %215, %201, %207, %214, %195 in 0 : vector<1x32xf32>, vector<1x32xf32>, vector<1x32xf32>, vector<1x32xf32>, vector<4x32xf32> -> vector<8x32xf32>
    %217 = vector.shape_cast %216 : vector<8x32xf32> to vector<1x8x32xf32>
    %218 = vector.shape_cast %217 : vector<1x8x32xf32> to vector<8x32xf32>
    %c568 = arith.constant 568 : index
    %c0_92 = arith.constant 0 : index
    %219 = vector.load %arg8[%c568, %c0_92] : memref<904x128xf32, #tpu.memory_space<vmem>>, vector<32x32xf32>
    %cst_93 = arith.constant dense<0.000000e+00> : vector<8x32xf32>
    %220 = tpu.matmul %218, %219, %cst_93 {dimension_numbers = #tpu.dot_dimension_numbers<[1], [0], [0], [1], [0, 0, 1, 1], [], []>} : vector<8x32xf32>, vector<32x32xf32>, vector<8x32xf32> -> vector<8x32xf32>
    %221 = vector.shape_cast %220 : vector<8x32xf32> to vector<1x8x32xf32>
    %c600 = arith.constant 600 : index
    %c0_94 = arith.constant 0 : index
    %222 = vector.load %arg8[%c600, %c0_94] : memref<904x128xf32, #tpu.memory_space<vmem>>, vector<32x32xf32>
    %cst_95 = arith.constant dense<0.000000e+00> : vector<8x32xf32>
    %223 = tpu.matmul %218, %222, %cst_95 {dimension_numbers = #tpu.dot_dimension_numbers<[1], [0], [0], [1], [0, 0, 1, 1], [], []>} : vector<8x32xf32>, vector<32x32xf32>, vector<8x32xf32> -> vector<8x32xf32>
    %224 = vector.shape_cast %223 : vector<8x32xf32> to vector<1x8x32xf32>
    %c632 = arith.constant 632 : index
    %c0_96 = arith.constant 0 : index
    %225 = vector.load %arg8[%c632, %c0_96] : memref<904x128xf32, #tpu.memory_space<vmem>>, vector<32x32xf32>
    %cst_97 = arith.constant dense<0.000000e+00> : vector<8x32xf32>
    %226 = tpu.matmul %218, %225, %cst_97 {dimension_numbers = #tpu.dot_dimension_numbers<[1], [0], [0], [1], [0, 0, 1, 1], [], []>} : vector<8x32xf32>, vector<32x32xf32>, vector<8x32xf32> -> vector<8x32xf32>
    %227 = vector.shape_cast %226 : vector<8x32xf32> to vector<1x8x32xf32>
    %cst_98 = arith.constant 1.000000e+00 : f32
    %228 = vector.broadcast %cst_98 : f32 to vector<1x8xf32>
    %229 = arith.subf %228, %13 : vector<1x8xf32>
    %cst_99 = arith.constant -1.000000e+09 : f32
    %230 = vector.broadcast %cst_99 : f32 to vector<1x8xf32>
    %231 = arith.mulf %229, %230 : vector<1x8xf32>
    %232 = vector.shape_cast %231 : vector<1x8xf32> to vector<1x1x8xf32>
    %c664 = arith.constant 664 : index
    %c0_100 = arith.constant 0 : index
    %233 = vector.load %arg8[%c664, %c0_100] : memref<904x128xf32, #tpu.memory_space<vmem>>, vector<32x32xf32>
    %cst_101 = arith.constant 0.000000e+00 : f32
    %234 = vector.broadcast %cst_101 : f32 to vector<8x32xf32>
    %235 = vector.extract_strided_slice %221 {offsets = [0, 0, 0], sizes = [1, 8, 16], strides = [1, 1, 1]} : vector<1x8x32xf32> to vector<1x8x16xf32>
    %236 = vector.extract_strided_slice %224 {offsets = [0, 0, 0], sizes = [1, 8, 16], strides = [1, 1, 1]} : vector<1x8x32xf32> to vector<1x8x16xf32>
    "tpu.trace_start"() <{level = 10 : i32, message = "nqd,nkd->nqk"}> : () -> ()
    %cst_102 = arith.constant dense<0.000000e+00> : vector<1x8x8xf32>
    %237 = tpu.matmul %235, %236, %cst_102 {dimension_numbers = #tpu.dot_dimension_numbers<[2], [2], [1], [1], [0, 0, 0, 1, 1, 1], [0], [0]>} : vector<1x8x16xf32>, vector<1x8x16xf32>, vector<1x8x8xf32> -> vector<1x8x8xf32>
    "tpu.trace_stop"() : () -> ()
    %cst_103 = arith.constant 2.500000e-01 : f32
    %238 = vector.broadcast %cst_103 : f32 to vector<1x8x8xf32>
    %239 = arith.mulf %237, %238 : vector<1x8x8xf32>
    %240 = vector.broadcast %232 : vector<1x1x8xf32> to vector<1x8x8xf32>
    %241 = arith.addf %239, %240 : vector<1x8x8xf32>
    %cst_104 = arith.constant dense<0xFF800000> : vector<1x8xf32>
    %242 = vector.multi_reduction <maximumf>, %241, %cst_104 [2] : vector<1x8x8xf32> to vector<1x8xf32>
    %243 = vector.shape_cast %242 : vector<1x8xf32> to vector<1x8x1xf32>
    %244 = vector.broadcast %243 : vector<1x8x1xf32> to vector<1x8x8xf32>
    %245 = arith.subf %241, %244 : vector<1x8x8xf32>
    %246 = math.exp %245 : vector<1x8x8xf32>
    %cst_105 = arith.constant dense<0.000000e+00> : vector<1x8xf32>
    %247 = vector.multi_reduction <add>, %246, %cst_105 [2] : vector<1x8x8xf32> to vector<1x8xf32>
    %248 = vector.shape_cast %247 : vector<1x8xf32> to vector<1x8x1xf32>
    %249 = tpu.reciprocal %248 {approx = true} : vector<1x8x1xf32> -> vector<1x8x1xf32>
    %250 = vector.broadcast %249 : vector<1x8x1xf32> to vector<1x8x8xf32>
    %251 = arith.mulf %246, %250 : vector<1x8x8xf32>
    %252 = vector.extract_strided_slice %227 {offsets = [0, 0, 0], sizes = [1, 8, 16], strides = [1, 1, 1]} : vector<1x8x32xf32> to vector<1x8x16xf32>
    "tpu.trace_start"() <{level = 10 : i32, message = "nqk,nkd->nqd"}> : () -> ()
    %cst_106 = arith.constant dense<0.000000e+00> : vector<1x8x16xf32>
    %253 = tpu.matmul %251, %252, %cst_106 {dimension_numbers = #tpu.dot_dimension_numbers<[2], [1], [1], [2], [0, 0, 0, 1, 1, 2], [0], [0]>} : vector<1x8x8xf32>, vector<1x8x16xf32>, vector<1x8x16xf32> -> vector<1x8x16xf32>
    "tpu.trace_stop"() : () -> ()
    %254 = vector.shape_cast %253 : vector<1x8x16xf32> to vector<8x16xf32>
    %255 = vector.extract_strided_slice %233 {offsets = [0, 0], sizes = [16, 32], strides = [1, 1]} : vector<32x32xf32> to vector<16x32xf32>
    %cst_107 = arith.constant dense<0.000000e+00> : vector<8x32xf32>
    %256 = tpu.matmul %254, %255, %cst_107 {dimension_numbers = #tpu.dot_dimension_numbers<[1], [0], [0], [1], [0, 0, 1, 1], [], []>} : vector<8x16xf32>, vector<16x32xf32>, vector<8x32xf32> -> vector<8x32xf32>
    %257 = arith.addf %234, %256 : vector<8x32xf32>
    %258 = vector.extract_strided_slice %221 {offsets = [0, 0, 16], sizes = [1, 8, 16], strides = [1, 1, 1]} : vector<1x8x32xf32> to vector<1x8x16xf32>
    %259 = vector.extract_strided_slice %224 {offsets = [0, 0, 16], sizes = [1, 8, 16], strides = [1, 1, 1]} : vector<1x8x32xf32> to vector<1x8x16xf32>
    "tpu.trace_start"() <{level = 10 : i32, message = "nqd,nkd->nqk"}> : () -> ()
    %cst_108 = arith.constant dense<0.000000e+00> : vector<1x8x8xf32>
    %260 = tpu.matmul %258, %259, %cst_108 {dimension_numbers = #tpu.dot_dimension_numbers<[2], [2], [1], [1], [0, 0, 0, 1, 1, 1], [0], [0]>} : vector<1x8x16xf32>, vector<1x8x16xf32>, vector<1x8x8xf32> -> vector<1x8x8xf32>
    "tpu.trace_stop"() : () -> ()
    %cst_109 = arith.constant 2.500000e-01 : f32
    %261 = vector.broadcast %cst_109 : f32 to vector<1x8x8xf32>
    %262 = arith.mulf %260, %261 : vector<1x8x8xf32>
    %263 = vector.broadcast %232 : vector<1x1x8xf32> to vector<1x8x8xf32>
    %264 = arith.addf %262, %263 : vector<1x8x8xf32>
    %cst_110 = arith.constant dense<0xFF800000> : vector<1x8xf32>
    %265 = vector.multi_reduction <maximumf>, %264, %cst_110 [2] : vector<1x8x8xf32> to vector<1x8xf32>
    %266 = vector.shape_cast %265 : vector<1x8xf32> to vector<1x8x1xf32>
    %267 = vector.broadcast %266 : vector<1x8x1xf32> to vector<1x8x8xf32>
    %268 = arith.subf %264, %267 : vector<1x8x8xf32>
    %269 = math.exp %268 : vector<1x8x8xf32>
    %cst_111 = arith.constant dense<0.000000e+00> : vector<1x8xf32>
    %270 = vector.multi_reduction <add>, %269, %cst_111 [2] : vector<1x8x8xf32> to vector<1x8xf32>
    %271 = vector.shape_cast %270 : vector<1x8xf32> to vector<1x8x1xf32>
    %272 = tpu.reciprocal %271 {approx = true} : vector<1x8x1xf32> -> vector<1x8x1xf32>
    %273 = vector.broadcast %272 : vector<1x8x1xf32> to vector<1x8x8xf32>
    %274 = arith.mulf %269, %273 : vector<1x8x8xf32>
    %275 = vector.extract_strided_slice %227 {offsets = [0, 0, 16], sizes = [1, 8, 16], strides = [1, 1, 1]} : vector<1x8x32xf32> to vector<1x8x16xf32>
    "tpu.trace_start"() <{level = 10 : i32, message = "nqk,nkd->nqd"}> : () -> ()
    %cst_112 = arith.constant dense<0.000000e+00> : vector<1x8x16xf32>
    %276 = tpu.matmul %274, %275, %cst_112 {dimension_numbers = #tpu.dot_dimension_numbers<[2], [1], [1], [2], [0, 0, 0, 1, 1, 2], [0], [0]>} : vector<1x8x8xf32>, vector<1x8x16xf32>, vector<1x8x16xf32> -> vector<1x8x16xf32>
    "tpu.trace_stop"() : () -> ()
    %277 = vector.shape_cast %276 : vector<1x8x16xf32> to vector<8x16xf32>
    %278 = vector.extract_strided_slice %233 {offsets = [16, 0], sizes = [16, 32], strides = [1, 1]} : vector<32x32xf32> to vector<16x32xf32>
    %cst_113 = arith.constant dense<0.000000e+00> : vector<8x32xf32>
    %279 = tpu.matmul %277, %278, %cst_113 {dimension_numbers = #tpu.dot_dimension_numbers<[1], [0], [0], [1], [0, 0, 1, 1], [], []>} : vector<8x16xf32>, vector<16x32xf32>, vector<8x32xf32> -> vector<8x32xf32>
    %280 = arith.addf %257, %279 : vector<8x32xf32>
    %281 = arith.addf %218, %280 : vector<8x32xf32>
    %c696 = arith.constant 696 : index
    %c0_114 = arith.constant 0 : index
    %282 = vector.load %arg8[%c696, %c0_114] : memref<904x128xf32, #tpu.memory_space<vmem>>, vector<1x32xf32>
    %c704 = arith.constant 704 : index
    %c0_115 = arith.constant 0 : index
    %283 = vector.load %arg8[%c704, %c0_115] : memref<904x128xf32, #tpu.memory_space<vmem>>, vector<1x32xf32>
    %cst_116 = arith.constant dense<0.000000e+00> : vector<8xf32>
    %284 = vector.multi_reduction <add>, %281, %cst_116 [1] : vector<8x32xf32> to vector<8xf32>
    %285 = vector.shape_cast %284 : vector<8xf32> to vector<8x1xf32>
    %cst_117 = arith.constant 3.200000e+01 : f32
    %286 = vector.broadcast %cst_117 : f32 to vector<8x1xf32>
    %287 = arith.divf %285, %286 : vector<8x1xf32>
    %288 = vector.broadcast %287 : vector<8x1xf32> to vector<8x32xf32>
    %289 = arith.subf %281, %288 : vector<8x32xf32>
    %290 = arith.mulf %289, %289 : vector<8x32xf32>
    %cst_118 = arith.constant dense<0.000000e+00> : vector<8xf32>
    %291 = vector.multi_reduction <add>, %290, %cst_118 [1] : vector<8x32xf32> to vector<8xf32>
    %292 = vector.shape_cast %291 : vector<8xf32> to vector<8x1xf32>
    %cst_119 = arith.constant 3.200000e+01 : f32
    %293 = vector.broadcast %cst_119 : f32 to vector<8x1xf32>
    %294 = arith.divf %292, %293 : vector<8x1xf32>
    %cst_120 = arith.constant 9.99999974E-6 : f32
    %295 = vector.broadcast %cst_120 : f32 to vector<8x1xf32>
    %296 = arith.addf %294, %295 : vector<8x1xf32>
    %297 = math.rsqrt %296 : vector<8x1xf32>
    %298 = vector.broadcast %297 : vector<8x1xf32> to vector<8x32xf32>
    %299 = arith.mulf %289, %298 : vector<8x32xf32>
    %300 = vector.broadcast %282 : vector<1x32xf32> to vector<8x32xf32>
    %301 = arith.mulf %299, %300 : vector<8x32xf32>
    %302 = vector.broadcast %283 : vector<1x32xf32> to vector<8x32xf32>
    %303 = arith.addf %301, %302 : vector<8x32xf32>
    %c712 = arith.constant 712 : index
    %c0_121 = arith.constant 0 : index
    %304 = vector.load %arg8[%c712, %c0_121] : memref<904x128xf32, #tpu.memory_space<vmem>>, vector<32x128xf32>
    %cst_122 = arith.constant dense<0.000000e+00> : vector<8x128xf32>
    %305 = tpu.matmul %303, %304, %cst_122 {dimension_numbers = #tpu.dot_dimension_numbers<[1], [0], [0], [1], [0, 0, 1, 1], [], []>} : vector<8x32xf32>, vector<32x128xf32>, vector<8x128xf32> -> vector<8x128xf32>
    %c744 = arith.constant 744 : index
    %c0_123 = arith.constant 0 : index
    %306 = vector.load %arg8[%c744, %c0_123] : memref<904x128xf32, #tpu.memory_space<vmem>>, vector<1x128xf32>
    %307 = vector.broadcast %306 : vector<1x128xf32> to vector<8x128xf32>
    %308 = arith.addf %305, %307 : vector<8x128xf32>
    %cst_124 = arith.constant 5.000000e-01 : f32
    %309 = vector.broadcast %cst_124 : f32 to vector<8x128xf32>
    %310 = arith.mulf %309, %308 : vector<8x128xf32>
    %cst_125 = arith.constant 4.471500e-02 : f32
    %311 = vector.broadcast %cst_125 : f32 to vector<8x128xf32>
    %312 = arith.mulf %311, %308 : vector<8x128xf32>
    %313 = arith.mulf %312, %308 : vector<8x128xf32>
    %314 = arith.mulf %313, %308 : vector<8x128xf32>
    %315 = arith.addf %308, %314 : vector<8x128xf32>
    %cst_126 = arith.constant 0.797884583 : f32
    %316 = vector.broadcast %cst_126 : f32 to vector<8x128xf32>
    %317 = arith.mulf %316, %315 : vector<8x128xf32>
    %318 = math.tanh %317 : vector<8x128xf32>
    %cst_127 = arith.constant 1.000000e+00 : f32
    %319 = vector.broadcast %cst_127 : f32 to vector<8x128xf32>
    %320 = arith.addf %319, %318 : vector<8x128xf32>
    %321 = arith.mulf %310, %320 : vector<8x128xf32>
    %c752 = arith.constant 752 : index
    %c0_128 = arith.constant 0 : index
    %322 = vector.load %arg8[%c752, %c0_128] : memref<904x128xf32, #tpu.memory_space<vmem>>, vector<128x32xf32>
    %cst_129 = arith.constant dense<0.000000e+00> : vector<8x32xf32>
    %323 = tpu.matmul %321, %322, %cst_129 {dimension_numbers = #tpu.dot_dimension_numbers<[1], [0], [0], [1], [0, 0, 1, 1], [], []>} : vector<8x128xf32>, vector<128x32xf32>, vector<8x32xf32> -> vector<8x32xf32>
    %c880 = arith.constant 880 : index
    %c0_130 = arith.constant 0 : index
    %324 = vector.load %arg8[%c880, %c0_130] : memref<904x128xf32, #tpu.memory_space<vmem>>, vector<1x32xf32>
    %325 = vector.broadcast %324 : vector<1x32xf32> to vector<8x32xf32>
    %326 = arith.addf %323, %325 : vector<8x32xf32>
    %327 = arith.addf %303, %326 : vector<8x32xf32>
    %c888 = arith.constant 888 : index
    %c0_131 = arith.constant 0 : index
    %328 = vector.load %arg8[%c888, %c0_131] : memref<904x128xf32, #tpu.memory_space<vmem>>, vector<1x32xf32>
    %c896 = arith.constant 896 : index
    %c0_132 = arith.constant 0 : index
    %329 = vector.load %arg8[%c896, %c0_132] : memref<904x128xf32, #tpu.memory_space<vmem>>, vector<1x32xf32>
    %cst_133 = arith.constant dense<0.000000e+00> : vector<8xf32>
    %330 = vector.multi_reduction <add>, %327, %cst_133 [1] : vector<8x32xf32> to vector<8xf32>
    %331 = vector.shape_cast %330 : vector<8xf32> to vector<8x1xf32>
    %cst_134 = arith.constant 3.200000e+01 : f32
    %332 = vector.broadcast %cst_134 : f32 to vector<8x1xf32>
    %333 = arith.divf %331, %332 : vector<8x1xf32>
    %334 = vector.broadcast %333 : vector<8x1xf32> to vector<8x32xf32>
    %335 = arith.subf %327, %334 : vector<8x32xf32>
    %336 = arith.mulf %335, %335 : vector<8x32xf32>
    %cst_135 = arith.constant dense<0.000000e+00> : vector<8xf32>
    %337 = vector.multi_reduction <add>, %336, %cst_135 [1] : vector<8x32xf32> to vector<8xf32>
    %338 = vector.shape_cast %337 : vector<8xf32> to vector<8x1xf32>
    %cst_136 = arith.constant 3.200000e+01 : f32
    %339 = vector.broadcast %cst_136 : f32 to vector<8x1xf32>
    %340 = arith.divf %338, %339 : vector<8x1xf32>
    %cst_137 = arith.constant 9.99999974E-6 : f32
    %341 = vector.broadcast %cst_137 : f32 to vector<8x1xf32>
    %342 = arith.addf %340, %341 : vector<8x1xf32>
    %343 = math.rsqrt %342 : vector<8x1xf32>
    %344 = vector.broadcast %343 : vector<8x1xf32> to vector<8x32xf32>
    %345 = arith.mulf %335, %344 : vector<8x32xf32>
    %346 = vector.broadcast %328 : vector<1x32xf32> to vector<8x32xf32>
    %347 = arith.mulf %345, %346 : vector<8x32xf32>
    %348 = vector.broadcast %329 : vector<1x32xf32> to vector<8x32xf32>
    %349 = arith.addf %347, %348 : vector<8x32xf32>
    %350 = vector.shape_cast %349 : vector<8x32xf32> to vector<1x8x32xf32>
    %c0_138 = arith.constant 0 : index
    %c0_139 = arith.constant 0 : index
    %c0_140 = arith.constant 0 : index
    %351 = vector.load %arg9[%c0_138, %c0_139, %c0_140] : memref<1x8x32xf32, #tpu.memory_space<vmem>>, vector<1x8x32xf32>
    tpu.vector_store %arg9[%c0_138, %c0_139, %c0_140], %350 {strides = array<i32>} : memref<1x8x32xf32, #tpu.memory_space<vmem>>, vector<1x8x32xf32>,
    return
  }
  func.func @transform_0(%arg0: i32) -> (i32, i32, i32) {
    %c0_i32 = arith.constant 0 : i32
    %c0_i32_0 = arith.constant 0 : i32
    %c0_i32_1 = arith.constant 0 : i32
    return %arg0, %c0_i32, %c0_i32_0 : i32, i32, i32
  }
  func.func @transform_1(%arg0: i32) -> (i32, i32, i32) {
    %c0_i32 = arith.constant 0 : i32
    %c0_i32_0 = arith.constant 0 : i32
    %c0_i32_1 = arith.constant 0 : i32
    return %arg0, %c0_i32, %c0_i32_0 : i32, i32, i32
  }
  func.func @transform_2(%arg0: i32) -> (i32, i32, i32) {
    %c0_i32 = arith.constant 0 : i32
    %c0_i32_0 = arith.constant 0 : i32
    %c0_i32_1 = arith.constant 0 : i32
    return %arg0, %c0_i32, %c0_i32_0 : i32, i32, i32
  }
  func.func @transform_3(%arg0: i32) -> (i32, i32, i32) {
    %c0_i32 = arith.constant 0 : i32
    %c0_i32_0 = arith.constant 0 : i32
    %c0_i32_1 = arith.constant 0 : i32
    return %arg0, %c0_i32, %c0_i32_0 : i32, i32, i32
  }
  func.func @transform_4(%arg0: i32) -> (i32, i32, i32) {
    %c0_i32 = arith.constant 0 : i32
    %c0_i32_0 = arith.constant 0 : i32
    %c0_i32_1 = arith.constant 0 : i32
    return %arg0, %c0_i32, %c0_i32_0 : i32, i32, i32
  }
  func.func @transform_5(%arg0: i32) -> (i32, i32, i32) {
    %c0_i32 = arith.constant 0 : i32
    %c0_i32_0 = arith.constant 0 : i32
    %c0_i32_1 = arith.constant 0 : i32
    return %arg0, %c0_i32, %c0_i32_0 : i32, i32, i32
  }
  func.func @transform_6(%arg0: i32) -> (i32, i32, i32) {
    %c0_i32 = arith.constant 0 : i32
    %c0_i32_0 = arith.constant 0 : i32
    %c0_i32_1 = arith.constant 0 : i32
    return %arg0, %c0_i32, %c0_i32_0 : i32, i32, i32
  }
  func.func @transform_7(%arg0: i32) -> (i32, i32) {
    %c0_i32 = arith.constant 0 : i32
    %c0_i32_0 = arith.constant 0 : i32
    %c0_i32_1 = arith.constant 0 : i32
    return %c0_i32, %c0_i32_0 : i32, i32
  }
  func.func @transform_8(%arg0: i32) -> (i32, i32, i32) {
    %c0_i32 = arith.constant 0 : i32
    %c0_i32_0 = arith.constant 0 : i32
    %c0_i32_1 = arith.constant 0 : i32
    return %arg0, %c0_i32, %c0_i32_0 : i32, i32, i32
  }
}

</mosaic_0001>

<bundles_post_ra>
// kernel: tpu_custom_call.1
= control target key start
LH: loop header
LB: loop body
LE: loop exit
PB: predicated region body
PF: predicated region fallthrough
CT: control target
= control target key end

     0   :  { %13 = vsyncpa [#allocation3], 0  ;;  %s6024_s0 = inlined_call_operand.vmem [shape: f32[2,16,4], index: 0, kind: input, shape index: {}]   ;;  %s6025_s1 = inlined_call_operand.vmem [shape: f32[2,16,1], index: 1, kind: input, shape index: {}]   ;;  %s6026_s2 = inlined_call_operand.vmem [shape: f32[2,4,1], index: 2, kind: input, shape index: {}]   ;;  %s6027_s3 = inlined_call_operand.vmem [shape: f32[2,4,1], index: 3, kind: input, shape index: {}]   ;;  %s6028_s4 = inlined_call_operand.vmem [shape: f32[2,4,7], index: 4, kind: input, shape index: {}]   ;;  %s6029_s5 = inlined_call_operand.vmem [shape: f32[2,1,2], index: 5, kind: input, shape index: {}]   ;;  %s6030_s6 = inlined_call_operand.vmem [shape: f32[2,1,8], index: 6, kind: input, shape index: {}]   ;;  %s6031_s7 = inlined_call_operand.hbm [shape: f32[904,128], index: 7, kind: input, shape index: {}]   ;;  %s6032_s8 = inlined_call_operand.hbm [shape: f32[2,8,32], index: 8, kind: output, shape index: {}]  }
   0x1   :  { %14 = vsyncpa [#allocation4], 0 }
   0x2   :  { %16 = vsyncpa [#allocation4 + $0x1], 0  ;;  %s4376_s27 = smov 0   ;;  %s4378_s28 = smov 0  }
   0x3   :  { %s4380_s29 = smov 0   ;;  %s4382_s30 = smov 0  }
   0x4 LB: > { %s4397_s9 = sadd.s32 4294967295, %s4322_s30   ;;  %s3982_s10 = sadd.s32 4294967294, %s4322_s30   ;;  %s4322_s30 = sphi %s4382_s30, %s6152_s30   ;;  %s4318_s29 = sphi %s4380_s29, %s6151_s29   ;;  %s4314_s28 = sphi %s4378_s28, %s6150_s28   ;;  %s4310_s27 = sphi %s4376_s27, %s6149_s27  }
   0x5   : > { %s4401_s11 = sadd.s32 1, %s4322_s30   ;;  %s232_s12 = sadd.s32 1, %s4318_s29 }
   0x6   : > { %s229_s13 = ssub.s32 %s4322_s30, %s4401_s11  ;;  %p242_p0 = scmp.ne.s32.totalorder %s4318_s29, %s4314_s28 }
   0x7   : > { %p230_p1 = scmp.eq.s32.totalorder %s229_s13, 0  ;;  %p243_p2 = scmp.eq.s32.totalorder %s4397_s9, 1 }
   0x8   : > { %p248_p3 = scmp.ne.s32.totalorder %s4314_s28, %s4310_s27  ;;  %p249_p4 = scmp.eq.s32.totalorder %s3982_s10, 1 }
   0x9   : > { %s4412_s14 = scalar_select %p230_p1, %s4318_s29, %s232_s12  }
   0xa   : > { %p4414_p5 = por %p243_p2, %p242_p0  ;;  %p4418_p6 = por %p249_p4, %p248_p3 }
   0xb   : > { %p3983_p7 = scmp.ge.s32.totalorder %s4322_s30, 1  ;;  %p256_p8 = scmp.lt.s32.totalorder %s4322_s30, 3 }
   0xc   : > { %p4092_p9 = scmp.eq.s32.totalorder %s4397_s9, 0  ;;  %s267_s19 = sshll.u32 %s6031_s7, 4  ;;  %s268_s19 = int_to_ptr.hbm [resolvable:$true] %s267_s19 }
   0xd   : > { %p257_p10 = pnand %p3983_p7, %p256_p8  ;;  %s4324_s20 = smov [#allocation2]  }
   0xe   : > { %s269_s21 = sshll.u32 %s4324_s20, 4  ;;  %s4325_s22 = smov 128   ;;  %s270_s21 = int_to_ptr.vmem [resolvable:$true] %s269_s21 }
   0xf   : > { %p4084_p11 = pneg %p257_p10  ;;  %s4326_s23 = smov 8  }
  0x10   : > { %334 = sbr.rel (%p257_p10) target bundleno = 4570 (0x11da), region = 52 }
  0x11   : > { %p4085_p12 = pnand %p4092_p9, %p4084_p11 }
  0x13   : > { %4087 = dma.hbm_to_vmem [thread:$0]  (!%p4085_p12), %s268_s19, 14464, %s270_s21, [#allocation3], %s4325_s22, %s4325_s22, %s4326_s23  }
  0x15   : > { %4301 = dma.done.wait (%p4092_p9), [#allocation3], 14464  }
  0x16   : > { %4303 = vsyncadd (%p4092_p9), [#allocation3], 4294952832  ;;  %p392_p13 = scmp.lt.s32.totalorder %s4397_s9, 1  ;;  %v4327_v0 = vmov 0   ;;  %vm437_vm0 = vcmask 1043456   ;;  %vm430_vm1 = vcmask 31744  }
  0x17   : > { %4134 = vset.pattern.permute.xlu0 %v4327_v0  ;;  %4135 = vset.pattern.permute.xlu1 %v4327_v0  ;;  %v429_v1 = vld [vmem:[#allocation2] sm:$0xf]  ;;  %v520_v4 = vld [vmem:[#allocation2 + $0x58] sm:$0xff]  ;;  %v519_v6 = vld [vmem:[#allocation2 + $0x50] sm:$0xff]  ;;  %vm482_vm2 = vcmask 261120   ;;  %vm563_vm3 = vcmask 257024  }
  0x18   : > { %s4436_s24 = scalar_select %p392_p13, %s4397_s9, 1  ;;  %4136 = vset.pattern.permute.xlu2 %v4327_v0  ;;  %3996 = vmatpush.msk.msra.mxu0 %vm437_vm0, %v429_v1  ;;  %v467_v5 = vld [vmem:[#allocation2 + $0x38] sm:$0xff]  ;;  %v466_v7 = vld [vmem:[#allocation2 + $0x30] sm:$0xff]  ;;  %v518_v8 = vld [vmem:[#allocation2 + $0x48] sm:$0xff]  ;;  %vm639_vm4 = vcmask 1040384   ;;  %vm644_vm5 = vcmask 1041408  }
  0x19   : > { %4077 = vmatpush.msk.msra.mxu3 %vm437_vm0, %v429_v1  ;;  %536 = vmatpush.msra.mxu2 %v520_v4  ;;  %v465_v10 = vld [vmem:[#allocation2 + $0x28] sm:$0xff]  ;;  %v517_v11 = vld [vmem:[#allocation2 + $0x40] sm:$0xff]  ;;  %v556_v19 = vld [vmem:[#allocation2 + $0x70] sm:$0xf]  ;;  %vm649_vm6 = vcmask 1042432   ;;  %vm1068_vm7 = vcmask 130048  }
  0x1a   : > { %s4075_s25 = sshll.u32 %s4436_s24, 4  ;;  %s4440_s26 = sshll.u32 %s4436_s24, 2  ;;  %501 = vmatpush.msra.mxu1 %v467_v5  ;;  %v516_v12 = vld [vmem:[#allocation2 + $0x8] sm:$0xf]  ;;  %v464_v13 = vld [vmem:[#allocation2 + $0x20] sm:$0xff]  ;;  %vm1328_vm8 = vcmask 1046528  }
  0x1b   : > { %s396_s13 = scalar_lea.vmem %s6024_s0, %s4075_s25  ;;  %s405_s19 = scalar_lea.vmem %s6026_s2, %s4440_s26  ;;  %537 = vmatpush.msra.mxu2 %v519_v6  ;;  %v4138_v29 = vld [vmem:[#allocation2 + $0x60] ss:$0 sm:$0xff]  ;;  %v571_v32 = vld [vmem:[#allocation2 + $0x78] sm:$0x1]  ;;  %v4139_v34 = vld [vmem:[#allocation2 + $0x68] ss:$0 sm:$0xff] }
  0x1c   : > { %v420_v2 = vld [vmem:[%s396_s13] sm:$0xff]  ;;  %v421_v3 = vld [vmem:[%s396_s13 + $0x8] sm:$0xff]  ;;  %502 = vmatpush.msra.mxu1 %v466_v7  ;;  %s401_s22 = scalar_lea.vmem %s6025_s1, %s4075_s25  ;;  %s409_s12 = scalar_lea.vmem %s6027_s3, %s4440_s26  ;;  %v4142_v45 = vld [vmem:[#allocation2 + $0x88] ss:$0 sm:$0xff]  ;;  %vm1265_vm9 = vcmask 55296   ;;  %vm1324_vm10 = vcmask 56320  }
  0x1d   : > { %3997 = vmatmul.msk.f32.vlgmr.msra.gmra.mxu0 %vm430_vm1, %v420_v2  ;;  %3998 = vmatmul.msk.f32.vlgmr.msra.gmra.mxu3 %vm430_vm1, %v421_v3  ;;  %v424_v9 = vld [vmem:[%s405_s19] sm:$0xf]  ;;  %v423_v15 = vld [vmem:[%s401_s22 + $0x8] sm:$0xff]  ;;  %v4474_v53 = vld [vmem:[#allocation2 + $0x10] ss:$0 sm:$0xff]  ;;  %s413_s17 = scalar_lea.vmem %s6028_s4, %s4440_s26  ;;  %s4328_s26 = smov 112  }
  0x1e   : > { %559 = vperm.xlu0 %4134, %v424_v9   ;;  %538 = vmatpush.msra.mxu2 %v518_v8  ;;  %v422_v14 = vld [vmem:[%s401_s22] sm:$0xff]  ;;  %v4141_v37 = vld [vmem:[#allocation2 + $0x80] ss:$0 sm:$0xff]  ;;  %v586_v2 = vrot.slane %v4474_v53, 1  ;;  %s416_s20 = scalar_lea.vmem %s6029_s5, %s4436_s24  ;;  %s419_s23 = scalar_lea.vmem %s6030_s6, %s4436_s24 }
  0x1f   : > { %503 = vmatpush.msra.mxu1 %v465_v10  ;;  %476 = vperm.xlu1 %4135, %v423_v15   ;;  %v425_v16 = vld [vmem:[%s409_s12] sm:$0xf]  ;;  %s389_s24 = sand.u32 1, %s4314_s28   ;;  %s4072_s12 = sshll.u32 %s4397_s9, 3 }
  0x20   : > { %539 = vmatpush.msra.mxu2 %v517_v11  ;;  %s3988_s10 = sshll.u32 %s389_s24, 3  ;;  %s3830_s9 = scalar_lea.sflag [#allocation4], %s389_s24 }
  0x21   : > { %4001 = vmatmul.msk.f32.vlgmr.msra.gmra.mxu2 %vm482_vm2, %v516_v12  ;;  %504 = vmatpush.msra.mxu1 %v464_v13 }
  0x26   : > { %471 = vperm.xlu0 %4134, %v422_v14  }
  0x27   : > { %577 = vperm.xlu1 %4135, %v425_v16  }
  0x90   : > { %v4465_v20 = vpop.permute.xlu0 %559 }
  0x91   : > { %6091 = vst [vmem:[#allocation8_spill] sm:$0xff] %v4465_v20  ;;  %v562_v21 = vmul.f32 %v4465_v20, %v556_v19  ;;  %v477_v27 = vpop.permute.xlu1 %476 }
  0x92   : > { %v481_v42 = vmul.f32 %v4138_v29, %v477_v27 }
  0x93   : > { %v564_v22 = vsel %vm563_vm3, %v562_v21, 0.0 }
  0x94   : > { %v565_v23 = vrot.slane %v564_v22, 4 }
  0x96   : > { %v566_v24 = vadd.f32 %v565_v23, %v564_v22  ;;  %v587_v22 = vrot.slane %v4474_v53, 2 }
  0x98   : > { %v567_v25 = vrot.slane %v566_v24, 2  ;;  %v472_v30 = vpop.permute.xlu0 %471 }
  0x99   : > { %v480_v33 = vmul.f32 %v4138_v29, %v472_v30  ;;  %v578_v40 = vpop.permute.xlu1 %577 }
  0x9a   : > { %v458_v17 = vpop.f32.mrf.mxu0  ;;  %v568_v26 = vadd.f32 %v567_v25, %v566_v24  ;;  %v581_v46 = vmul.f32 %v4141_v37, %v578_v40 }
  0x9b   : > { %3999 = vmatmul.msk.f32.vlgmr.msra.gmra.mxu1 %vm482_vm2, %v458_v17 }
  0x9c   : > { %v569_v28 = vrot.slane %v568_v26, 1  ;;  %v4471_v50 = vadd.f32 %v4142_v45, %v581_v46 }
  0x9e   : > { %v570_v31 = vadd.f32 %v569_v28, %v568_v26  ;;  %v608_v55 = vperm.slane %v4471_v50, 0  ;;  %v597_v3 = vrot.slane %v4471_v50, 1  ;;  %v598_v19 = vrot.slane %v4471_v50, 2 }
  0x9f   : > { %v599_v37 = vrot.slane %v4471_v50, 3 }
  0xa0   : > { %v461_v18 = vpop.f32.mrf.mxu3  ;;  %v572_v38 = vadd.f32 %v571_v32, %v570_v31  ;;  %v609_v9 = vperm.slane %v597_v3, 0  ;;  %v610_v23 = vperm.slane %v598_v19, 0  ;;  %v815_v3 = vld [vmem:[#allocation2 + $0x110] sm:$0xff] }
  0xa1   : > { %v611_v40 = vperm.slane %v599_v37, 0 }
  0xa2   : > { %v4469_v47 = vperm.slane %v572_v38, 0 }
  0xa3   : > { %4000 = vmatmul.msk.f32.gmra.mxu1 %vm482_vm2, %v461_v18 }
  0xa4   : > { %v541_v39 = vpop.f32.mrf.mxu2  ;;  %v600_v52 = vperm.slane %v4469_v47, 0  ;;  %v593_v62 = vrot.slane %v4469_v47, 1  ;;  %v594_v16 = vrot.slane %v4469_v47, 2 }
  0xa6   : > { %v640_v59 = vsel %vm639_vm4, %v4474_v53, %v600_v52  ;;  %v601_v1 = vperm.slane %v593_v62, 0  ;;  %v602_v21 = vperm.slane %v594_v16, 0  ;;  %v922_v16 = vld [vmem:[#allocation2 + $0x128] sm:$0xff] }
  0xa7   : > { %v645_v63 = vsel %vm644_vm5, %v640_v59, %v608_v55 }
  0xa8   : > { %v641_v11 = vsel %vm639_vm4, %v586_v2, %v601_v1  ;;  %v642_v24 = vsel %vm639_vm4, %v587_v22, %v602_v21  ;;  %v817_v1 = vld [vmem:[#allocation2 + $0x120] sm:$0xff]  ;;  %v816_v2 = vld [vmem:[#allocation2 + $0x118] sm:$0xff] }
  0xa9   : > { %v646_v17 = vsel %vm644_vm5, %v641_v11, %v609_v9  ;;  %v647_v30 = vsel %vm644_vm5, %v642_v24, %v610_v23  ;;  %877 = vmatpush.msrb.mxu2 %v817_v1  ;;  %v925_v9 = vld [vmem:[#allocation2 + $0x140] sm:$0xff]  ;;  %v924_v11 = vld [vmem:[#allocation2 + $0x138] sm:$0xff] }
  0xaa   : > { %985 = vmatpush.msrb.mxu0 %v925_v9 }
  0xab   : > { %878 = vmatpush.msrb.mxu2 %v816_v2 }
  0xac   : > { %986 = vmatpush.msrb.mxu0 %v924_v11 }
  0xad   : > { %879 = vmatpush.msrb.mxu2 %v815_v3 }
 0x118   : > { %v506_v35 = vpop.f32.mrf.mxu1 }
 0x119   : > { %v507_v36 = vadd.f32 %v506_v35, %v480_v33  ;;  %v595_v35 = vrot.slane %v4469_v47, 3 }
 0x11b   : > { %v514_v41 = vadd.f32 %v4139_v34, %v507_v36  ;;  %v603_v38 = vperm.slane %v595_v35, 0 }
 0x11d   : > { %v546_v43 = vrot.slane %v514_v41, 4  ;;  %v550_v44 = vadd.f32 %v541_v39, %v514_v41 }
 0x11f   : > { %v551_v48 = vadd.f32 %v546_v43, %v541_v39  ;;  %620 = vst [vmem:[#allocation1] ss:$2 sm:$0xff] %v550_v44 }
 0x120   : > { %v509_v49 = vpop.f32.mrf.mxu1 }
 0x121   : > { %623 = vst [vmem:[#allocation1 + $0x10] ss:$2 sm:$0xff] %v551_v48  ;;  %v510_v51 = vadd.f32 %v509_v49, %v481_v42 }
 0x123   : > { %v515_v54 = vadd.f32 %v4139_v34, %v510_v51 }
 0x125   : > { %v547_v56 = vrot.slane %v515_v54, 4  ;;  %v552_v57 = vadd.f32 %v541_v39, %v515_v54  ;;  %v708_v54 = vld [vmem:[#allocation2 + $0xf8] sm:$0xff] }
 0x126   : > { %v621_v58 = vld.sshfl [vmem:[#allocation1] sm:$0xff pattern:$0x75316420] }
 0x127   : > { %v631_v60 = vrot.slane %v621_v58, 5  ;;  %v553_v61 = vadd.f32 %v547_v56, %v541_v39  ;;  %626 = vst [vmem:[#allocation1 + $0x20] ss:$2 sm:$0xff] %v552_v57  ;;  %v588_v39 = vrot.slane %v4474_v53, 3  ;;  %v709_v53 = vld [vmem:[#allocation2 + $0x100] sm:$0xff]  ;;  %v707_v58 = vld [vmem:[#allocation2 + $0xf0] sm:$0xff] }
 0x128   : > { %v624_v5 = vld.sshfl [vmem:[#allocation1 + $0x10] sm:$0xff pattern:$0x75316420]  ;;  %769 = vmatpush.msrb.mxu3 %v709_v53 }
 0x129   : > { %629 = vst [vmem:[#allocation1 + $0x30] ss:$2 sm:$0xff] %v553_v61  ;;  %v4482_v0 = vsel %vm649_vm6, %v645_v63, %v631_v60  ;;  %v632_v12 = vrot.slane %v624_v5, 5  ;;  %v643_v41 = vsel %vm639_vm4, %v588_v39, %v603_v38  ;;  %v706_v61 = vld [vmem:[#allocation2 + $0xe8] sm:$0xff] }
 0x12a   : > { %v4487_v4 = vrot.slane %v4482_v0, 2  ;;  %v4491_v7 = vrot.slane %v4482_v0, 1  ;;  %v4494_v10 = vrot.slane %v4482_v0, 3  ;;  %v4499_v13 = vrot.slane %v4482_v0, 4  ;;  %770 = vmatpush.msrb.mxu3 %v708_v54  ;;  %v814_v5 = vld [vmem:[#allocation2 + $0x108] sm:$0xff] }
 0x12b   : > { %v4503_v14 = vrot.slane %v4482_v0, 5  ;;  %v4507_v15 = vrot.slane %v4482_v0, 6  ;;  %v4514_v18 = vsel %vm649_vm6, %v646_v17, %v632_v12  ;;  %v648_v46 = vsel %vm644_vm5, %v643_v41, %v611_v40  ;;  %880 = vmatpush.msrb.mxu2 %v814_v5  ;;  %v923_v12 = vld [vmem:[#allocation2 + $0x130] sm:$0xff] }
 0x12c   : > { %v4522_v25 = vrot.slane %v4514_v18, 1  ;;  %v4525_v27 = vrot.slane %v4514_v18, 2  ;;  %v4528_v29 = vrot.slane %v4514_v18, 3  ;;  %v4533_v31 = vrot.slane %v4514_v18, 4  ;;  %771 = vmatpush.msrb.mxu3 %v707_v58  ;;  %987 = vmatpush.msrb.mxu0 %v923_v12 }
 0x12d   : > { %v4537_v32 = vrot.slane %v4514_v18, 5  ;;  %v4544_v34 = vrot.slane %v4514_v18, 6 }
 0x12e   : > { %v627_v6 = vld.sshfl [vmem:[#allocation1 + $0x20] sm:$0xff pattern:$0x75316420]  ;;  %772 = vmatpush.msrb.mxu3 %v706_v61  ;;  %988 = vmatpush.msrb.mxu0 %v922_v16 }
 0x12f   : > { %714 = vst [vmem:[#allocation1 + $0x2] ss:$9 sm:$0xff] %v4487_v4  ;;  %v633_v26 = vrot.slane %v627_v6, 5 }
 0x130   : > { %v630_v8 = vld.sshfl [vmem:[#allocation1 + $0x30] sm:$0xff pattern:$0x75316420] }
 0x131   : > { %710 = vst [vmem:[#allocation1] ss:$9 sm:$0xff] %v4482_v0  ;;  %v4540_v33 = vsel %vm649_vm6, %v647_v30, %v633_v26  ;;  %v634_v42 = vrot.slane %v630_v8, 5 }
 0x132   : > { %712 = vst [vmem:[#allocation1 + $0x1] ss:$9 sm:$0xff] %v4491_v7  ;;  %v4550_v36 = vrot.slane %v4540_v33, 1  ;;  %v4559_v43 = vrot.slane %v4540_v33, 2  ;;  %v4562_v44 = vrot.slane %v4540_v33, 3  ;;  %v4566_v47 = vrot.slane %v4540_v33, 4 }
 0x133   : > { %716 = vst [vmem:[#allocation1 + $0x3] ss:$9 sm:$0xff] %v4494_v10  ;;  %v4570_v48 = vsel %vm649_vm6, %v648_v46, %v634_v42  ;;  %v4573_v49 = vrot.slane %v4540_v33, 5  ;;  %v4577_v50 = vrot.slane %v4540_v33, 6 }
 0x134   : > { %718 = vst [vmem:[#allocation1 + $0x4] ss:$9 sm:$0xff] %v4499_v13  ;;  %v4582_v51 = vrot.slane %v4570_v48, 1  ;;  %v4586_v52 = vrot.slane %v4570_v48, 2  ;;  %v4592_v55 = vrot.slane %v4570_v48, 3  ;;  %v4595_v56 = vrot.slane %v4570_v48, 4 }
 0x135   : > { %720 = vst [vmem:[#allocation1 + $0x5] ss:$9 sm:$0xff] %v4503_v14  ;;  %v4598_v59 = vrot.slane %v4570_v48, 5  ;;  %v4602_v60 = vrot.slane %v4570_v48, 6 }
 0x136   : > { %722 = vst [vmem:[#allocation1 + $0x6] ss:$9 sm:$0xff] %v4507_v15 }
 0x137   : > { %724 = vst [vmem:[#allocation1 + $0x7] ss:$9 sm:$0xff] %v4514_v18 }
 0x13e   : > { %v725_v28 = vld [vmem:[#allocation1] sm:$0xff] }
 0x13f   : > { %726 = vst [vmem:[#allocation1] ss:$9 sm:$0xff] %v4522_v25  ;;  %4002 = vmatmul.msk.f32.vlgmr.msrb.gmra.mxu3 %vm482_vm2, %v725_v28 }
 0x140   : > { %727 = vst [vmem:[#allocation1 + $0x1] ss:$9 sm:$0xff] %v4525_v27 }
 0x141   : > { %728 = vst [vmem:[#allocation1 + $0x2] ss:$9 sm:$0xff] %v4528_v29 }
 0x142   : > { %729 = vst [vmem:[#allocation1 + $0x3] ss:$9 sm:$0xff] %v4533_v31 }
 0x143   : > { %730 = vst [vmem:[#allocation1 + $0x4] ss:$9 sm:$0xff] %v4537_v32 }
 0x144   : > { %731 = vst [vmem:[#allocation1 + $0x5] ss:$9 sm:$0xff] %v4544_v34 }
 0x145   : > { %732 = vst [vmem:[#allocation1 + $0x6] ss:$9 sm:$0xff] %v4540_v33 }
 0x146   : > { %733 = vst [vmem:[#allocation1 + $0x7] ss:$9 sm:$0xff] %v4550_v36 }
 0x14d   : > { %v734_v45 = vld [vmem:[#allocation1] sm:$0xff] }
 0x14e   : > { %735 = vst [vmem:[#allocation1] ss:$9 sm:$0xff] %v4559_v43  ;;  %4003 = vmatmul.msk.f32.gmra.mxu3 %vm482_vm2, %v734_v45 }
 0x14f   : > { %736 = vst [vmem:[#allocation1 + $0x1] ss:$9 sm:$0xff] %v4562_v44 }
 0x150   : > { %737 = vst [vmem:[#allocation1 + $0x2] ss:$9 sm:$0xff] %v4566_v47 }
 0x151   : > { %738 = vst [vmem:[#allocation1 + $0x3] ss:$9 sm:$0xff] %v4573_v49 }
 0x152   : > { %739 = vst [vmem:[#allocation1 + $0x4] ss:$9 sm:$0xff] %v4577_v50 }
 0x153   : > { %740 = vst [vmem:[#allocation1 + $0x5] ss:$9 sm:$0xff] %v4570_v48 }
 0x154   : > { %741 = vst [vmem:[#allocation1 + $0x6] ss:$9 sm:$0xff] %v4582_v51 }
 0x155   : > { %742 = vst [vmem:[#allocation1 + $0x7] ss:$9 sm:$0xff] %v4586_v52 }
 0x15c   : > { %v743_v57 = vld [vmem:[#allocation1] sm:$0xff] }
 0x15d   : > { %744 = vst [vmem:[#allocation1] ss:$9 sm:$0xff] %v4592_v55  ;;  %4004 = vmatmul.msk.f32.gmra.mxu3 %vm482_vm2, %v743_v57 }
 0x15e   : > { %745 = vst [vmem:[#allocation1 + $0x1] ss:$9 sm:$0xff] %v4595_v56 }
 0x15f   : > { %746 = vst [vmem:[#allocation1 + $0x2] ss:$9 sm:$0xff] %v4598_v59 }
 0x160   : > { %747 = vst [vmem:[#allocation1 + $0x3] ss:$9 sm:$0xff] %v4602_v60 }
 0x167   : > { %v748_v62 = vld [vmem:[#allocation1] sm:$0xff] }
 0x168   : > { %818 = vst [vmem:[#allocation1] ss:$9 sm:$0xff] %v4482_v0  ;;  %4005 = vmatmul.msk.f32.gmra.mxu3 %vm482_vm2, %v748_v62 }
 0x169   : > { %820 = vst [vmem:[#allocation1 + $0x1] ss:$9 sm:$0xff] %v4491_v7 }
 0x16a   : > { %822 = vst [vmem:[#allocation1 + $0x2] ss:$9 sm:$0xff] %v4487_v4 }
 0x16b   : > { %824 = vst [vmem:[#allocation1 + $0x3] ss:$9 sm:$0xff] %v4494_v10 }
 0x16c   : > { %826 = vst [vmem:[#allocation1 + $0x4] ss:$9 sm:$0xff] %v4499_v13 }
 0x16d   : > { %828 = vst [vmem:[#allocation1 + $0x5] ss:$9 sm:$0xff] %v4503_v14 }
 0x16e   : > { %830 = vst [vmem:[#allocation1 + $0x6] ss:$9 sm:$0xff] %v4507_v15 }
 0x16f   : > { %832 = vst [vmem:[#allocation1 + $0x7] ss:$9 sm:$0xff] %v4514_v18 }
 0x176   : > { %v833_v63 = vld [vmem:[#allocation1] sm:$0xff] }
 0x177   : > { %834 = vst [vmem:[#allocation1] ss:$9 sm:$0xff] %v4522_v25  ;;  %4006 = vmatmul.msk.f32.vlgmr.msrb.gmra.mxu2 %vm482_vm2, %v833_v63 }
 0x178   : > { %835 = vst [vmem:[#allocation1 + $0x1] ss:$9 sm:$0xff] %v4525_v27 }
 0x179   : > { %836 = vst [vmem:[#allocation1 + $0x2] ss:$9 sm:$0xff] %v4528_v29 }
 0x17a   : > { %837 = vst [vmem:[#allocation1 + $0x3] ss:$9 sm:$0xff] %v4533_v31 }
 0x17b   : > { %838 = vst [vmem:[#allocation1 + $0x4] ss:$9 sm:$0xff] %v4537_v32 }
 0x17c   : > { %839 = vst [vmem:[#allocation1 + $0x5] ss:$9 sm:$0xff] %v4544_v34 }
 0x17d   : > { %840 = vst [vmem:[#allocation1 + $0x6] ss:$9 sm:$0xff] %v4540_v33 }
 0x17e   : > { %841 = vst [vmem:[#allocation1 + $0x7] ss:$9 sm:$0xff] %v4550_v36 }
 0x185   : > { %v842_v6 = vld [vmem:[#allocation1] sm:$0xff] }
 0x186   : > { %843 = vst [vmem:[#allocation1] ss:$9 sm:$0xff] %v4559_v43  ;;  %4007 = vmatmul.msk.f32.gmra.mxu2 %vm482_vm2, %v842_v6 }
 0x187   : > { %844 = vst [vmem:[#allocation1 + $0x1] ss:$9 sm:$0xff] %v4562_v44 }
 0x188   : > { %845 = vst [vmem:[#allocation1 + $0x2] ss:$9 sm:$0xff] %v4566_v47 }
 0x189   : > { %846 = vst [vmem:[#allocation1 + $0x3] ss:$9 sm:$0xff] %v4573_v49 }
 0x18a   : > { %847 = vst [vmem:[#allocation1 + $0x4] ss:$9 sm:$0xff] %v4577_v50 }
 0x18b   : > { %848 = vst [vmem:[#allocation1 + $0x5] ss:$9 sm:$0xff] %v4570_v48 }
 0x18c   : > { %849 = vst [vmem:[#allocation1 + $0x6] ss:$9 sm:$0xff] %v4582_v51 }
 0x18d   : > { %850 = vst [vmem:[#allocation1 + $0x7] ss:$9 sm:$0xff] %v4586_v52 }
 0x194   : > { %v851_v8 = vld [vmem:[#allocation1] sm:$0xff] }
 0x195   : > { %852 = vst [vmem:[#allocation1] ss:$9 sm:$0xff] %v4592_v55  ;;  %4008 = vmatmul.msk.f32.gmra.mxu2 %vm482_vm2, %v851_v8 }
 0x196   : > { %853 = vst [vmem:[#allocation1 + $0x1] ss:$9 sm:$0xff] %v4595_v56 }
 0x197   : > { %854 = vst [vmem:[#allocation1 + $0x2] ss:$9 sm:$0xff] %v4598_v59 }
 0x198   : > { %855 = vst [vmem:[#allocation1 + $0x3] ss:$9 sm:$0xff] %v4602_v60 }
 0x19f   : > { %v856_v17 = vld [vmem:[#allocation1] sm:$0xff] }
 0x1a0   : > { %926 = vst [vmem:[#allocation1] ss:$9 sm:$0xff] %v4482_v0  ;;  %4009 = vmatmul.msk.f32.gmra.mxu2 %vm482_vm2, %v856_v17 }
 0x1a1   : > { %928 = vst [vmem:[#allocation1 + $0x1] ss:$9 sm:$0xff] %v4491_v7 }
 0x1a2   : > { %930 = vst [vmem:[#allocation1 + $0x2] ss:$9 sm:$0xff] %v4487_v4 }
 0x1a3   : > { %932 = vst [vmem:[#allocation1 + $0x3] ss:$9 sm:$0xff] %v4494_v10 }
 0x1a4   : > { %934 = vst [vmem:[#allocation1 + $0x4] ss:$9 sm:$0xff] %v4499_v13 }
 0x1a5   : > { %936 = vst [vmem:[#allocation1 + $0x5] ss:$9 sm:$0xff] %v4503_v14 }
 0x1a6   : > { %938 = vst [vmem:[#allocation1 + $0x6] ss:$9 sm:$0xff] %v4507_v15 }
 0x1a7   : > { %940 = vst [vmem:[#allocation1 + $0x7] ss:$9 sm:$0xff] %v4514_v18 }
 0x1ae   : > { %v941_v19 = vld [vmem:[#allocation1] sm:$0xff] }
 0x1af   : > { %942 = vst [vmem:[#allocation1] ss:$9 sm:$0xff] %v4522_v25  ;;  %4010 = vmatmul.msk.f32.vlgmr.msrb.gmra.mxu0 %vm482_vm2, %v941_v19 }
 0x1b0   : > { %943 = vst [vmem:[#allocation1 + $0x1] ss:$9 sm:$0xff] %v4525_v27 }
 0x1b1   : > { %944 = vst [vmem:[#allocation1 + $0x2] ss:$9 sm:$0xff] %v4528_v29 }
 0x1b2   : > { %945 = vst [vmem:[#allocation1 + $0x3] ss:$9 sm:$0xff] %v4533_v31 }
 0x1b3   : > { %946 = vst [vmem:[#allocation1 + $0x4] ss:$9 sm:$0xff] %v4537_v32 }
 0x1b4   : > { %947 = vst [vmem:[#allocation1 + $0x5] ss:$9 sm:$0xff] %v4544_v34 }
 0x1b5   : > { %948 = vst [vmem:[#allocation1 + $0x6] ss:$9 sm:$0xff] %v4540_v33 }
 0x1b6   : > { %949 = vst [vmem:[#allocation1 + $0x7] ss:$9 sm:$0xff] %v4550_v36 }
 0x1bd   : > { %v950_v21 = vld [vmem:[#allocation1] sm:$0xff] }
 0x1be   : > { %951 = vst [vmem:[#allocation1] ss:$9 sm:$0xff] %v4559_v43  ;;  %4011 = vmatmul.msk.f32.gmra.mxu0 %vm482_vm2, %v950_v21 }
 0x1bf   : > { %952 = vst [vmem:[#allocation1 + $0x1] ss:$9 sm:$0xff] %v4562_v44 }
 0x1c0   : > { %953 = vst [vmem:[#allocation1 + $0x2] ss:$9 sm:$0xff] %v4566_v47 }
 0x1c1   : > { %954 = vst [vmem:[#allocation1 + $0x3] ss:$9 sm:$0xff] %v4573_v49 }
 0x1c2   : > { %955 = vst [vmem:[#allocation1 + $0x4] ss:$9 sm:$0xff] %v4577_v50  ;;  %v4675_v24 = vpop.f32.mrf.mxu3 }
 0x1c3   : > { %956 = vst [vmem:[#allocation1 + $0x5] ss:$9 sm:$0xff] %v4570_v48  ;;  %v790_v26 = vrot.slane %v4675_v24, 1  ;;  %v791_v28 = vrot.slane %v4675_v24, 2  ;;  %v792_v30 = vrot.slane %v4675_v24, 3  ;;  %v793_v35 = vrot.slane %v4675_v24, 4 }
 0x1c4   : > { %957 = vst [vmem:[#allocation1 + $0x6] ss:$9 sm:$0xff] %v4582_v51  ;;  %v794_v37 = vrot.slane %v4675_v24, 5  ;;  %v795_v38 = vrot.slane %v4675_v24, 6  ;;  %v796_v58 = vrot.slane %v4675_v24, 7 }
 0x1c5   : > { %958 = vst [vmem:[#allocation1 + $0x7] ss:$9 sm:$0xff] %v4586_v52 }
 0x1cc   : > { %v959_v22 = vld [vmem:[#allocation1] sm:$0xff] }
 0x1cd   : > { %960 = vst [vmem:[#allocation1] ss:$9 sm:$0xff] %v4592_v55  ;;  %4012 = vmatmul.msk.f32.gmra.mxu0 %vm482_vm2, %v959_v22 }
 0x1ce   : > { %961 = vst [vmem:[#allocation1 + $0x1] ss:$9 sm:$0xff] %v4595_v56 }
 0x1cf   : > { %962 = vst [vmem:[#allocation1 + $0x2] ss:$9 sm:$0xff] %v4598_v59 }
 0x1d0   : > { %963 = vst [vmem:[#allocation1 + $0x3] ss:$9 sm:$0xff] %v4602_v60 }
 0x1d1   : > { %v4717_v57 = vpop.f32.mrf.mxu3 }
 0x1d2   : > { %v797_v62 = vrot.slane %v4717_v57, 1  ;;  %v6080_v63 = vrot.slane %v4717_v57, 2  ;;  %v6079_v1 = vrot.slane %v4717_v57, 3  ;;  %v6072_v2 = vrot.slane %v4717_v57, 4 }
 0x1d3   : > { %v6070_v3 = vrot.slane %v4717_v57, 5  ;;  %v6034_v19 = vrot.slane %v4717_v57, 6  ;;  %v6035_v22 = vrot.slane %v4717_v57, 7 }
 0x1d7   : > { %v964_v23 = vld [vmem:[#allocation1] sm:$0xff] }
 0x1d8   : > { %4013 = vmatmul.msk.f32.gmra.mxu0 %vm482_vm2, %v964_v23  ;;  %1040 = vst [vmem:[#allocation1] ss:$9 sm:$0xff] %v4675_v24 }
 0x1d9   : > { %1042 = vst [vmem:[#allocation1 + $0x1] ss:$9 sm:$0xff] %v790_v26 }
 0x1da   : > { %1044 = vst [vmem:[#allocation1 + $0x2] ss:$9 sm:$0xff] %v791_v28 }
 0x1db   : > { %1046 = vst [vmem:[#allocation1 + $0x3] ss:$9 sm:$0xff] %v792_v30 }
 0x1dc   : > { %1048 = vst [vmem:[#allocation1 + $0x4] ss:$9 sm:$0xff] %v793_v35 }
 0x1dd   : > { %1050 = vst [vmem:[#allocation1 + $0x5] ss:$9 sm:$0xff] %v794_v37 }
 0x1de   : > { %1052 = vst [vmem:[#allocation1 + $0x6] ss:$9 sm:$0xff] %v795_v38 }
 0x1e0   : > { %v4762_v21 = vpop.f32.mrf.mxu3 }
 0x1e5   : > { %v1053_v39 = vld [vmem:[#allocation1] sm:$0xff] }
 0x1fa   : > { %v4696_v40 = vpop.f32.mrf.mxu2 }
 0x1fb   : > { %v898_v41 = vrot.slane %v4696_v40, 1  ;;  %v899_v42 = vrot.slane %v4696_v40, 2  ;;  %v900_v45 = vrot.slane %v4696_v40, 3  ;;  %1054 = vst [vmem:[#allocation1] ss:$9 sm:$0xff] %v4696_v40  ;;  %v901_v46 = vrot.slane %v4696_v40, 4 }
 0x1fc   : > { %v902_v53 = vrot.slane %v4696_v40, 5  ;;  %v903_v54 = vrot.slane %v4696_v40, 6  ;;  %v6059_v6 = vrot.slane %v4696_v40, 7 }
 0x1fd   : > { %1056 = vst [vmem:[#allocation1 + $0x1] ss:$9 sm:$0xff] %v898_v41 }
 0x1fe   : > { %1058 = vst [vmem:[#allocation1 + $0x2] ss:$9 sm:$0xff] %v899_v42 }
 0x1ff   : > { %1060 = vst [vmem:[#allocation1 + $0x3] ss:$9 sm:$0xff] %v900_v45 }
 0x200   : > { %1062 = vst [vmem:[#allocation1 + $0x4] ss:$9 sm:$0xff] %v901_v46 }
 0x201   : > { %1064 = vst [vmem:[#allocation1 + $0x5] ss:$9 sm:$0xff] %v902_v53 }
 0x202   : > { %1066 = vst [vmem:[#allocation1 + $0x6] ss:$9 sm:$0xff] %v903_v54 }
 0x209   : > { %v1067_v61 = vld [vmem:[#allocation1] sm:$0xff]  ;;  %v4740_v5 = vpop.f32.mrf.mxu2 }
 0x20a   : > { %1093 = vst [vmem:[#allocation1] ss:$9 sm:$0xff] %v796_v58  ;;  %4014 = vmatpush.xpose.msk.msrb.mxu1 %vm1068_vm7, %v1067_v61  ;;  %v6058_v9 = vrot.slane %v4740_v5, 1  ;;  %v6044_v11 = vrot.slane %v4740_v5, 2  ;;  %v6043_v12 = vrot.slane %v4740_v5, 3  ;;  %v6036_v16 = vrot.slane %v4740_v5, 4 }
 0x20b   : > { %1095 = vst [vmem:[#allocation1 + $0x1] ss:$9 sm:$0xff] %v4717_v57  ;;  %v6033_v17 = vrot.slane %v4740_v5, 5  ;;  %v6040_v61 = vrot.slane %v4762_v21, 2 }
 0x20c   : > { %1097 = vst [vmem:[#allocation1 + $0x2] ss:$9 sm:$0xff] %v797_v62 }
 0x20d   : > { %1099 = vst [vmem:[#allocation1 + $0x3] ss:$9 sm:$0xff] %v6080_v63  ;;  %4015 = vmatmul.msk.f32.vlgmr.msrb.gmra.mxu1 %vm1068_vm7, %v1053_v39  ;;  %v6037_v39 = vrot.slane %v4762_v21, 1 }
 0x20e   : > { %1101 = vst [vmem:[#allocation1 + $0x4] ss:$9 sm:$0xff] %v6079_v1 }
 0x20f   : > { %1103 = vst [vmem:[#allocation1 + $0x5] ss:$9 sm:$0xff] %v6072_v2 }
 0x210   : > { %1105 = vst [vmem:[#allocation1 + $0x6] ss:$9 sm:$0xff] %v6070_v3 }
 0x217   : > { %v1106_v8 = vld [vmem:[#allocation1] sm:$0xff] }
 0x218   : > { %1107 = vst [vmem:[#allocation1] ss:$9 sm:$0xff] %v6059_v6 }
 0x219   : > { %1109 = vst [vmem:[#allocation1 + $0x1] ss:$9 sm:$0xff] %v4740_v5 }
 0x21a   : > { %1111 = vst [vmem:[#allocation1 + $0x2] ss:$9 sm:$0xff] %v6058_v9 }
 0x21b   : > { %1113 = vst [vmem:[#allocation1 + $0x3] ss:$9 sm:$0xff] %v6044_v11 }
 0x21c   : > { %1115 = vst [vmem:[#allocation1 + $0x4] ss:$9 sm:$0xff] %v6043_v12  ;;  %v4807_v12 = vpop.f32.mrf.mxu3 }
 0x21d   : > { %1117 = vst [vmem:[#allocation1 + $0x5] ss:$9 sm:$0xff] %v6036_v16  ;;  %v6041_v16 = vrot.slane %v4740_v5, 7 }
 0x21e   : > { %1119 = vst [vmem:[#allocation1 + $0x6] ss:$9 sm:$0xff] %v6033_v17  ;;  %v6038_v17 = vrot.slane %v4762_v21, 3 }
 0x225   : > { %v1120_v23 = vld [vmem:[#allocation1] sm:$0xff] }
 0x226   : > { %1145 = vst [vmem:[#allocation1] ss:$9 sm:$0xff] %v6034_v19  ;;  %4016 = vmatpush.xpose.msk.msra.mxu1 %vm1068_vm7, %v1120_v23  ;;  %v6039_v19 = vrot.slane %v4762_v21, 4  ;;  %v6042_v23 = vrot.slane %v4740_v5, 6 }
 0x227   : > { %1147 = vst [vmem:[#allocation1 + $0x1] ss:$9 sm:$0xff] %v6035_v22  ;;  %v4785_v22 = vpop.f32.mrf.mxu2 }
 0x228   : > { %1149 = vst [vmem:[#allocation1 + $0x2] ss:$9 sm:$0xff] %v4762_v21 }
 0x229   : > { %1151 = vst [vmem:[#allocation1 + $0x3] ss:$9 sm:$0xff] %v6037_v39  ;;  %4017 = vmatmul.msk.f32.vlgmr.msra.gmra.mxu1 %vm1068_vm7, %v1106_v8  ;;  %v6045_v8 = vrot.slane %v4785_v22, 1 }
 0x22a   : > { %1153 = vst [vmem:[#allocation1 + $0x4] ss:$9 sm:$0xff] %v6040_v61  ;;  %v6047_v61 = vrot.slane %v4785_v22, 4 }
 0x22b   : > { %1155 = vst [vmem:[#allocation1 + $0x5] ss:$9 sm:$0xff] %v6038_v17  ;;  %v6048_v17 = vrot.slane %v4785_v22, 2 }
 0x22c   : > { %1157 = vst [vmem:[#allocation1 + $0x6] ss:$9 sm:$0xff] %v6039_v19  ;;  %v6046_v19 = vrot.slane %v4785_v22, 3 }
 0x233   : > { %v1158_v39 = vld [vmem:[#allocation1] sm:$0xff] }
 0x234   : > { %1159 = vst [vmem:[#allocation1] ss:$9 sm:$0xff] %v6042_v23  ;;  %v6050_v23 = vrot.slane %v4762_v21, 6 }
 0x235   : > { %1161 = vst [vmem:[#allocation1 + $0x1] ss:$9 sm:$0xff] %v6041_v16  ;;  %v6051_v16 = vrot.slane %v4762_v21, 5 }
 0x236   : > { %1163 = vst [vmem:[#allocation1 + $0x2] ss:$9 sm:$0xff] %v4785_v22 }
 0x237   : > { %1165 = vst [vmem:[#allocation1 + $0x3] ss:$9 sm:$0xff] %v6045_v8  ;;  %v6049_v8 = vrot.slane %v4762_v21, 7 }
 0x238   : > { %1167 = vst [vmem:[#allocation1 + $0x4] ss:$9 sm:$0xff] %v6048_v17  ;;  %v6052_v17 = vrot.slane %v4807_v12, 3 }
 0x239   : > { %1169 = vst [vmem:[#allocation1 + $0x5] ss:$9 sm:$0xff] %v6046_v19  ;;  %v6054_v19 = vrot.slane %v4807_v12, 1 }
 0x23a   : > { %1171 = vst [vmem:[#allocation1 + $0x6] ss:$9 sm:$0xff] %v6047_v61  ;;  %v6053_v61 = vrot.slane %v4807_v12, 2 }
 0x241   : > { %v1172_v11 = vld [vmem:[#allocation1] sm:$0xff] }
 0x242   : > { %1197 = vst [vmem:[#allocation1] ss:$9 sm:$0xff] %v6051_v16  ;;  %4018 = vmatpush.xpose.msk.msrb.mxu1 %vm1068_vm7, %v1172_v11  ;;  %v6057_v11 = vrot.slane %v4785_v22, 5  ;;  %v4830_v16 = vpop.f32.mrf.mxu2 }
 0x243   : > { %1199 = vst [vmem:[#allocation1 + $0x1] ss:$9 sm:$0xff] %v6050_v23 }
 0x244   : > { %1201 = vst [vmem:[#allocation1 + $0x2] ss:$9 sm:$0xff] %v6049_v8  ;;  %v6055_v8 = vrot.slane %v4785_v22, 6 }
 0x245   : > { %1203 = vst [vmem:[#allocation1 + $0x3] ss:$9 sm:$0xff] %v4807_v12  ;;  %4019 = vmatmul.msk.f32.vlgmr.msrb.gmra.mxu1 %vm1068_vm7, %v1158_v39  ;;  %v6056_v39 = vrot.slane %v4785_v22, 7 }
 0x246   : > { %1205 = vst [vmem:[#allocation1 + $0x4] ss:$9 sm:$0xff] %v6054_v19  ;;  %v6061_v19 = vrot.slane %v4830_v16, 3 }
 0x247   : > { %1207 = vst [vmem:[#allocation1 + $0x5] ss:$9 sm:$0xff] %v6053_v61  ;;  %v6060_v61 = vrot.slane %v4830_v16, 2 }
 0x248   : > { %1209 = vst [vmem:[#allocation1 + $0x6] ss:$9 sm:$0xff] %v6052_v17  ;;  %v6062_v17 = vrot.slane %v4830_v16, 1 }
 0x24f   : > { %v1210_v23 = vld [vmem:[#allocation1] sm:$0xff] }
 0x250   : > { %1211 = vst [vmem:[#allocation1] ss:$9 sm:$0xff] %v6057_v11 }
 0x251   : > { %1213 = vst [vmem:[#allocation1 + $0x1] ss:$9 sm:$0xff] %v6055_v8  ;;  %v4849_v8 = vpop.f32.mrf.mxu0 }
 0x252   : > { %1215 = vst [vmem:[#allocation1 + $0x2] ss:$9 sm:$0xff] %v6056_v39  ;;  %v6064_v11 = vrot.slane %v4849_v8, 1  ;;  %v6063_v9 = vrot.slane %v4849_v8, 2  ;;  %v6065_v6 = vrot.slane %v4849_v8, 3 }
 0x253   : > { %1217 = vst [vmem:[#allocation1 + $0x3] ss:$9 sm:$0xff] %v4830_v16 }
 0x254   : > { %1219 = vst [vmem:[#allocation1 + $0x4] ss:$9 sm:$0xff] %v6062_v17  ;;  %v6067_v17 = vrot.slane %v4849_v8, 6 }
 0x255   : > { %1221 = vst [vmem:[#allocation1 + $0x5] ss:$9 sm:$0xff] %v6060_v61  ;;  %v6066_v61 = vrot.slane %v4849_v8, 4 }
 0x256   : > { %1223 = vst [vmem:[#allocation1 + $0x6] ss:$9 sm:$0xff] %v6061_v19  ;;  %v6068_v19 = vrot.slane %v4849_v8, 5 }
 0x25d   : > { %v1224_v39 = vld [vmem:[#allocation1] sm:$0xff] }
 0x25e   : > { %1310 = vst [vmem:[#allocation1] ss:$9 sm:$0xff] %v4849_v8  ;;  %4020 = vmatpush.xpose.msk.msra.mxu3 %vm1068_vm7, %v1224_v39  ;;  %v4872_v39 = vpop.f32.mrf.mxu0 }
 0x25f   : > { %1312 = vst [vmem:[#allocation1 + $0x1] ss:$9 sm:$0xff] %v6064_v11 }
 0x260   : > { %1314 = vst [vmem:[#allocation1 + $0x2] ss:$9 sm:$0xff] %v6063_v9  ;;  %v6069_v9 = vrot.slane %v4849_v8, 7 }
 0x261   : > { %1316 = vst [vmem:[#allocation1 + $0x3] ss:$9 sm:$0xff] %v6065_v6  ;;  %4021 = vmatmul.msk.f32.vlgmr.msra.gmra.mxu3 %vm1068_vm7, %v1210_v23  ;;  %v6071_v23 = vrot.slane %v4872_v39, 1  ;;  %v6076_v6 = vrot.slane %v4872_v39, 2 }
 0x262   : > { %1318 = vst [vmem:[#allocation1 + $0x4] ss:$9 sm:$0xff] %v6066_v61  ;;  %v6073_v61 = vrot.slane %v4872_v39, 3 }
 0x263   : > { %1320 = vst [vmem:[#allocation1 + $0x5] ss:$9 sm:$0xff] %v6068_v19  ;;  %v6075_v19 = vrot.slane %v4872_v39, 5 }
 0x264   : > { %1322 = vst [vmem:[#allocation1 + $0x6] ss:$9 sm:$0xff] %v6067_v17  ;;  %v6074_v17 = vrot.slane %v4872_v39, 4 }
 0x266   : > { %v4894_v3 = vpop.f32.mrf.mxu0 }
 0x26b   : > { %v1323_v11 = vld [vmem:[#allocation1] sm:$0xff] }
 0x26c   : > { %1351 = vst [vmem:[#allocation1] ss:$9 sm:$0xff] %v6069_v9  ;;  %v6078_v9 = vrot.slane %v4872_v39, 6  ;;  %4022 = vmatpush.msk.msra.mxu1 %vm1328_vm8, %v1323_v11 }
 0x26d   : > { %1353 = vst [vmem:[#allocation1 + $0x1] ss:$9 sm:$0xff] %v4872_v39 }
 0x26e   : > { %1355 = vst [vmem:[#allocation1 + $0x2] ss:$9 sm:$0xff] %v6071_v23  ;;  %v6077_v23 = vrot.slane %v4872_v39, 7  ;;  %v4916_v63 = vpop.f32.mrf.mxu0 }
 0x26f   : > { %1357 = vst [vmem:[#allocation1 + $0x3] ss:$9 sm:$0xff] %v6076_v6  ;;  %v6082_v6 = vrot.slane %v4894_v3, 4 }
 0x270   : > { %1359 = vst [vmem:[#allocation1 + $0x4] ss:$9 sm:$0xff] %v6073_v61  ;;  %v6081_v61 = vrot.slane %v4894_v3, 1 }
 0x271   : > { %1361 = vst [vmem:[#allocation1 + $0x5] ss:$9 sm:$0xff] %v6074_v17  ;;  %v6084_v17 = vrot.slane %v4894_v3, 2 }
 0x272   : > { %1363 = vst [vmem:[#allocation1 + $0x6] ss:$9 sm:$0xff] %v6075_v19  ;;  %v6083_v19 = vrot.slane %v4894_v3, 3 }
 0x279   : > { %v1364_v2 = vld [vmem:[#allocation1] sm:$0xff] }
 0x27a   : > { %1390 = vst [vmem:[#allocation1] ss:$9 sm:$0xff] %v6078_v9  ;;  %v6085_v9 = vrot.slane %v4894_v3, 6  ;;  %4024 = vmatpush.msk.msra.mxu2 %vm1328_vm8, %v1364_v2  ;;  %v6106_v2 = vrot.slane %v4762_v21, 3 }
 0x27b   : > { %1392 = vst [vmem:[#allocation1 + $0x1] ss:$9 sm:$0xff] %v6077_v23  ;;  %v1024_v23 = vrot.slane %v4894_v3, 5 }
 0x27c   : > { %1394 = vst [vmem:[#allocation1 + $0x2] ss:$9 sm:$0xff] %v4894_v3 }
 0x27d   : > { %1396 = vst [vmem:[#allocation1 + $0x3] ss:$9 sm:$0xff] %v6081_v61  ;;  %v1026_v61 = vrot.slane %v4894_v3, 7 }
 0x27e   : > { %1398 = vst [vmem:[#allocation1 + $0x4] ss:$9 sm:$0xff] %v6084_v17  ;;  %v6086_v17 = vrot.slane %v4916_v63, 3 }
 0x27f   : > { %1400 = vst [vmem:[#allocation1 + $0x5] ss:$9 sm:$0xff] %v6083_v19  ;;  %v1028_v19 = vrot.slane %v4916_v63, 2 }
 0x280   : > { %1402 = vst [vmem:[#allocation1 + $0x6] ss:$9 sm:$0xff] %v6082_v6  ;;  %v1027_v6 = vrot.slane %v4916_v63, 1 }
 0x287   : > { %v1403_v1 = vld [vmem:[#allocation1] sm:$0xff] }
 0x288   : > { %1429 = vst [vmem:[#allocation1] ss:$9 sm:$0xff] %v1024_v23  ;;  %4026 = vmatpush.msk.msrb.mxu3 %vm1328_vm8, %v1403_v1  ;;  %v6105_v1 = vrot.slane %v4762_v21, 2 }
 0x289   : > { %1431 = vst [vmem:[#allocation1 + $0x1] ss:$9 sm:$0xff] %v6085_v9 }
 0x28a   : > { %1433 = vst [vmem:[#allocation1 + $0x2] ss:$9 sm:$0xff] %v1026_v61 }
 0x28b   : > { %1435 = vst [vmem:[#allocation1 + $0x3] ss:$9 sm:$0xff] %v4916_v63 }
 0x28c   : > { %1437 = vst [vmem:[#allocation1 + $0x4] ss:$9 sm:$0xff] %v1027_v6 }
 0x28d   : > { %1439 = vst [vmem:[#allocation1 + $0x5] ss:$9 sm:$0xff] %v1028_v19 }
 0x28e   : > { %1441 = vst [vmem:[#allocation1 + $0x6] ss:$9 sm:$0xff] %v6086_v17 }
 0x295   : > { %v1442_v9 = vld [vmem:[#allocation1] sm:$0xff] }
 0x296   : > { %1496 = vst [vmem:[#allocation1] ss:$9 sm:$0xff] %v4675_v24  ;;  %4028 = vmatpush.msk.msra.mxu0 %vm1328_vm8, %v1442_v9  ;;  %v6096_v24 = vrot.slane %v4696_v40, 7  ;;  %v6107_v9 = vrot.slane %v4762_v21, 4 }
 0x297   : > { %1498 = vst [vmem:[#allocation1 + $0x1] ss:$9 sm:$0xff] %v790_v26 }
 0x298   : > { %1500 = vst [vmem:[#allocation1 + $0x2] ss:$9 sm:$0xff] %v791_v28  ;;  %v6092_v28 = vrot.slane %v4717_v57, 2 }
 0x299   : > { %1502 = vst [vmem:[#allocation1 + $0x3] ss:$9 sm:$0xff] %v792_v30  ;;  %v6093_v30 = vrot.slane %v4717_v57, 3 }
 0x29a   : > { %1504 = vst [vmem:[#allocation1 + $0x4] ss:$9 sm:$0xff] %v793_v35  ;;  %v6094_v35 = vrot.slane %v4717_v57, 4 }
 0x29b   : > { %1506 = vst [vmem:[#allocation1 + $0x5] ss:$9 sm:$0xff] %v794_v37  ;;  %v6095_v37 = vrot.slane %v4717_v57, 5 }
 0x29c   : > { %1508 = vst [vmem:[#allocation1 + $0x6] ss:$9 sm:$0xff] %v795_v38 }
 0x2a3   : > { %v4948_v17 = vld [vmem:[#allocation1] sm:$0xff] }
 0x2a4   : > { %1512 = vst [vmem:[#allocation1] ss:$9 sm:$0xff] %v4696_v40 }
 0x2a5   : > { %1514 = vst [vmem:[#allocation1 + $0x1] ss:$9 sm:$0xff] %v898_v41  ;;  %v6097_v41 = vrot.slane %v4740_v5, 1 }
 0x2a6   : > { %1516 = vst [vmem:[#allocation1 + $0x2] ss:$9 sm:$0xff] %v899_v42  ;;  %v6098_v42 = vrot.slane %v4740_v5, 2 }
 0x2a7   : > { %1518 = vst [vmem:[#allocation1 + $0x3] ss:$9 sm:$0xff] %v900_v45  ;;  %v6099_v45 = vrot.slane %v4740_v5, 3 }
 0x2a8   : > { %1520 = vst [vmem:[#allocation1 + $0x4] ss:$9 sm:$0xff] %v901_v46  ;;  %v6100_v46 = vrot.slane %v4740_v5, 4 }
 0x2a9   : > { %1522 = vst [vmem:[#allocation1 + $0x5] ss:$9 sm:$0xff] %v902_v53  ;;  %v6101_v53 = vrot.slane %v4740_v5, 5 }
 0x2aa   : > { %1524 = vst [vmem:[#allocation1 + $0x6] ss:$9 sm:$0xff] %v903_v54  ;;  %v6102_v54 = vrot.slane %v4717_v57, 6 }
 0x2b1   : > { %v4967_v26 = vld [vmem:[#allocation1] sm:$0xff] }
 0x2b2   : > { %1552 = vst [vmem:[#allocation1] ss:$9 sm:$0xff] %v796_v58  ;;  %v6103_v58 = vrot.slane %v4717_v57, 7 }
 0x2b3   : > { %1554 = vst [vmem:[#allocation1 + $0x1] ss:$9 sm:$0xff] %v4717_v57  ;;  %v6109_v57 = vrot.slane %v4740_v5, 7 }
 0x2b4   : > { %1556 = vst [vmem:[#allocation1 + $0x2] ss:$9 sm:$0xff] %v797_v62  ;;  %v6104_v62 = vrot.slane %v4762_v21, 1 }
 0x2b5   : > { %1558 = vst [vmem:[#allocation1 + $0x3] ss:$9 sm:$0xff] %v6092_v28  ;;  %v6108_v28 = vrot.slane %v4740_v5, 6 }
 0x2b6   : > { %1560 = vst [vmem:[#allocation1 + $0x4] ss:$9 sm:$0xff] %v6093_v30  ;;  %v6110_v30 = vrot.slane %v4785_v22, 1 }
 0x2b7   : > { %1562 = vst [vmem:[#allocation1 + $0x5] ss:$9 sm:$0xff] %v6094_v35  ;;  %v6111_v35 = vrot.slane %v4785_v22, 2 }
 0x2b8   : > { %1564 = vst [vmem:[#allocation1 + $0x6] ss:$9 sm:$0xff] %v6095_v37  ;;  %v6112_v37 = vrot.slane %v4785_v22, 3 }
 0x2bf   : > { %v1565_v38 = vld [vmem:[#allocation1] sm:$0xff] }
 0x2c0   : > { %1568 = vst [vmem:[#allocation1] ss:$9 sm:$0xff] %v6096_v24  ;;  %v6113_v24 = vrot.slane %v4785_v22, 4 }
 0x2c1   : > { %1570 = vst [vmem:[#allocation1 + $0x1] ss:$9 sm:$0xff] %v4740_v5  ;;  %v426_v5 = vld [vmem:[%s413_s17] sm:$0xf]  ;;  %s3840_s17 = scalar_lea.hbm %s6032_s8, %s4072_s12 }
 0x2c2   : > { %1572 = vst [vmem:[#allocation1 + $0x2] ss:$9 sm:$0xff] %v6097_v41  ;;  %v1030_v41 = vsub.f32 1.0, %v426_v5  ;;  %v6124_v5 = vrot.slane %v4830_v16, 2  ;;  %s3844_s19 = sshll.u32 %s3840_s17, 4  ;;  %s3845_s19 = int_to_ptr.hbm [resolvable:$true] %s3844_s19 }
 0x2c3   : > { %1574 = vst [vmem:[#allocation1 + $0x3] ss:$9 sm:$0xff] %v6098_v42 }
 0x2c4   : > { %1576 = vst [vmem:[#allocation1 + $0x4] ss:$9 sm:$0xff] %v6099_v45  ;;  %v6114_v45 = vrot.slane %v4762_v21, 5 }
 0x2c5   : > { %1578 = vst [vmem:[#allocation1 + $0x5] ss:$9 sm:$0xff] %v6100_v46  ;;  %v5033_v46 = vmul.f32 -1e+09, %v1030_v41 }
 0x2c6   : > { %1580 = vst [vmem:[#allocation1 + $0x6] ss:$9 sm:$0xff] %v6101_v53  ;;  %v6115_v53 = vrot.slane %v4762_v21, 6 }
 0x2c7   : > { %v1033_v41 = vrot.slane %v5033_v46, 1 }
 0x2cd   : > { %v4995_v40 = vld [vmem:[#allocation1] sm:$0xff] }
 0x2ce   : > { %1608 = vst [vmem:[#allocation1] ss:$9 sm:$0xff] %v6102_v54  ;;  %v6116_v54 = vrot.slane %v4762_v21, 7 }
 0x2cf   : > { %1610 = vst [vmem:[#allocation1 + $0x1] ss:$9 sm:$0xff] %v6103_v58  ;;  %v6117_v58 = vrot.slane %v4807_v12, 1 }
 0x2d0   : > { %1612 = vst [vmem:[#allocation1 + $0x2] ss:$9 sm:$0xff] %v4762_v21 }
 0x2d1   : > { %1614 = vst [vmem:[#allocation1 + $0x3] ss:$9 sm:$0xff] %v6104_v62  ;;  %v1090_v62 = vpop.f32.mrf.mxu1 }
 0x2d2   : > { %1616 = vst [vmem:[#allocation1 + $0x4] ss:$9 sm:$0xff] %v6105_v1  ;;  %v6118_v1 = vrot.slane %v4807_v12, 2 }
 0x2d3   : > { %1618 = vst [vmem:[#allocation1 + $0x5] ss:$9 sm:$0xff] %v6106_v2  ;;  %v1249_v2 = vmul.f32 0.25, %v1090_v62 }
 0x2d4   : > { %1620 = vst [vmem:[#allocation1 + $0x6] ss:$9 sm:$0xff] %v6107_v9  ;;  %v1253_v9 = vperm.slane %v5033_v46, 0 }
 0x2db   : > { %v5010_v11 = vld [vmem:[#allocation1] sm:$0xff] }
 0x2dc   : > { %1624 = vst [vmem:[#allocation1] ss:$9 sm:$0xff] %v6108_v28  ;;  %v6119_v28 = vrot.slane %v4807_v12, 3 }
 0x2dd   : > { %1626 = vst [vmem:[#allocation1 + $0x1] ss:$9 sm:$0xff] %v6109_v57  ;;  %v5049_v57 = vadd.f32 %v1253_v9, %v1249_v2  ;;  %v6126_v2 = vrot.slane %v4849_v8, 1 }
 0x2de   : > { %1628 = vst [vmem:[#allocation1 + $0x2] ss:$9 sm:$0xff] %v4785_v22 }
 0x2df   : > { %1630 = vst [vmem:[#allocation1 + $0x3] ss:$9 sm:$0xff] %v6110_v30  ;;  %v1266_v21 = vsel %vm1265_vm9, %v5049_v57, -inf }
 0x2e0   : > { %1632 = vst [vmem:[#allocation1 + $0x4] ss:$9 sm:$0xff] %v6111_v35  ;;  %1267 = vmax.xlane.f32.xlu0 %v1266_v21  ;;  %v6120_v35 = vrot.slane %v4785_v22, 5  ;;  %v6129_v21 = vrot.slane %v4849_v8, 4 }
 0x2e1   : > { %1634 = vst [vmem:[#allocation1 + $0x5] ss:$9 sm:$0xff] %v6112_v37  ;;  %v6121_v37 = vrot.slane %v4785_v22, 6 }
 0x2e2   : > { %1636 = vst [vmem:[#allocation1 + $0x6] ss:$9 sm:$0xff] %v6113_v24  ;;  %v6123_v24 = vrot.slane %v4830_v16, 1 }
 0x2e9   : > { %v5029_v42 = vld [vmem:[#allocation1] sm:$0xff] }
 0x2ea   : > { %1664 = vst [vmem:[#allocation1] ss:$9 sm:$0xff] %v6114_v45  ;;  %v6125_v45 = vrot.slane %v4830_v16, 3 }
 0x2eb   : > { %1666 = vst [vmem:[#allocation1 + $0x1] ss:$9 sm:$0xff] %v6115_v53  ;;  %v1142_v53 = vpop.f32.mrf.mxu1 }
 0x2ec   : > { %1668 = vst [vmem:[#allocation1 + $0x2] ss:$9 sm:$0xff] %v6116_v54  ;;  %v1250_v54 = vmul.f32 0.25, %v1142_v53 }
 0x2ed   : > { %1670 = vst [vmem:[#allocation1 + $0x3] ss:$9 sm:$0xff] %v4807_v12  ;;  %v6122_v12 = vrot.slane %v4785_v22, 7 }
 0x2ee   : > { %1672 = vst [vmem:[#allocation1 + $0x4] ss:$9 sm:$0xff] %v6117_v58  ;;  %v5069_v58 = vperm.slane %v1033_v41, 0 }
 0x2ef   : > { %1674 = vst [vmem:[#allocation1 + $0x5] ss:$9 sm:$0xff] %v6118_v1 }
 0x2f0   : > { %1676 = vst [vmem:[#allocation1 + $0x6] ss:$9 sm:$0xff] %v6119_v28  ;;  %v5072_v22 = vadd.f32 %v5069_v58, %v1250_v54  ;;  %v6128_v28 = vrot.slane %v4849_v8, 3  ;;  %v6132_v54 = vrot.slane %v4849_v8, 7 }
 0x2f2   : > { %v1269_v62 = vsel %vm1265_vm9, %v5072_v22, -inf }
 0x2f3   : > { %1270 = vmax.xlane.f32.xlu2 %v1269_v62  ;;  %v6133_v62 = vrot.slane %v4872_v39, 1 }
 0x2f4   : > { %1566 = vrot.lane.b32.xlu0 %v1565_v38, %s4328_s26 }
 0x2f7   : > { %v5053_v30 = vld [vmem:[#allocation1] sm:$0xff] }
 0x2f8   : > { %1680 = vst [vmem:[#allocation1] ss:$9 sm:$0xff] %v6120_v35  ;;  %v6130_v35 = vrot.slane %v4849_v8, 5 }
 0x2f9   : > { %1682 = vst [vmem:[#allocation1 + $0x1] ss:$9 sm:$0xff] %v6121_v37  ;;  %v6131_v37 = vrot.slane %v4849_v8, 6 }
 0x2fa   : > { %1684 = vst [vmem:[#allocation1 + $0x2] ss:$9 sm:$0xff] %v6122_v12  ;;  %v1034_v12 = vrot.slane %v5033_v46, 2 }
 0x2fb   : > { %1686 = vst [vmem:[#allocation1 + $0x3] ss:$9 sm:$0xff] %v4830_v16  ;;  %v6127_v16 = vrot.slane %v4849_v8, 2 }
 0x2fc   : > { %1688 = vst [vmem:[#allocation1 + $0x4] ss:$9 sm:$0xff] %v6123_v24  ;;  %v1194_v24 = vpop.f32.mrf.mxu1  ;;  %v5091_v41 = vperm.slane %v1034_v12, 0 }
 0x2fd   : > { %1690 = vst [vmem:[#allocation1 + $0x5] ss:$9 sm:$0xff] %v6124_v5  ;;  %v1251_v5 = vmul.f32 0.25, %v1194_v24 }
 0x2fe   : > { %1692 = vst [vmem:[#allocation1 + $0x6] ss:$9 sm:$0xff] %v6125_v45 }
 0x2ff   : > { %v1263_v38 = vadd.f32 %v5091_v41, %v1251_v5 }
 0x301   : > { %v1272_v53 = vsel %vm1265_vm9, %v1263_v38, -inf }
 0x302   : > { %1273 = vmax.xlane.f32.xlu2 %v1272_v53  ;;  %v6138_v53 = vrot.slane %v4872_v39, 6 }
 0x305   : > { %v1693_v1 = vld [vmem:[#allocation1] sm:$0xff] }
 0x306   : > { %1772 = vst [vmem:[#allocation1] ss:$9 sm:$0xff] %v4849_v8  ;;  %v1246_v8 = vpop.f32.mrf.mxu3 }
 0x307   : > { %1774 = vst [vmem:[#allocation1 + $0x1] ss:$9 sm:$0xff] %v6126_v2  ;;  %v6134_v2 = vrot.slane %v4872_v39, 2 }
 0x308   : > { %1776 = vst [vmem:[#allocation1 + $0x2] ss:$9 sm:$0xff] %v6127_v16  ;;  %v6135_v16 = vrot.slane %v4872_v39, 3 }
 0x309   : > { %1778 = vst [vmem:[#allocation1 + $0x3] ss:$9 sm:$0xff] %v6128_v28  ;;  %v6136_v28 = vrot.slane %v4872_v39, 4 }
 0x30a   : > { %1780 = vst [vmem:[#allocation1 + $0x4] ss:$9 sm:$0xff] %v6129_v21  ;;  %v6137_v21 = vrot.slane %v4872_v39, 5 }
 0x30b   : > { %1782 = vst [vmem:[#allocation1 + $0x5] ss:$9 sm:$0xff] %v6130_v35  ;;  %v1035_v35 = vrot.slane %v5033_v46, 3 }
 0x30c   : > { %1784 = vst [vmem:[#allocation1 + $0x6] ss:$9 sm:$0xff] %v6131_v37  ;;  %v1252_v37 = vmul.f32 0.25, %v1246_v8  ;;  %v6144_v8 = vrot.slane %v4894_v3, 6 }
 0x30d   : > { %v5111_v12 = vperm.slane %v1035_v35, 0 }
 0x30f   : > { %v1264_v5 = vadd.f32 %v5111_v12, %v1252_v37 }
 0x313   : > { %v5094_v45 = vld [vmem:[#allocation1] sm:$0xff] }
 0x314   : > { %1813 = vst [vmem:[#allocation1] ss:$9 sm:$0xff] %v6132_v54  ;;  %v6139_v54 = vrot.slane %v4872_v39, 7 }
 0x315   : > { %1815 = vst [vmem:[#allocation1 + $0x1] ss:$9 sm:$0xff] %v4872_v39 }
 0x316   : > { %1817 = vst [vmem:[#allocation1 + $0x2] ss:$9 sm:$0xff] %v6133_v62  ;;  %v1275_v62 = vsel %vm1265_vm9, %v1264_v5, -inf }
 0x317   : > { %1819 = vst [vmem:[#allocation1 + $0x3] ss:$9 sm:$0xff] %v6134_v2  ;;  %1276 = vmax.xlane.f32.xlu1 %v1275_v62  ;;  %v6140_v2 = vrot.slane %v4894_v3, 1 }
 0x318   : > { %1821 = vst [vmem:[#allocation1 + $0x4] ss:$9 sm:$0xff] %v6135_v16  ;;  %v6141_v16 = vrot.slane %v4894_v3, 2 }
 0x319   : > { %1823 = vst [vmem:[#allocation1 + $0x5] ss:$9 sm:$0xff] %v6136_v28  ;;  %v6142_v28 = vrot.slane %v4894_v3, 3 }
 0x31a   : > { %1825 = vst [vmem:[#allocation1 + $0x6] ss:$9 sm:$0xff] %v6137_v21  ;;  %v6143_v21 = vrot.slane %v4894_v3, 4  ;;  %1582 = vrot.lane.b32.xlu2 %v4995_v40, %s4328_s26  ;;  %v6145_v40 = vrot.slane %v4916_v63, 3 }
 0x321   : > { %v5113_v24 = vld [vmem:[#allocation1] sm:$0xff] }
 0x322   : > { %1854 = vst [vmem:[#allocation1] ss:$9 sm:$0xff] %v6138_v53  ;;  %1622 = vrot.lane.b32.xlu2 %v5010_v11, %s4328_s26 }
 0x323   : > { %1856 = vst [vmem:[#allocation1 + $0x1] ss:$9 sm:$0xff] %v6139_v54 }
 0x324   : > { %1858 = vst [vmem:[#allocation1 + $0x2] ss:$9 sm:$0xff] %v4894_v3 }
 0x325   : > { %1860 = vst [vmem:[#allocation1 + $0x3] ss:$9 sm:$0xff] %v6140_v2 }
 0x326   : > { %1862 = vst [vmem:[#allocation1 + $0x4] ss:$9 sm:$0xff] %v6141_v16 }
 0x327   : > { %1864 = vst [vmem:[#allocation1 + $0x5] ss:$9 sm:$0xff] %v6142_v28 }
 0x328   : > { %1866 = vst [vmem:[#allocation1 + $0x6] ss:$9 sm:$0xff] %v6143_v21 }
 0x32a   : > { %1526 = vrot.lane.b32.xlu2 %v4967_v26, %s4328_s26 }
 0x32f   : > { %v5132_v39 = vld [vmem:[#allocation1] sm:$0xff] }
 0x330   : > { %1895 = vst [vmem:[#allocation1] ss:$9 sm:$0xff] %v1024_v23  ;;  %1638 = vrot.lane.b32.xlu1 %v5029_v42, %s4328_s26 }
 0x331   : > { %1897 = vst [vmem:[#allocation1 + $0x1] ss:$9 sm:$0xff] %v6144_v8 }
 0x332   : > { %1899 = vst [vmem:[#allocation1 + $0x2] ss:$9 sm:$0xff] %v1026_v61 }
 0x333   : > { %1901 = vst [vmem:[#allocation1 + $0x3] ss:$9 sm:$0xff] %v4916_v63 }
 0x334   : > { %1903 = vst [vmem:[#allocation1 + $0x4] ss:$9 sm:$0xff] %v1027_v6 }
 0x335   : > { %1905 = vst [vmem:[#allocation1 + $0x5] ss:$9 sm:$0xff] %v1028_v19 }
 0x336   : > { %1907 = vst [vmem:[#allocation1 + $0x6] ss:$9 sm:$0xff] %v6145_v40 }
 0x338   : > { %1694 = vrot.lane.b32.xlu1 %v1693_v1, %s4328_s26 }
 0x353   : > { %v1268_v3 = vpop.xlane.xlu0 %1267 }
 0x354   : > { %v1278_v6 = vsub.f32 %v5049_v57, %v1268_v3 }
 0x356   : > { %v1282_v61 = vmul.f32 1.442695, %v1278_v6 }
 0x358   : > { %4156 = vpow2.f32 %v1282_v61 }
 0x35e   : > { %v4157_v23 = vpop.eup %4156 }
 0x35f   : > { %v1290_v11 = vsel %vm1265_vm9, %v4157_v23, 0.0 }
 0x360   : > { %1291 = vadd.xlane.f32.xlu2 %v1290_v11 }
 0x366   : > { %v1271_v19 = vpop.xlane.xlu2 %1270 }
 0x367   : > { %v1279_v63 = vsub.f32 %v5072_v22, %v1271_v19 }
 0x369   : > { %v1284_v35 = vmul.f32 1.442695, %v1279_v63 }
 0x36b   : > { %4158 = vpow2.f32 %v1284_v35  ;;  %v1567_v35 = vpop.permute.xlu0 %1566 }
 0x371   : > { %v4159_v26 = vpop.eup %4158 }
 0x372   : > { %v1293_v37 = vsel %vm1265_vm9, %v4159_v26, 0.0 }
 0x373   : > { %1294 = vadd.xlane.f32.xlu2 %v1293_v37 }
 0x375   : > { %v1274_v42 = vpop.xlane.xlu2 %1273 }
 0x376   : > { %v1280_v1 = vsub.f32 %v1263_v38, %v1274_v42 }
 0x378   : > { %v1286_v53 = vmul.f32 1.442695, %v1280_v1 }
 0x37a   : > { %4160 = vpow2.f32 %v1286_v53 }
 0x37d   : > { %v1583_v57 = vpop.permute.xlu2 %1582 }
 0x37e   : > { %4032 = vmatpush.xpose.msk.msrb.mxu2 %vm1068_vm7, %v1583_v57 }
 0x380   : > { %v4161_v54 = vpop.eup %4160 }
 0x381   : > { %v1296_v62 = vsel %vm1265_vm9, %v4161_v54, 0.0 }
 0x382   : > { %1297 = vadd.xlane.f32.xlu2 %v1296_v62 }
 0x385   : > { %v1623_v2 = vpop.permute.xlu2 %1622 }
 0x38a   : > { %v1277_v16 = vpop.xlane.xlu1 %1276 }
 0x38b   : > { %v1281_v22 = vsub.f32 %v1264_v5, %v1277_v16 }
 0x38d   : > { %v1288_v28 = vmul.f32 1.442695, %v1281_v22  ;;  %v1527_v21 = vpop.permute.xlu2 %1526 }
 0x38e   : > { %4030 = vmatpush.xpose.msk.msrb.mxu1 %vm1068_vm7, %v1527_v21 }
 0x38f   : > { %4162 = vpow2.f32 %v1288_v28 }
 0x395   : > { %v4163_v8 = vpop.eup %4162 }
 0x396   : > { %v1299_v38 = vsel %vm1265_vm9, %v4163_v8, 0.0 }
 0x397   : > { %1300 = vadd.xlane.f32.xlu0 %v1299_v38 }
 0x39a   : > { %1510 = vrot.lane.b32.xlu2 %v4948_v17, %s4328_s26 }
 0x3a2   : > { %v1639_v40 = vpop.permute.xlu1 %1638  ;;  %1678 = vrot.lane.b32.xlu2 %v5053_v30, %s4328_s26 }
 0x3a3   : > { %4034 = vmatpush.xpose.msk.msra.mxu3 %vm1068_vm7, %v1639_v40 }
 0x3aa   : > { %v1695_v3 = vpop.permute.xlu1 %1694 }
 0x3ab   : > { %4036 = vmatpush.xpose.msk.msrb.mxu0 %vm1068_vm7, %v1695_v3 }
 0x3d3   : > { %v1292_v5 = vpop.xlane.xlu2 %1291 }
 0x3d4   : > { %4164 = vrcp.f32 %v1292_v5 }
 0x3da   : > { %v4165_v6 = vpop.eup %4164 }
 0x3db   : > { %v1306_v61 = vmul.f32 %v4165_v6, %v4157_v23 }
 0x3dd   : > { %4023 = vmatmul.msk.f32.vlgmr.msra.gmra.mxu1 %vm1324_vm10, %v1306_v61 }
 0x3e6   : > { %v1295_v11 = vpop.xlane.xlu2 %1294 }
 0x3e7   : > { %4166 = vrcp.f32 %v1295_v11 }
 0x3ed   : > { %v4167_v19 = vpop.eup %4166 }
 0x3ee   : > { %v1307_v17 = vmul.f32 %v4167_v19, %v4159_v26 }
 0x3f0   : > { %4025 = vmatmul.msk.f32.vlgmr.msra.gmra.mxu2 %vm1324_vm10, %v1307_v17 }
 0x3f5   : > { %v1298_v63 = vpop.xlane.xlu2 %1297 }
 0x3f6   : > { %4168 = vrcp.f32 %v1298_v63 }
 0x3f8   : > { %4033 = vmatmul.msk.f32.vlgmr.msrb.gmra.mxu2 %vm1068_vm7, %v1567_v35 }
 0x3fc   : > { %v4169_v30 = vpop.eup %4168 }
 0x3fd   : > { %v1308_v37 = vmul.f32 %v4169_v30, %v4161_v54  ;;  %v1511_v42 = vpop.permute.xlu2 %1510 }
 0x3fe   : > { %4031 = vmatmul.msk.f32.vlgmr.msrb.gmra.mxu1 %vm1068_vm7, %v1511_v42 }
 0x3ff   : > { %4027 = vmatmul.msk.f32.vlgmr.msrb.gmra.mxu3 %vm1324_vm10, %v1308_v37 }
 0x405   : > { %v1679_v53 = vpop.permute.xlu2 %1678 }
 0x407   : > { %4035 = vmatmul.msk.f32.vlgmr.msra.gmra.mxu3 %vm1068_vm7, %v1623_v2 }
 0x40a   : > { %v1301_v23 = vpop.xlane.xlu0 %1300 }
 0x40b   : > { %4170 = vrcp.f32 %v1301_v23 }
 0x411   : > { %v4171_v1 = vpop.eup %4170 }
 0x412   : > { %v1309_v26 = vmul.f32 %v4171_v1, %v4163_v8 }
 0x414   : > { %4029 = vmatmul.msk.f32.vlgmr.msra.gmra.mxu0 %vm1324_vm10, %v1309_v26 }
 0x41c   : > { %4037 = vmatmul.msk.f32.vlgmr.msrb.gmra.mxu0 %vm1068_vm7, %v1679_v53 }
 0x45a   : > { %v5178_v62 = vpop.f32.mrf.mxu1 }
 0x473   : > { %v5176_v57 = vpop.f32.mrf.mxu2 }
 0x47b   : > { %v1605_v54 = vpop.f32.mrf.mxu2  ;;  %v1549_v22 = vpop.f32.mrf.mxu1 }
 0x47c   : > { %v1721_v16 = vmul.f32 0.25, %v1605_v54  ;;  %v1720_v28 = vmul.f32 0.25, %v1549_v22 }
 0x47e   : > { %v1725_v21 = vadd.f32 %v1721_v16, %v5069_v58  ;;  %v1724_v2 = vadd.f32 %v1720_v28, %v1253_v9  ;;  %v1908_v28 = vld [vmem:[#allocation1] sm:$0xff] }
 0x480   : > { %v1731_v8 = vsel %vm1265_vm9, %v1725_v21, -inf  ;;  %v1728_v38 = vsel %vm1265_vm9, %v1724_v2, -inf }
 0x481   : > { %1732 = vmax.xlane.f32.xlu1 %v1731_v8  ;;  %1729 = vmax.xlane.f32.xlu2 %v1728_v38 }
 0x482   : > { %v5185_v40 = vpop.f32.mrf.mxu3 }
 0x48a   : > { %v1661_v3 = vpop.f32.mrf.mxu3 }
 0x48b   : > { %v1722_v5 = vmul.f32 0.25, %v1661_v3 }
 0x48d   : > { %v1726_v61 = vadd.f32 %v1722_v5, %v5091_v41 }
 0x48f   : > { %v1734_v11 = vsel %vm1265_vm9, %v1726_v61, -inf }
 0x490   : > { %1735 = vmax.xlane.f32.xlu0 %v1734_v11 }
 0x491   : > { %v5187_v6 = vpop.f32.mrf.mxu0 }
 0x499   : > { %v1717_v58 = vpop.f32.mrf.mxu0 }
 0x49a   : > { %v1723_v46 = vmul.f32 0.25, %v1717_v58  ;;  %1827 = vrot.lane.b32.xlu1 %v5113_v24, %s4328_s26 }
 0x49c   : > { %v1727_v9 = vadd.f32 %v1723_v46, %v5111_v12 }
 0x49e   : > { %v1737_v19 = vsel %vm1265_vm9, %v1727_v9, -inf }
 0x49f   : > { %1738 = vmax.xlane.f32.xlu0 %v1737_v19 }
 0x4f4   : > { %v1733_v17 = vpop.xlane.xlu1 %1732  ;;  %v1730_v35 = vpop.xlane.xlu2 %1729 }
 0x4f5   : > { %v1741_v63 = vsub.f32 %v1725_v21, %v1733_v17  ;;  %v1740_v30 = vsub.f32 %v1724_v2, %v1730_v35 }
 0x4f7   : > { %v1746_v37 = vmul.f32 1.442695, %v1741_v63  ;;  %v1744_v42 = vmul.f32 1.442695, %v1740_v30 }
 0x4f9   : > { %4172 = vpow2.f32 %v1746_v37 }
 0x4fa   : > { %4174 = vpow2.f32 %v1744_v42 }
 0x4ff   : > { %v4173_v41 = vpop.eup %4172 }
 0x500   : > { %v4175_v23 = vpop.eup %4174  ;;  %v1755_v1 = vsel %vm1265_vm9, %v4173_v41, 0.0 }
 0x501   : > { %1756 = vadd.xlane.f32.xlu1 %v1755_v1  ;;  %v1752_v12 = vsel %vm1265_vm9, %v4175_v23, 0.0 }
 0x502   : > { %1753 = vadd.xlane.f32.xlu0 %v1752_v12 }
 0x503   : > { %v1736_v24 = vpop.xlane.xlu0 %1735 }
 0x504   : > { %v1742_v26 = vsub.f32 %v1726_v61, %v1736_v24 }
 0x506   : > { %v1748_v53 = vmul.f32 1.442695, %v1742_v26 }
 0x508   : > { %4176 = vpow2.f32 %v1748_v53 }
 0x50c   : > { %v1828_v54 = vpop.permute.xlu1 %1827 }
 0x50d   : > { %4040 = vmatpush.msk.msra.mxu2 %vm1328_vm8, %v1828_v54 }
 0x50e   : > { %v4177_v16 = vpop.eup %4176 }
 0x50f   : > { %v1758_v22 = vsel %vm1265_vm9, %v4177_v16, 0.0 }
 0x510   : > { %1759 = vadd.xlane.f32.xlu2 %v1758_v22 }
 0x512   : > { %v1739_v21 = vpop.xlane.xlu0 %1738 }
 0x513   : > { %v1743_v2 = vsub.f32 %v1727_v9, %v1739_v21 }
 0x515   : > { %v1750_v8 = vmul.f32 1.442695, %v1743_v2 }
 0x516   : > { %1786 = vrot.lane.b32.xlu0 %v5094_v45, %s4328_s26 }
 0x517   : > { %4178 = vpow2.f32 %v1750_v8 }
 0x51a   : > { %1909 = vrot.lane.b32.xlu1 %v1908_v28, %s4328_s26 }
 0x51d   : > { %v4179_v38 = vpop.eup %4178 }
 0x51e   : > { %v1761_v3 = vsel %vm1265_vm9, %v4179_v38, 0.0 }
 0x528   : > { %1868 = vrot.lane.b32.xlu2 %v5132_v39, %s4328_s26 }
 0x540   : > { %1762 = vadd.xlane.f32.xlu0 %v1761_v3 }
 0x574   : > { %v1757_v5 = vpop.xlane.xlu1 %1756 }
 0x575   : > { %4180 = vrcp.f32 %v1757_v5  ;;  %v1754_v58 = vpop.xlane.xlu0 %1753 }
 0x576   : > { %4182 = vrcp.f32 %v1754_v58 }
 0x57b   : > { %v4181_v61 = vpop.eup %4180 }
 0x57c   : > { %v1769_v11 = vmul.f32 %v4181_v61, %v4173_v41  ;;  %v4183_v46 = vpop.eup %4182  ;;  %v1039_v41 = vld [vmem:[#allocation2 + $0x160] sm:$0xff] }
 0x57d   : > { %v1768_v39 = vmul.f32 %v4183_v46, %v4175_v23 }
 0x57e   : > { %4041 = vmatmul.msk.f32.vlgmr.msra.gmra.mxu2 %vm1324_vm10, %v1769_v11 }
 0x583   : > { %v1760_v45 = vpop.xlane.xlu2 %1759 }
 0x584   : > { %4184 = vrcp.f32 %v1760_v45 }
 0x588   : > { %v1787_v19 = vpop.permute.xlu0 %1786 }
 0x589   : > { %4038 = vmatpush.msk.msra.mxu1 %vm1328_vm8, %v1787_v19 }
 0x58a   : > { %4039 = vmatmul.msk.f32.vlgmr.msra.gmra.mxu1 %vm1324_vm10, %v1768_v39  ;;  %v4185_v9 = vpop.eup %4184 }
 0x58b   : > { %v1770_v17 = vmul.f32 %v4185_v9, %v4177_v16  ;;  %v1869_v63 = vpop.permute.xlu2 %1868  ;;  %2025 = vmatpush.msrb.mxu1 %v1039_v41  ;;  %v1038_v16 = vld [vmem:[#allocation2 + $0x158] sm:$0xff] }
 0x58c   : > { %v1910_v35 = vpop.permute.xlu1 %1909  ;;  %4042 = vmatpush.msk.msrb.mxu3 %vm1328_vm8, %v1869_v63 }
 0x58d   : > { %4044 = vmatpush.msk.msra.mxu0 %vm1328_vm8, %v1910_v35  ;;  %4043 = vmatmul.msk.f32.vlgmr.msrb.gmra.mxu3 %vm1324_vm10, %v1770_v17 }
 0x58e   : > { %2026 = vmatpush.msrb.mxu1 %v1038_v16  ;;  %v1036_v16 = vld [vmem:[#allocation2 + $0x148] sm:$0xff] }
 0x5b3   : > { %v1763_v30 = vpop.xlane.xlu0 %1762 }
 0x5b4   : > { %4186 = vrcp.f32 %v1763_v30 }
 0x5ba   : > { %v4187_v37 = vpop.eup %4186 }
 0x5bb   : > { %v1771_v42 = vmul.f32 %v4187_v37, %v4179_v38 }
 0x5bd   : > { %4045 = vmatmul.msk.f32.vlgmr.msra.gmra.mxu0 %vm1324_vm10, %v1771_v42 }
 0x601   : > { %v1851_v23 = vpop.f32.mrf.mxu2 }
 0x602   : > { %1978 = vst [vmem:[#allocation1 + $0x7] ss:$9 sm:$0xff] %v1851_v23  ;;  %v1946_v28 = vrot.slane %v1851_v23, 1  ;;  %v1947_v21 = vrot.slane %v1851_v23, 2  ;;  %v1948_v8 = vrot.slane %v1851_v23, 3  ;;  %v1949_v3 = vrot.slane %v1851_v23, 4 }
 0x603   : > { %v1950_v5 = vrot.slane %v1851_v23, 5  ;;  %v1951_v61 = vrot.slane %v1851_v23, 6 }
 0x607   : > { %v1810_v1 = vpop.f32.mrf.mxu1 }
 0x608   : > { %v1940_v12 = vrot.slane %v1810_v1, 1  ;;  %v1941_v24 = vrot.slane %v1810_v1, 2  ;;  %v1942_v26 = vrot.slane %v1810_v1, 3  ;;  %1964 = vst [vmem:[#allocation1] ss:$9 sm:$0xff] %v1810_v1  ;;  %v1943_v53 = vrot.slane %v1810_v1, 4 }
 0x609   : > { %v1944_v54 = vrot.slane %v1810_v1, 5  ;;  %v1945_v22 = vrot.slane %v1810_v1, 6  ;;  %v1472_v1 = vrot.slane %v5178_v62, 1 }
 0x60a   : > { %1966 = vst [vmem:[#allocation1 + $0x1] ss:$9 sm:$0xff] %v1940_v12 }
 0x60b   : > { %1968 = vst [vmem:[#allocation1 + $0x2] ss:$9 sm:$0xff] %v1941_v24  ;;  %v1473_v24 = vrot.slane %v5178_v62, 2 }
 0x60c   : > { %1970 = vst [vmem:[#allocation1 + $0x3] ss:$9 sm:$0xff] %v1942_v26  ;;  %v1037_v26 = vld [vmem:[#allocation2 + $0x150] sm:$0xff] }
 0x60d   : > { %1972 = vst [vmem:[#allocation1 + $0x4] ss:$9 sm:$0xff] %v1943_v53  ;;  %v1474_v53 = vrot.slane %v5178_v62, 3  ;;  %2101 = vmatpush.msrb.mxu2 %v1037_v26 }
 0x60e   : > { %1974 = vst [vmem:[#allocation1 + $0x5] ss:$9 sm:$0xff] %v1944_v54  ;;  %v1475_v54 = vrot.slane %v5178_v62, 4 }
 0x60f   : > { %1976 = vst [vmem:[#allocation1 + $0x6] ss:$9 sm:$0xff] %v1945_v22  ;;  %v1476_v22 = vrot.slane %v5178_v62, 5  ;;  %2102 = vmatpush.msrb.mxu2 %v1036_v16 }
 0x610   : > { %v1892_v38 = vpop.f32.mrf.mxu3 }
 0x611   : > { %v1952_v11 = vrot.slane %v1892_v38, 1  ;;  %v1953_v58 = vrot.slane %v1892_v38, 2  ;;  %v1954_v45 = vrot.slane %v1892_v38, 3  ;;  %v1955_v39 = vrot.slane %v1892_v38, 4 }
 0x612   : > { %v1956_v19 = vrot.slane %v1892_v38, 5  ;;  %v1957_v9 = vrot.slane %v1892_v38, 6 }
 0x616   : > { %v1979_v2 = vld [vmem:[#allocation1] sm:$0xff] }
 0x617   : > { %1980 = vst [vmem:[#allocation1] ss:$9 sm:$0xff] %v1946_v28  ;;  %4046 = vmatmul.msk.f32.vlgmr.msrb.gmra.mxu1 %vm1068_vm7, %v1979_v2  ;;  %v1477_v28 = vrot.slane %v5178_v62, 6  ;;  %v1479_v2 = vrot.slane %v5176_v57, 2 }
 0x618   : > { %1981 = vst [vmem:[#allocation1 + $0x1] ss:$9 sm:$0xff] %v1947_v21  ;;  %v1478_v21 = vrot.slane %v5176_v57, 1 }
 0x619   : > { %1982 = vst [vmem:[#allocation1 + $0x2] ss:$9 sm:$0xff] %v1948_v8 }
 0x61a   : > { %1983 = vst [vmem:[#allocation1 + $0x3] ss:$9 sm:$0xff] %v1949_v3  ;;  %v1481_v3 = vrot.slane %v5176_v57, 4 }
 0x61b   : > { %1984 = vst [vmem:[#allocation1 + $0x4] ss:$9 sm:$0xff] %v1950_v5  ;;  %v1483_v5 = vrot.slane %v5176_v57, 6 }
 0x61c   : > { %1985 = vst [vmem:[#allocation1 + $0x5] ss:$9 sm:$0xff] %v1951_v61  ;;  %v1484_v61 = vrot.slane %v5185_v40, 1 }
 0x61d   : > { %1986 = vst [vmem:[#allocation1 + $0x6] ss:$9 sm:$0xff] %v1892_v38  ;;  %v1480_v38 = vrot.slane %v5176_v57, 3 }
 0x61e   : > { %1987 = vst [vmem:[#allocation1 + $0x7] ss:$9 sm:$0xff] %v1952_v11  ;;  %v1485_v11 = vrot.slane %v5185_v40, 2 }
 0x625   : > { %v1988_v46 = vld [vmem:[#allocation1] sm:$0xff] }
 0x626   : > { %1989 = vst [vmem:[#allocation1] ss:$9 sm:$0xff] %v1953_v58  ;;  %4047 = vmatmul.msk.f32.gmra.mxu1 %vm1068_vm7, %v1988_v46  ;;  %v1486_v58 = vrot.slane %v5185_v40, 3  ;;  %v1487_v46 = vrot.slane %v5185_v40, 4 }
 0x627   : > { %1990 = vst [vmem:[#allocation1 + $0x1] ss:$9 sm:$0xff] %v1954_v45 }
 0x628   : > { %1991 = vst [vmem:[#allocation1 + $0x2] ss:$9 sm:$0xff] %v1955_v39  ;;  %v1489_v39 = vrot.slane %v5185_v40, 6 }
 0x629   : > { %1992 = vst [vmem:[#allocation1 + $0x3] ss:$9 sm:$0xff] %v1956_v19  ;;  %v1490_v19 = vrot.slane %v5187_v6, 1 }
 0x62a   : > { %1993 = vst [vmem:[#allocation1 + $0x4] ss:$9 sm:$0xff] %v1957_v9  ;;  %v1491_v9 = vrot.slane %v5187_v6, 2 }
 0x63a   : > { %v1933_v17 = vpop.f32.mrf.mxu0 }
 0x63b   : > { %v1958_v63 = vrot.slane %v1933_v17, 1  ;;  %v1959_v35 = vrot.slane %v1933_v17, 2  ;;  %1994 = vst [vmem:[#allocation1 + $0x5] ss:$9 sm:$0xff] %v1933_v17  ;;  %v1960_v30 = vrot.slane %v1933_v17, 3  ;;  %v1961_v37 = vrot.slane %v1933_v17, 4 }
 0x63c   : > { %v1962_v41 = vrot.slane %v1933_v17, 5  ;;  %v1963_v23 = vrot.slane %v1933_v17, 6  ;;  %v1492_v17 = vrot.slane %v5187_v6, 3 }
 0x63d   : > { %1995 = vst [vmem:[#allocation1 + $0x6] ss:$9 sm:$0xff] %v1958_v63  ;;  %v1493_v63 = vrot.slane %v5187_v6, 4 }
 0x63e   : > { %1996 = vst [vmem:[#allocation1 + $0x7] ss:$9 sm:$0xff] %v1959_v35 }
 0x645   : > { %v1997_v42 = vld [vmem:[#allocation1] sm:$0xff] }
 0x646   : > { %1998 = vst [vmem:[#allocation1] ss:$9 sm:$0xff] %v1960_v30  ;;  %4048 = vmatmul.msk.f32.gmra.mxu1 %vm1068_vm7, %v1997_v42  ;;  %v1494_v30 = vrot.slane %v5187_v6, 5 }
 0x647   : > { %1999 = vst [vmem:[#allocation1 + $0x1] ss:$9 sm:$0xff] %v1961_v37 }
 0x648   : > { %2000 = vst [vmem:[#allocation1 + $0x2] ss:$9 sm:$0xff] %v1962_v41 }
 0x649   : > { %2001 = vst [vmem:[#allocation1 + $0x3] ss:$9 sm:$0xff] %v1963_v23 }
 0x650   : > { %v2002_v12 = vld [vmem:[#allocation1] sm:$0xff] }
 0x651   : > { %2040 = vst [vmem:[#allocation1] ss:$9 sm:$0xff] %v5178_v62  ;;  %4049 = vmatmul.msk.f32.gmra.mxu1 %vm1068_vm7, %v2002_v12  ;;  %v1482_v62 = vrot.slane %v5176_v57, 5 }
 0x652   : > { %2042 = vst [vmem:[#allocation1 + $0x1] ss:$9 sm:$0xff] %v1472_v1 }
 0x653   : > { %2044 = vst [vmem:[#allocation1 + $0x2] ss:$9 sm:$0xff] %v1473_v24 }
 0x654   : > { %2046 = vst [vmem:[#allocation1 + $0x3] ss:$9 sm:$0xff] %v1474_v53 }
 0x655   : > { %2048 = vst [vmem:[#allocation1 + $0x4] ss:$9 sm:$0xff] %v1475_v54 }
 0x656   : > { %2050 = vst [vmem:[#allocation1 + $0x5] ss:$9 sm:$0xff] %v1476_v22 }
 0x657   : > { %2052 = vst [vmem:[#allocation1 + $0x6] ss:$9 sm:$0xff] %v1477_v28 }
 0x658   : > { %2054 = vst [vmem:[#allocation1 + $0x7] ss:$9 sm:$0xff] %v5176_v57  ;;  %v1488_v57 = vrot.slane %v5185_v40, 5 }
 0x65f   : > { %v2055_v8 = vld [vmem:[#allocation1] sm:$0xff] }
 0x660   : > { %2056 = vst [vmem:[#allocation1] ss:$9 sm:$0xff] %v1478_v21  ;;  %4050 = vmatmul.msk.f32.vlgmr.msrb.gmra.mxu2 %vm1068_vm7, %v2055_v8 }
 0x661   : > { %2057 = vst [vmem:[#allocation1 + $0x1] ss:$9 sm:$0xff] %v1479_v2 }
 0x662   : > { %2058 = vst [vmem:[#allocation1 + $0x2] ss:$9 sm:$0xff] %v1480_v38 }
 0x663   : > { %2059 = vst [vmem:[#allocation1 + $0x3] ss:$9 sm:$0xff] %v1481_v3 }
 0x664   : > { %2060 = vst [vmem:[#allocation1 + $0x4] ss:$9 sm:$0xff] %v1482_v62 }
 0x665   : > { %2061 = vst [vmem:[#allocation1 + $0x5] ss:$9 sm:$0xff] %v1483_v5 }
 0x666   : > { %2062 = vst [vmem:[#allocation1 + $0x6] ss:$9 sm:$0xff] %v5185_v40  ;;  %v1495_v40 = vrot.slane %v5187_v6, 6 }
 0x667   : > { %2063 = vst [vmem:[#allocation1 + $0x7] ss:$9 sm:$0xff] %v1484_v61 }
 0x66e   : > { %v2064_v45 = vld [vmem:[#allocation1] sm:$0xff] }
 0x66f   : > { %2065 = vst [vmem:[#allocation1] ss:$9 sm:$0xff] %v1485_v11  ;;  %4051 = vmatmul.msk.f32.gmra.mxu2 %vm1068_vm7, %v2064_v45 }
 0x670   : > { %2066 = vst [vmem:[#allocation1 + $0x1] ss:$9 sm:$0xff] %v1486_v58 }
 0x671   : > { %2067 = vst [vmem:[#allocation1 + $0x2] ss:$9 sm:$0xff] %v1487_v46 }
 0x672   : > { %2068 = vst [vmem:[#allocation1 + $0x3] ss:$9 sm:$0xff] %v1488_v57 }
 0x673   : > { %2069 = vst [vmem:[#allocation1 + $0x4] ss:$9 sm:$0xff] %v1489_v39 }
 0x674   : > { %2070 = vst [vmem:[#allocation1 + $0x5] ss:$9 sm:$0xff] %v5187_v6 }
 0x675   : > { %2071 = vst [vmem:[#allocation1 + $0x6] ss:$9 sm:$0xff] %v1490_v19 }
 0x676   : > { %2072 = vst [vmem:[#allocation1 + $0x7] ss:$9 sm:$0xff] %v1491_v9 }
 0x67d   : > { %v2073_v35 = vld [vmem:[#allocation1] sm:$0xff] }
 0x67e   : > { %2074 = vst [vmem:[#allocation1] ss:$9 sm:$0xff] %v1492_v17  ;;  %4052 = vmatmul.msk.f32.gmra.mxu2 %vm1068_vm7, %v2073_v35 }
 0x67f   : > { %2075 = vst [vmem:[#allocation1 + $0x1] ss:$9 sm:$0xff] %v1493_v63 }
 0x680   : > { %2076 = vst [vmem:[#allocation1 + $0x2] ss:$9 sm:$0xff] %v1494_v30 }
 0x681   : > { %2077 = vst [vmem:[#allocation1 + $0x3] ss:$9 sm:$0xff] %v1495_v40 }
 0x688   : > { %v2078_v37 = vld [vmem:[#allocation1] sm:$0xff] }
 0x689   : > { %4053 = vmatmul.msk.f32.gmra.mxu2 %vm1068_vm7, %v2078_v37 }
 0x694   : > { %v2028_v42 = vpop.f32.mrf.mxu1 }
 0x6e3   : > { %v2104_v41 = vpop.f32.mrf.mxu2 }
 0x6e4   : > { %v2105_v23 = vadd.f32 %v2104_v41, %v2028_v42 }
 0x6e6   : > { %v2120_v1 = vrot.slane %v2105_v23, 1  ;;  %v2121_v12 = vrot.slane %v2105_v23, 2  ;;  %v2122_v24 = vrot.slane %v2105_v23, 3  ;;  %v2123_v26 = vrot.slane %v2105_v23, 4 }
 0x6e7   : > { %v2124_v53 = vrot.slane %v2105_v23, 5  ;;  %v2125_v54 = vrot.slane %v2105_v23, 6  ;;  %v5249_v16 = vadd.f32 %v2105_v23, %v4482_v0  ;;  %v2126_v22 = vrot.slane %v2105_v23, 7 }
 0x6e8   : > { %v5252_v6 = vadd.f32 %v2120_v1, %v4491_v7  ;;  %v5255_v28 = vadd.f32 %v2121_v12, %v4487_v4  ;;  %v5258_v21 = vadd.f32 %v2122_v24, %v4494_v10  ;;  %v5261_v2 = vadd.f32 %v2123_v26, %v4499_v13  ;;  %v2031_v7 = vpop.f32.mrf.mxu1 }
 0x6e9   : > { %2226 = vst [vmem:[#allocation1] ss:$9 sm:$0xff] %v5249_v16  ;;  %v5265_v8 = vadd.f32 %v2124_v53, %v4503_v14  ;;  %v5269_v0 = vadd.f32 %v2125_v54, %v4507_v15  ;;  %v5273_v4 = vadd.f32 %v2126_v22, %v4514_v18 }
 0x6ea   : > { %2228 = vst [vmem:[#allocation1 + $0x1] ss:$9 sm:$0xff] %v5252_v6 }
 0x6eb   : > { %2230 = vst [vmem:[#allocation1 + $0x2] ss:$9 sm:$0xff] %v5255_v28 }
 0x6ec   : > { %2232 = vst [vmem:[#allocation1 + $0x3] ss:$9 sm:$0xff] %v5258_v21 }
 0x6ed   : > { %2234 = vst [vmem:[#allocation1 + $0x4] ss:$9 sm:$0xff] %v5261_v2 }
 0x6ee   : > { %2236 = vst [vmem:[#allocation1 + $0x5] ss:$9 sm:$0xff] %v5265_v8 }
 0x6ef   : > { %2238 = vst [vmem:[#allocation1 + $0x6] ss:$9 sm:$0xff] %v5269_v0 }
 0x6f0   : > { %2240 = vst [vmem:[#allocation1 + $0x7] ss:$9 sm:$0xff] %v5273_v4 }
 0x6f2   : > { %v2107_v10 = vpop.f32.mrf.mxu2 }
 0x6f3   : > { %v2108_v13 = vadd.f32 %v2107_v10, %v2031_v7 }
 0x6f5   : > { %v2127_v14 = vrot.slane %v2108_v13, 1  ;;  %v2128_v15 = vrot.slane %v2108_v13, 2  ;;  %v2129_v38 = vrot.slane %v2108_v13, 3  ;;  %v2130_v3 = vrot.slane %v2108_v13, 4 }
 0x6f6   : > { %v2131_v62 = vrot.slane %v2108_v13, 5  ;;  %v2132_v18 = vrot.slane %v2108_v13, 6  ;;  %v5281_v5 = vadd.f32 %v2108_v13, %v4522_v25  ;;  %v2133_v11 = vrot.slane %v2108_v13, 7 }
 0x6f7   : > { %v2241_v61 = vld [vmem:[#allocation1] sm:$0xff]  ;;  %v5284_v58 = vadd.f32 %v2127_v14, %v4525_v27  ;;  %v5287_v45 = vadd.f32 %v2128_v15, %v4528_v29  ;;  %v5290_v46 = vadd.f32 %v2129_v38, %v4533_v31  ;;  %v5293_v57 = vadd.f32 %v2130_v3, %v4537_v32  ;;  %v2034_v31 = vpop.f32.mrf.mxu1 }
 0x6f8   : > { %2242 = vst [vmem:[#allocation1] ss:$9 sm:$0xff] %v5281_v5  ;;  %v2269_v39 = vsel %vm482_vm2, %v2241_v61, 0.0  ;;  %v5298_v25 = vadd.f32 %v2131_v62, %v4544_v34  ;;  %v5302_v27 = vadd.f32 %v2132_v18, %v4540_v33  ;;  %v5306_v29 = vadd.f32 %v2133_v11, %v4550_v36 }
 0x6f9   : > { %2243 = vst [vmem:[#allocation1 + $0x1] ss:$9 sm:$0xff] %v5284_v58  ;;  %2270 = vadd.xlane.f32.xlu2 %v2269_v39 }
 0x6fa   : > { %2244 = vst [vmem:[#allocation1 + $0x2] ss:$9 sm:$0xff] %v5287_v45 }
 0x6fb   : > { %2245 = vst [vmem:[#allocation1 + $0x3] ss:$9 sm:$0xff] %v5290_v46 }
 0x6fc   : > { %2246 = vst [vmem:[#allocation1 + $0x4] ss:$9 sm:$0xff] %v5293_v57 }
 0x6fd   : > { %2247 = vst [vmem:[#allocation1 + $0x5] ss:$9 sm:$0xff] %v5298_v25 }
 0x6fe   : > { %2248 = vst [vmem:[#allocation1 + $0x6] ss:$9 sm:$0xff] %v5302_v27 }
 0x6ff   : > { %2249 = vst [vmem:[#allocation1 + $0x7] ss:$9 sm:$0xff] %v5306_v29 }
 0x701   : > { %v2110_v32 = vpop.f32.mrf.mxu2 }
 0x702   : > { %v2111_v34 = vadd.f32 %v2110_v32, %v2034_v31 }
 0x704   : > { %v2134_v33 = vrot.slane %v2111_v34, 1  ;;  %v2135_v19 = vrot.slane %v2111_v34, 2  ;;  %v2136_v9 = vrot.slane %v2111_v34, 3  ;;  %v2137_v17 = vrot.slane %v2111_v34, 4 }
 0x705   : > { %v2138_v63 = vrot.slane %v2111_v34, 5  ;;  %v2139_v36 = vrot.slane %v2111_v34, 6  ;;  %v5314_v35 = vadd.f32 %v2111_v34, %v4559_v43  ;;  %v2140_v40 = vrot.slane %v2111_v34, 7 }
 0x706   : > { %v2250_v30 = vld [vmem:[#allocation1] sm:$0xff]  ;;  %v5317_v37 = vadd.f32 %v2134_v33, %v4562_v44  ;;  %v5320_v42 = vadd.f32 %v2135_v19, %v4566_v47  ;;  %v5323_v41 = vadd.f32 %v2136_v9, %v4573_v49  ;;  %v5326_v23 = vadd.f32 %v2137_v17, %v4577_v50  ;;  %v2037_v49 = vpop.f32.mrf.mxu1 }
 0x707   : > { %2251 = vst [vmem:[#allocation1] ss:$9 sm:$0xff] %v5314_v35  ;;  %v2272_v1 = vsel %vm482_vm2, %v2250_v30, 0.0  ;;  %v5331_v43 = vadd.f32 %v2138_v63, %v4570_v48  ;;  %v5335_v44 = vadd.f32 %v2139_v36, %v4582_v51  ;;  %v5339_v47 = vadd.f32 %v2140_v40, %v4586_v52 }
 0x708   : > { %2252 = vst [vmem:[#allocation1 + $0x1] ss:$9 sm:$0xff] %v5317_v37  ;;  %2273 = vadd.xlane.f32.xlu1 %v2272_v1 }
 0x709   : > { %2253 = vst [vmem:[#allocation1 + $0x2] ss:$9 sm:$0xff] %v5320_v42 }
 0x70a   : > { %2254 = vst [vmem:[#allocation1 + $0x3] ss:$9 sm:$0xff] %v5323_v41 }
 0x70b   : > { %2255 = vst [vmem:[#allocation1 + $0x4] ss:$9 sm:$0xff] %v5326_v23 }
 0x70c   : > { %2256 = vst [vmem:[#allocation1 + $0x5] ss:$9 sm:$0xff] %v5331_v43  ;;  %v2113_v48 = vpop.f32.mrf.mxu2 }
 0x70d   : > { %2257 = vst [vmem:[#allocation1 + $0x6] ss:$9 sm:$0xff] %v5335_v44  ;;  %v2114_v50 = vadd.f32 %v2113_v48, %v2037_v49 }
 0x70e   : > { %2258 = vst [vmem:[#allocation1 + $0x7] ss:$9 sm:$0xff] %v5339_v47 }
 0x70f   : > { %v2141_v51 = vrot.slane %v2114_v50, 1  ;;  %v2142_v12 = vrot.slane %v2114_v50, 2  ;;  %v2143_v24 = vrot.slane %v2114_v50, 3  ;;  %v5350_v52 = vadd.f32 %v2114_v50, %v4592_v55 }
 0x711   : > { %v5347_v26 = vadd.f32 %v2141_v51, %v4595_v56  ;;  %v5353_v53 = vadd.f32 %v2142_v12, %v4598_v59  ;;  %v5356_v22 = vadd.f32 %v2143_v24, %v4602_v60  ;;  %v4329_v59 = vmov 32.0  }
 0x712   : > { %4188 = vrcp.f32 %v4329_v59 }
 0x715   : > { %v2259_v54 = vld [vmem:[#allocation1] sm:$0xff] }
 0x716   : > { %2260 = vst [vmem:[#allocation1] ss:$9 sm:$0xff] %v5350_v52  ;;  %v2275_v7 = vsel %vm482_vm2, %v2259_v54, 0.0 }
 0x717   : > { %2261 = vst [vmem:[#allocation1 + $0x1] ss:$9 sm:$0xff] %v5347_v26  ;;  %2276 = vadd.xlane.f32.xlu0 %v2275_v7 }
 0x718   : > { %2262 = vst [vmem:[#allocation1 + $0x2] ss:$9 sm:$0xff] %v5353_v53  ;;  %v4189_v10 = vpop.eup %4188 }
 0x719   : > { %2263 = vst [vmem:[#allocation1 + $0x3] ss:$9 sm:$0xff] %v5356_v22  ;;  %v2282_v60 = vmul.f32 32.0, %v4189_v10  ;;  %vm2286_vm11 = vweird.f32 %v4189_v10 }
 0x71b   : > { %v2283_v13 = vsub.f32 1.0, %v2282_v60 }
 0x71d   : > { %v2284_v14 = vmul.f32 %v4189_v10, %v2283_v13 }
 0x71f   : > { %v2285_v15 = vadd.f32 %v4189_v10, %v2284_v14 }
 0x720   : > { %v2264_v55 = vld [vmem:[#allocation1] sm:$0xff] }
 0x721   : > { %v2278_v56 = vsel %vm563_vm3, %v2264_v55, 0.0  ;;  %v5364_v38 = vsel %vm2286_vm11, %v4189_v10, %v2285_v15 }
 0x722   : > { %2279 = vadd.xlane.f32.xlu2 %v2278_v56 }
 0x76c   : > { %v2271_v3 = vpop.xlane.xlu2 %2270 }
 0x76d   : > { %v2288_v62 = vmul.f32 %v5364_v38, %v2271_v3 }
 0x76f   : > { %v2296_v18 = vperm.slane %v2288_v62, 0  ;;  %v2297_v61 = vperm.slane %v2288_v62, 1  ;;  %v2298_v11 = vperm.slane %v2288_v62, 2  ;;  %v2299_v39 = vperm.slane %v2288_v62, 3 }
 0x770   : > { %v2300_v31 = vperm.slane %v2288_v62, 4  ;;  %v2301_v32 = vperm.slane %v2288_v62, 5  ;;  %v2302_v34 = vperm.slane %v2288_v62, 6  ;;  %v2303_v33 = vperm.slane %v2288_v62, 7 }
 0x771   : > { %v5368_v19 = vsub.f32 %v5249_v16, %v2296_v18  ;;  %v5371_v9 = vsub.f32 %v5252_v6, %v2297_v61  ;;  %v5374_v17 = vsub.f32 %v5255_v28, %v2298_v11  ;;  %v5377_v63 = vsub.f32 %v5258_v21, %v2299_v39 }
 0x772   : > { %v5380_v36 = vsub.f32 %v5261_v2, %v2300_v31  ;;  %v5383_v30 = vsub.f32 %v5265_v8, %v2301_v32  ;;  %v5386_v40 = vsub.f32 %v5269_v0, %v2302_v34  ;;  %v5395_v21 = vsub.f32 %v5273_v4, %v2303_v33 }
 0x773   : > { %v2380_v16 = vmul.f32 %v5368_v19, %v5368_v19  ;;  %v2381_v6 = vmul.f32 %v5371_v9, %v5371_v9  ;;  %v2382_v28 = vmul.f32 %v5374_v17, %v5374_v17  ;;  %v2383_v2 = vmul.f32 %v5377_v63, %v5377_v63 }
 0x774   : > { %v2384_v8 = vmul.f32 %v5380_v36, %v5380_v36  ;;  %v2385_v0 = vmul.f32 %v5383_v30, %v5383_v30  ;;  %v2386_v1 = vmul.f32 %v5386_v40, %v5386_v40  ;;  %v2387_v49 = vmul.f32 %v5395_v21, %v5395_v21 }
 0x775   : > { %2436 = vst [vmem:[#allocation1] ss:$9 sm:$0xff] %v2380_v16 }
 0x776   : > { %2438 = vst [vmem:[#allocation1 + $0x1] ss:$9 sm:$0xff] %v2381_v6 }
 0x777   : > { %2440 = vst [vmem:[#allocation1 + $0x2] ss:$9 sm:$0xff] %v2382_v28 }
 0x778   : > { %2442 = vst [vmem:[#allocation1 + $0x3] ss:$9 sm:$0xff] %v2383_v2 }
 0x779   : > { %2444 = vst [vmem:[#allocation1 + $0x4] ss:$9 sm:$0xff] %v2384_v8 }
 0x77a   : > { %2446 = vst [vmem:[#allocation1 + $0x5] ss:$9 sm:$0xff] %v2385_v0 }
 0x77b   : > { %2448 = vst [vmem:[#allocation1 + $0x6] ss:$9 sm:$0xff] %v2386_v1  ;;  %v2274_v4 = vpop.xlane.xlu1 %2273 }
 0x77c   : > { %2450 = vst [vmem:[#allocation1 + $0x7] ss:$9 sm:$0xff] %v2387_v49  ;;  %v2289_v48 = vmul.f32 %v5364_v38, %v2274_v4 }
 0x77e   : > { %v2304_v50 = vperm.slane %v2289_v48, 0  ;;  %v2305_v51 = vperm.slane %v2289_v48, 1  ;;  %v2306_v12 = vperm.slane %v2289_v48, 2  ;;  %v2307_v24 = vperm.slane %v2289_v48, 3 }
 0x77f   : > { %v2308_v54 = vperm.slane %v2289_v48, 4  ;;  %v2309_v7 = vperm.slane %v2289_v48, 5  ;;  %v2310_v55 = vperm.slane %v2289_v48, 6  ;;  %v2311_v56 = vperm.slane %v2289_v48, 7 }
 0x780   : > { %v5409_v59 = vsub.f32 %v5281_v5, %v2304_v50  ;;  %v5412_v10 = vsub.f32 %v5284_v58, %v2305_v51  ;;  %v5415_v60 = vsub.f32 %v5287_v45, %v2306_v12  ;;  %v5418_v13 = vsub.f32 %v5290_v46, %v2307_v24 }
 0x781   : > { %v5421_v14 = vsub.f32 %v5293_v57, %v2308_v54  ;;  %v5424_v15 = vsub.f32 %v5298_v25, %v2309_v7  ;;  %v5427_v3 = vsub.f32 %v5302_v27, %v2310_v55  ;;  %v5436_v62 = vsub.f32 %v5306_v29, %v2311_v56 }
 0x782   : > { %v2388_v5 = vmul.f32 %v5409_v59, %v5409_v59  ;;  %v2389_v58 = vmul.f32 %v5412_v10, %v5412_v10  ;;  %v2390_v45 = vmul.f32 %v5415_v60, %v5415_v60  ;;  %v2391_v57 = vmul.f32 %v5418_v13, %v5418_v13 }
 0x783   : > { %v2451_v46 = vld [vmem:[#allocation1] sm:$0xff]  ;;  %v2392_v25 = vmul.f32 %v5421_v14, %v5421_v14  ;;  %v2393_v18 = vmul.f32 %v5424_v15, %v5424_v15  ;;  %v2394_v61 = vmul.f32 %v5427_v3, %v5427_v3  ;;  %v2395_v29 = vmul.f32 %v5436_v62, %v5436_v62 }
 0x784   : > { %2452 = vst [vmem:[#allocation1] ss:$9 sm:$0xff] %v2388_v5  ;;  %v2479_v27 = vsel %vm482_vm2, %v2451_v46, 0.0 }
 0x785   : > { %2453 = vst [vmem:[#allocation1 + $0x1] ss:$9 sm:$0xff] %v2389_v58  ;;  %2480 = vadd.xlane.f32.xlu0 %v2479_v27 }
 0x786   : > { %2454 = vst [vmem:[#allocation1 + $0x2] ss:$9 sm:$0xff] %v2390_v45 }
 0x787   : > { %2455 = vst [vmem:[#allocation1 + $0x3] ss:$9 sm:$0xff] %v2391_v57 }
 0x788   : > { %2456 = vst [vmem:[#allocation1 + $0x4] ss:$9 sm:$0xff] %v2392_v25 }
 0x789   : > { %2457 = vst [vmem:[#allocation1 + $0x5] ss:$9 sm:$0xff] %v2393_v18 }
 0x78a   : > { %2458 = vst [vmem:[#allocation1 + $0x6] ss:$9 sm:$0xff] %v2394_v61  ;;  %v2277_v11 = vpop.xlane.xlu0 %2276 }
 0x78b   : > { %2459 = vst [vmem:[#allocation1 + $0x7] ss:$9 sm:$0xff] %v2395_v29  ;;  %v2290_v39 = vmul.f32 %v5364_v38, %v2277_v11 }
 0x78d   : > { %v2312_v31 = vperm.slane %v2290_v39, 0  ;;  %v2313_v32 = vperm.slane %v2290_v39, 1  ;;  %v2314_v34 = vperm.slane %v2290_v39, 2  ;;  %v2315_v33 = vperm.slane %v2290_v39, 3 }
 0x78e   : > { %v2316_v16 = vperm.slane %v2290_v39, 4  ;;  %v2317_v6 = vperm.slane %v2290_v39, 5  ;;  %v2318_v28 = vperm.slane %v2290_v39, 6  ;;  %v2319_v2 = vperm.slane %v2290_v39, 7 }
 0x78f   : > { %v5451_v8 = vsub.f32 %v5314_v35, %v2312_v31  ;;  %v5454_v0 = vsub.f32 %v5317_v37, %v2313_v32  ;;  %v5457_v1 = vsub.f32 %v5320_v42, %v2314_v34  ;;  %v5460_v49 = vsub.f32 %v5323_v41, %v2315_v33 }
 0x790   : > { %v5463_v4 = vsub.f32 %v5326_v23, %v2316_v16  ;;  %v5466_v48 = vsub.f32 %v5331_v43, %v2317_v6  ;;  %v5469_v50 = vsub.f32 %v5335_v44, %v2318_v28  ;;  %v5478_v51 = vsub.f32 %v5339_v47, %v2319_v2  ;;  %v5515_v16 = vld [vmem:[#allocation2 + $0x168] ss:$0 sm:$0xff]  ;;  %v5517_v28 = vld [vmem:[#allocation2 + $0x170] ss:$0 sm:$0xff] }
 0x791   : > { %v2396_v35 = vmul.f32 %v5451_v8, %v5451_v8  ;;  %v2397_v37 = vmul.f32 %v5454_v0, %v5454_v0  ;;  %v2398_v42 = vmul.f32 %v5457_v1, %v5457_v1  ;;  %v2399_v23 = vmul.f32 %v5460_v49, %v5460_v49 }
 0x792   : > { %v2460_v41 = vld [vmem:[#allocation1] sm:$0xff]  ;;  %v2400_v43 = vmul.f32 %v5463_v4, %v5463_v4  ;;  %v2401_v12 = vmul.f32 %v5466_v48, %v5466_v48  ;;  %v2402_v24 = vmul.f32 %v5469_v50, %v5469_v50  ;;  %v2403_v54 = vmul.f32 %v5478_v51, %v5478_v51 }
 0x793   : > { %2461 = vst [vmem:[#allocation1] ss:$9 sm:$0xff] %v2396_v35  ;;  %v2482_v44 = vsel %vm482_vm2, %v2460_v41, 0.0  ;;  %v5523_v41 = vrot.slane %v5515_v16, 4 }
 0x794   : > { %2462 = vst [vmem:[#allocation1 + $0x1] ss:$9 sm:$0xff] %v2397_v37  ;;  %2483 = vadd.xlane.f32.xlu1 %v2482_v44  ;;  %v5532_v44 = vrot.slane %v5515_v16, 7 }
 0x795   : > { %2463 = vst [vmem:[#allocation1 + $0x2] ss:$9 sm:$0xff] %v2398_v42  ;;  %v2280_v47 = vpop.xlane.xlu2 %2279 }
 0x796   : > { %2464 = vst [vmem:[#allocation1 + $0x3] ss:$9 sm:$0xff] %v2399_v23  ;;  %v2291_v7 = vmul.f32 %v5364_v38, %v2280_v47  ;;  %v5526_v23 = vrot.slane %v5515_v16, 5  ;;  %v5539_v47 = vrot.slane %v5517_v28, 5 }
 0x797   : > { %2465 = vst [vmem:[#allocation1 + $0x4] ss:$9 sm:$0xff] %v2400_v43  ;;  %v5529_v43 = vrot.slane %v5515_v16, 6 }
 0x798   : > { %2466 = vst [vmem:[#allocation1 + $0x5] ss:$9 sm:$0xff] %v2401_v12  ;;  %v2320_v55 = vperm.slane %v2291_v7, 0  ;;  %v2321_v56 = vperm.slane %v2291_v7, 1  ;;  %v2322_v5 = vperm.slane %v2291_v7, 2  ;;  %v2323_v58 = vperm.slane %v2291_v7, 3 }
 0x799   : > { %2467 = vst [vmem:[#allocation1 + $0x6] ss:$9 sm:$0xff] %v2402_v24  ;;  %v5535_v12 = vrot.slane %v5517_v28, 4  ;;  %v5545_v7 = vrot.slane %v5517_v28, 7 }
 0x79a   : > { %2468 = vst [vmem:[#allocation1 + $0x7] ss:$9 sm:$0xff] %v2403_v54  ;;  %v5493_v45 = vsub.f32 %v5350_v52, %v2320_v55  ;;  %v5496_v46 = vsub.f32 %v5347_v26, %v2321_v56  ;;  %v5499_v57 = vsub.f32 %v5353_v53, %v2322_v5  ;;  %v5502_v25 = vsub.f32 %v5356_v22, %v2323_v58 }
 0x79b   : > { %v5542_v54 = vrot.slane %v5517_v28, 6  ;;  %v5548_v55 = vrot.slane %v5515_v16, 1  ;;  %v5551_v5 = vrot.slane %v5515_v16, 2  ;;  %v5554_v58 = vrot.slane %v5515_v16, 3 }
 0x79c   : > { %v2404_v27 = vmul.f32 %v5493_v45, %v5493_v45  ;;  %v2405_v18 = vmul.f32 %v5496_v46, %v5496_v46  ;;  %v2406_v61 = vmul.f32 %v5499_v57, %v5499_v57  ;;  %v2407_v26 = vmul.f32 %v5502_v25, %v5502_v25 }
 0x7a1   : > { %v2469_v52 = vld [vmem:[#allocation1] sm:$0xff] }
 0x7a2   : > { %2470 = vst [vmem:[#allocation1] ss:$9 sm:$0xff] %v2404_v27  ;;  %v2485_v53 = vsel %vm482_vm2, %v2469_v52, 0.0  ;;  %v5557_v27 = vrot.slane %v5517_v28, 1 }
 0x7a3   : > { %2471 = vst [vmem:[#allocation1 + $0x1] ss:$9 sm:$0xff] %v2405_v18  ;;  %2486 = vadd.xlane.f32.xlu2 %v2485_v53  ;;  %v2718_v18 = vld [vmem:[#allocation2 + $0x190] sm:$0xff] }
 0x7a4   : > { %2472 = vst [vmem:[#allocation1 + $0x2] ss:$9 sm:$0xff] %v2406_v61  ;;  %2808 = vmatpush.msra.mxu3 %v2718_v18 }
 0x7a5   : > { %2473 = vst [vmem:[#allocation1 + $0x3] ss:$9 sm:$0xff] %v2407_v26 }
 0x7ac   : > { %v2474_v22 = vld [vmem:[#allocation1] sm:$0xff] }
 0x7ad   : > { %v2488_v29 = vsel %vm563_vm3, %v2474_v22, 0.0 }
 0x7ae   : > { %2489 = vadd.xlane.f32.xlu0 %v2488_v29 }
 0x7f8   : > { %v2481_v11 = vpop.xlane.xlu0 %2480 }
 0x7f9   : > { %v2491_v39 = vmul.f32 %v2481_v11, %v5364_v38 }
 0x7fb   : > { %v2495_v31 = vadd.f32 1e-05, %v2491_v39 }
 0x7fd   : > { %4190 = vrsqrt.f32 %v2495_v31  ;;  %vm2505_vm13 = vweird.f32 %v2495_v31 }
 0x803   : > { %v4191_v32 = vpop.eup %4190 }
 0x804   : > { %v2500_v34 = vmul.f32 %v4191_v32, %v2495_v31  ;;  %vm2506_vm12 = vweird.f32 %v4191_v32  ;;  %v2717_v31 = vld [vmem:[#allocation2 + $0x188] sm:$0xff] }
 0x805   : > { %vm2507_vm14 = vmor %vm2505_vm13, %vm2506_vm12  ;;  %2809 = vmatpush.msra.mxu3 %v2717_v31 }
 0x806   : > { %v2501_v33 = vmul.f32 %v4191_v32, %v2500_v34 }
 0x807   : > { %v2484_v6 = vpop.xlane.xlu1 %2483 }
 0x808   : > { %v2502_v2 = vmul.f32 0.5, %v2501_v33  ;;  %v2492_v35 = vmul.f32 %v2484_v6, %v5364_v38 }
 0x80a   : > { %v2503_v37 = vsub.f32 1.5, %v2502_v2  ;;  %v5520_v42 = vadd.f32 1e-05, %v2492_v35 }
 0x80c   : > { %v2504_v24 = vmul.f32 %v4191_v32, %v2503_v37  ;;  %4192 = vrsqrt.f32 %v5520_v42  ;;  %vm2515_vm1 = vweird.f32 %v5520_v42 }
 0x80e   : > { %v2508_v56 = vsel %vm2507_vm14, %v4191_v32, %v2504_v24 }
 0x80f   : > { %v2543_v61 = vperm.slane %v2508_v56, 0  ;;  %v2544_v52 = vperm.slane %v2508_v56, 1  ;;  %v2545_v26 = vperm.slane %v2508_v56, 2  ;;  %v2546_v53 = vperm.slane %v2508_v56, 3 }
 0x810   : > { %v2547_v22 = vperm.slane %v2508_v56, 4  ;;  %v2548_v29 = vperm.slane %v2508_v56, 5  ;;  %v2549_v11 = vperm.slane %v2508_v56, 6  ;;  %v2550_v39 = vperm.slane %v2508_v56, 7  ;;  %v2716_v56 = vld [vmem:[#allocation2 + $0x180] sm:$0xff] }
 0x811   : > { %v2599_v32 = vmul.f32 %v2543_v61, %v5368_v19  ;;  %v2600_v34 = vmul.f32 %v2544_v52, %v5371_v9  ;;  %v2601_v33 = vmul.f32 %v2545_v26, %v5374_v17  ;;  %v2602_v6 = vmul.f32 %v2546_v53, %v5377_v63  ;;  %2810 = vmatpush.msra.mxu3 %v2716_v56 }
 0x812   : > { %v4193_v2 = vpop.eup %4192  ;;  %v2603_v35 = vmul.f32 %v2547_v22, %v5380_v36  ;;  %v2604_v37 = vmul.f32 %v2548_v29, %v5383_v30  ;;  %v2605_v24 = vmul.f32 %v2549_v11, %v5386_v40  ;;  %v2606_v18 = vmul.f32 %v2550_v39, %v5395_v21  ;;  %v2715_v21 = vld [vmem:[#allocation2 + $0x178] sm:$0xff] }
 0x813   : > { %v2643_v20 = vmul.f32 %v5515_v16, %v2599_v32  ;;  %v2510_v19 = vmul.f32 %v4193_v2, %v5520_v42  ;;  %v2644_v9 = vmul.f32 %v5548_v55, %v2600_v34  ;;  %v5571_v17 = vrot.slane %v5517_v28, 2  ;;  %2811 = vmatpush.msra.mxu3 %v2715_v21 }
 0x814   : > { %v2647_v63 = vmul.f32 %v5523_v41, %v2603_v35  ;;  %v2648_v36 = vmul.f32 %v5526_v23, %v2604_v37  ;;  %v2649_v30 = vmul.f32 %v5529_v43, %v2605_v24  ;;  %v2650_v40 = vmul.f32 %v5532_v44, %v2606_v18 }
 0x815   : > { %v5578_v61 = vadd.f32 %v5517_v28, %v2643_v20  ;;  %v2511_v52 = vmul.f32 %v4193_v2, %v2510_v19  ;;  %v2645_v26 = vmul.f32 %v5551_v5, %v2601_v33  ;;  %v5582_v53 = vrot.slane %v5517_v28, 3 }
 0x816   : > { %v5585_v22 = vadd.f32 %v5535_v12, %v2647_v63  ;;  %v5588_v29 = vadd.f32 %v5539_v47, %v2648_v36  ;;  %v5591_v11 = vadd.f32 %v5542_v54, %v2649_v30  ;;  %v2487_v39 = vpop.xlane.xlu2 %2486  ;;  %v2646_v20 = vmul.f32 %v5554_v58, %v2602_v6 }
 0x817   : > { %v5595_v31 = vadd.f32 %v5545_v7, %v2650_v40  ;;  %2749 = vst [vmem:[#allocation1] ss:$9 sm:$0xff] %v5578_v61  ;;  %v2512_v32 = vmul.f32 0.5, %v2511_v52  ;;  %v2493_v34 = vmul.f32 %v2487_v39, %v5364_v38  ;;  %v5601_v33 = vadd.f32 %v5557_v27, %v2644_v9 }
 0x818   : > { %2757 = vst [vmem:[#allocation1 + $0x4] ss:$9 sm:$0xff] %v5585_v22  ;;  %vm2516_vm15 = vweird.f32 %v4193_v2  ;;  %v5607_v6 = vadd.f32 %v5571_v17, %v2645_v26  ;;  %v5611_v24 = vadd.f32 %v5582_v53, %v2646_v20 }
 0x819   : > { %6146 = vst [vmem:[#allocation9_spill] sm:$0xff] %v5595_v31  ;;  %v2513_v35 = vsub.f32 1.5, %v2512_v32  ;;  %v5604_v37 = vadd.f32 1e-05, %v2493_v34  ;;  %vm2517_vm8 = vmor %vm2515_vm1, %vm2516_vm15 }
 0x81a   : > { %2759 = vst [vmem:[#allocation1 + $0x5] ss:$9 sm:$0xff] %v5588_v29 }
 0x81b   : > { %2761 = vst [vmem:[#allocation1 + $0x6] ss:$9 sm:$0xff] %v5591_v11  ;;  %v2514_v18 = vmul.f32 %v4193_v2, %v2513_v35  ;;  %4194 = vrsqrt.f32 %v5604_v37  ;;  %vm2525_vm10 = vweird.f32 %v5604_v37 }
 0x81c   : > { %2763 = vst [vmem:[#allocation1 + $0x7] ss:$9 sm:$0xff] %v5595_v31 }
 0x81d   : > { %2751 = vst [vmem:[#allocation1 + $0x1] ss:$9 sm:$0xff] %v5601_v33  ;;  %v2518_v56 = vsel %vm2517_vm8, %v4193_v2, %v2514_v18 }
 0x81e   : > { %2753 = vst [vmem:[#allocation1 + $0x2] ss:$9 sm:$0xff] %v5607_v6  ;;  %v2551_v19 = vperm.slane %v2518_v56, 0  ;;  %v2552_v9 = vperm.slane %v2518_v56, 1  ;;  %v2553_v63 = vperm.slane %v2518_v56, 2  ;;  %v2554_v36 = vperm.slane %v2518_v56, 3 }
 0x81f   : > { %2755 = vst [vmem:[#allocation1 + $0x3] ss:$9 sm:$0xff] %v5611_v24  ;;  %v2555_v30 = vperm.slane %v2518_v56, 4  ;;  %v2556_v40 = vperm.slane %v2518_v56, 5  ;;  %v2557_v21 = vperm.slane %v2518_v56, 6  ;;  %v2558_v52 = vperm.slane %v2518_v56, 7 }
 0x820   : > { %v2607_v42 = vmul.f32 %v2551_v19, %v5409_v59  ;;  %v2608_v26 = vmul.f32 %v2552_v9, %v5412_v10  ;;  %v2609_v39 = vmul.f32 %v2553_v63, %v5415_v60  ;;  %v2610_v2 = vmul.f32 %v2554_v36, %v5418_v13 }
 0x821   : > { %v4195_v20 = vpop.eup %4194  ;;  %v2611_v32 = vmul.f32 %v2555_v30, %v5421_v14  ;;  %v2612_v34 = vmul.f32 %v2556_v40, %v5424_v15  ;;  %v2613_v35 = vmul.f32 %v2557_v21, %v5427_v3  ;;  %v2614_v18 = vmul.f32 %v2558_v52, %v5436_v62  ;;  %v2490_v19 = vpop.xlane.xlu0 %2489 }
 0x822   : > { %v2651_v31 = vmul.f32 %v5515_v16, %v2607_v42  ;;  %v2520_v56 = vmul.f32 %v4195_v20, %v5604_v37  ;;  %v2652_v59 = vmul.f32 %v5548_v55, %v2608_v26  ;;  %v2653_v3 = vmul.f32 %v5551_v5, %v2609_v39 }
 0x823   : > { %v2655_v10 = vmul.f32 %v5523_v41, %v2611_v32  ;;  %v2656_v60 = vmul.f32 %v5526_v23, %v2612_v34  ;;  %v2657_v13 = vmul.f32 %v5529_v43, %v2613_v35  ;;  %v2654_v62 = vmul.f32 %v5554_v58, %v2610_v2 }
 0x824   : > { %v5634_v14 = vadd.f32 %v5517_v28, %v2651_v31  ;;  %v2521_v15 = vmul.f32 %v4195_v20, %v2520_v56  ;;  %v2658_v9 = vmul.f32 %v5532_v44, %v2614_v18  ;;  %v5643_v40 = vadd.f32 %v5557_v27, %v2652_v59 }
 0x825   : > { %v5640_v63 = vadd.f32 %v5535_v12, %v2655_v10  ;;  %v5646_v21 = vadd.f32 %v5571_v17, %v2653_v3  ;;  %v5649_v31 = vadd.f32 %v5582_v53, %v2654_v62  ;;  %v5654_v52 = vadd.f32 %v5539_v47, %v2656_v60 }
 0x826   : > { %v2764_v36 = vld [vmem:[#allocation1] sm:$0xff]  ;;  %v2522_v30 = vmul.f32 0.5, %v2521_v15  ;;  %v2494_v42 = vmul.f32 %v2490_v19, %v5364_v38  ;;  %v5659_v26 = vadd.f32 %v5542_v54, %v2657_v13  ;;  %vm2526_vm9 = vweird.f32 %v4195_v20 }
 0x827   : > { %4054 = vmatmul.msk.f32.vlgmr.msra.gmra.mxu3 %vm482_vm2, %v2764_v36  ;;  %2765 = vst [vmem:[#allocation1] ss:$9 sm:$0xff] %v5634_v14  ;;  %v5663_v2 = vadd.f32 %v5545_v7, %v2658_v9  ;;  %vm2527_vm11 = vmor %vm2525_vm10, %vm2526_vm9 }
 0x828   : > { %2769 = vst [vmem:[#allocation1 + $0x4] ss:$9 sm:$0xff] %v5640_v63  ;;  %v2523_v39 = vsub.f32 1.5, %v2522_v30  ;;  %v5665_v32 = vadd.f32 1e-05, %v2494_v42 }
 0x829   : > { %2766 = vst [vmem:[#allocation1 + $0x1] ss:$9 sm:$0xff] %v5643_v40 }
 0x82a   : > { %2767 = vst [vmem:[#allocation1 + $0x2] ss:$9 sm:$0xff] %v5646_v21  ;;  %v2524_v34 = vmul.f32 %v4195_v20, %v2523_v39  ;;  %4196 = vrsqrt.f32 %v5665_v32  ;;  %vm2535_vm13 = vweird.f32 %v5665_v32 }
 0x82b   : > { %2768 = vst [vmem:[#allocation1 + $0x3] ss:$9 sm:$0xff] %v5649_v31 }
 0x82c   : > { %2770 = vst [vmem:[#allocation1 + $0x5] ss:$9 sm:$0xff] %v5654_v52  ;;  %v2528_v35 = vsel %vm2527_vm11, %v4195_v20, %v2524_v34 }
 0x82d   : > { %2771 = vst [vmem:[#allocation1 + $0x6] ss:$9 sm:$0xff] %v5659_v26  ;;  %v2559_v18 = vperm.slane %v2528_v35, 0  ;;  %v2560_v56 = vperm.slane %v2528_v35, 1  ;;  %v2561_v59 = vperm.slane %v2528_v35, 2  ;;  %v2562_v10 = vperm.slane %v2528_v35, 3 }
 0x82e   : > { %2772 = vst [vmem:[#allocation1 + $0x7] ss:$9 sm:$0xff] %v5663_v2  ;;  %v2563_v60 = vperm.slane %v2528_v35, 4  ;;  %v2564_v13 = vperm.slane %v2528_v35, 5  ;;  %v2565_v15 = vperm.slane %v2528_v35, 6  ;;  %v2566_v37 = vperm.slane %v2528_v35, 7 }
 0x82f   : > { %v2615_v3 = vmul.f32 %v2559_v18, %v5451_v8  ;;  %v2616_v62 = vmul.f32 %v2560_v56, %v5454_v0  ;;  %v2617_v19 = vmul.f32 %v2561_v59, %v5457_v1  ;;  %v2618_v20 = vmul.f32 %v2562_v10, %v5460_v49  ;;  %v2876_v1 = vld [vmem:[#allocation2 + $0x218] sm:$0xff]  ;;  %v2875_v18 = vld [vmem:[#allocation2 + $0x210] sm:$0xff]  ;;  %v2874_v59 = vld [vmem:[#allocation2 + $0x208] sm:$0xff] }
 0x830   : > { %v2619_v9 = vmul.f32 %v2563_v60, %v5463_v4  ;;  %v2620_v36 = vmul.f32 %v2564_v13, %v5466_v48  ;;  %v2621_v30 = vmul.f32 %v2565_v15, %v5469_v50  ;;  %v2622_v42 = vmul.f32 %v2566_v37, %v5478_v51  ;;  %v4197_v39 = vpop.eup %4196  ;;  %2879 = vmatpush.msrb.mxu0 %v2876_v1  ;;  %v2873_v15 = vld [vmem:[#allocation2 + $0x200] sm:$0xff] }
 0x831   : > { %v2659_v34 = vmul.f32 %v5515_v16, %v2615_v3  ;;  %v2660_v35 = vmul.f32 %v5548_v55, %v2616_v62  ;;  %v2661_v8 = vmul.f32 %v5551_v5, %v2617_v19  ;;  %v2662_v0 = vmul.f32 %v5554_v58, %v2618_v20 }
 0x832   : > { %v2663_v49 = vmul.f32 %v5523_v41, %v2619_v9  ;;  %v2664_v4 = vmul.f32 %v5526_v23, %v2620_v36  ;;  %v2665_v48 = vmul.f32 %v5529_v43, %v2621_v30  ;;  %v2530_v51 = vmul.f32 %v4197_v39, %v5665_v32  ;;  %2880 = vmatpush.msrb.mxu0 %v2875_v18  ;;  %v4145_v18 = vld [vmem:[#allocation2 + $0x198] ss:$0 sm:$0xff] }
 0x833   : > { %v5690_v50 = vadd.f32 %v5517_v28, %v2659_v34  ;;  %v5694_v56 = vadd.f32 %v5557_v27, %v2660_v35  ;;  %v2666_v10 = vmul.f32 %v5532_v44, %v2622_v42  ;;  %v5701_v13 = vadd.f32 %v5571_v17, %v2661_v8 }
 0x834   : > { %v5698_v60 = vadd.f32 %v5535_v12, %v2663_v49  ;;  %v2531_v23 = vmul.f32 %v4197_v39, %v2530_v51  ;;  %v5704_v43 = vadd.f32 %v5582_v53, %v2662_v0  ;;  %v5709_v37 = vadd.f32 %v5539_v47, %v2664_v4  ;;  %2881 = vmatpush.msrb.mxu0 %v2874_v59  ;;  %v2864_v49 = vld [vmem:[#allocation2 + $0x1b8] sm:$0xff]  ;;  %v2863_v4 = vld [vmem:[#allocation2 + $0x1b0] sm:$0xff]  ;;  %v2862_v59 = vld [vmem:[#allocation2 + $0x1a8] sm:$0xff] }
 0x835   : > { %v2773_v41 = vld [vmem:[#allocation1] sm:$0xff]  ;;  %v5713_v44 = vadd.f32 %v5542_v54, %v2665_v48  ;;  %v5717_v3 = vadd.f32 %v5545_v7, %v2666_v10  ;;  %vm2536_vm12 = vweird.f32 %v4197_v39 }
 0x836   : > { %4055 = vmatmul.msk.f32.gmra.mxu3 %vm482_vm2, %v2773_v41  ;;  %2774 = vst [vmem:[#allocation1] ss:$9 sm:$0xff] %v5690_v50  ;;  %v2532_v12 = vmul.f32 0.5, %v2531_v23  ;;  %2882 = vmatpush.msrb.mxu0 %v2873_v15  ;;  %vm2537_vm14 = vmor %vm2535_vm13, %vm2536_vm12  ;;  %v2861_v41 = vld [vmem:[#allocation2 + $0x1a0] sm:$0xff] }
 0x837   : > { %2775 = vst [vmem:[#allocation1 + $0x1] ss:$9 sm:$0xff] %v5694_v56 }
 0x838   : > { %2776 = vst [vmem:[#allocation1 + $0x2] ss:$9 sm:$0xff] %v5701_v13  ;;  %v2533_v62 = vsub.f32 1.5, %v2532_v12 }
 0x839   : > { %2777 = vst [vmem:[#allocation1 + $0x3] ss:$9 sm:$0xff] %v5704_v43 }
 0x83a   : > { %2778 = vst [vmem:[#allocation1 + $0x4] ss:$9 sm:$0xff] %v5698_v60  ;;  %v2534_v47 = vmul.f32 %v4197_v39, %v2533_v62 }
 0x83b   : > { %2779 = vst [vmem:[#allocation1 + $0x5] ss:$9 sm:$0xff] %v5709_v37 }
 0x83c   : > { %2780 = vst [vmem:[#allocation1 + $0x6] ss:$9 sm:$0xff] %v5713_v44  ;;  %v2538_v54 = vsel %vm2537_vm14, %v4197_v39, %v2534_v47 }
 0x83d   : > { %2781 = vst [vmem:[#allocation1 + $0x7] ss:$9 sm:$0xff] %v5717_v3  ;;  %v2567_v7 = vperm.slane %v2538_v54, 0  ;;  %v2568_v19 = vperm.slane %v2538_v54, 1  ;;  %v2569_v20 = vperm.slane %v2538_v54, 2  ;;  %v2570_v9 = vperm.slane %v2538_v54, 3 }
 0x83f   : > { %v2623_v36 = vmul.f32 %v2567_v7, %v5493_v45  ;;  %v2624_v30 = vmul.f32 %v2568_v19, %v5496_v46  ;;  %v2625_v42 = vmul.f32 %v2569_v20, %v5499_v57  ;;  %v2626_v34 = vmul.f32 %v2570_v9, %v5502_v25 }
 0x841   : > { %v2667_v32 = vmul.f32 %v5515_v16, %v2623_v36  ;;  %v2668_v35 = vmul.f32 %v5548_v55, %v2624_v30  ;;  %v2669_v8 = vmul.f32 %v5551_v5, %v2625_v42  ;;  %v2670_v39 = vmul.f32 %v5554_v58, %v2626_v34  ;;  %v2872_v16 = vld [vmem:[#allocation2 + $0x1f8] sm:$0xff]  ;;  %v2870_v55 = vld [vmem:[#allocation2 + $0x1e8] sm:$0xff]  ;;  %v2869_v5 = vld [vmem:[#allocation2 + $0x1e0] sm:$0xff] }
 0x842   : > { %2883 = vmatpush.msrb.mxu0 %v2872_v16  ;;  %v2868_v58 = vld [vmem:[#allocation2 + $0x1d8] sm:$0xff] }
 0x843   : > { %v5734_v1 = vadd.f32 %v5517_v28, %v2667_v32  ;;  %v5737_v45 = vadd.f32 %v5557_v27, %v2668_v35  ;;  %v5740_v46 = vadd.f32 %v5571_v17, %v2669_v8  ;;  %v5744_v57 = vadd.f32 %v5582_v53, %v2670_v39  ;;  %v2871_v28 = vld [vmem:[#allocation2 + $0x1f0] sm:$0xff]  ;;  %v2866_v17 = vld [vmem:[#allocation2 + $0x1c8] sm:$0xff]  ;;  %v2865_v53 = vld [vmem:[#allocation2 + $0x1c0] sm:$0xff] }
 0x844   : > { %v2782_v0 = vld [vmem:[#allocation1] sm:$0xff]  ;;  %2884 = vmatpush.msrb.mxu0 %v2871_v28  ;;  %v2867_v27 = vld [vmem:[#allocation2 + $0x1d0] sm:$0xff] }
 0x845   : > { %4056 = vmatmul.msk.f32.gmra.mxu3 %vm482_vm2, %v2782_v0  ;;  %2783 = vst [vmem:[#allocation1] ss:$9 sm:$0xff] %v5734_v1 }
 0x846   : > { %2784 = vst [vmem:[#allocation1 + $0x1] ss:$9 sm:$0xff] %v5737_v45  ;;  %2885 = vmatpush.msrb.mxu0 %v2870_v55 }
 0x847   : > { %2785 = vst [vmem:[#allocation1 + $0x2] ss:$9 sm:$0xff] %v5740_v46 }
 0x848   : > { %2786 = vst [vmem:[#allocation1 + $0x3] ss:$9 sm:$0xff] %v5744_v57  ;;  %2886 = vmatpush.msrb.mxu0 %v2869_v5 }
 0x84a   : > { %2887 = vmatpush.msrb.mxu0 %v2868_v58 }
 0x84c   : > { %2888 = vmatpush.msrb.mxu0 %v2867_v27 }
 0x84e   : > { %2889 = vmatpush.msrb.mxu0 %v2866_v17 }
 0x84f   : > { %v2787_v25 = vld [vmem:[#allocation1] sm:$0xff] }
 0x850   : > { %4057 = vmatmul.msk.f32.gmra.mxu3 %vm482_vm2, %v2787_v25  ;;  %2890 = vmatpush.msrb.mxu0 %v2865_v53 }
 0x852   : > { %2891 = vmatpush.msrb.mxu0 %v2864_v49 }
 0x854   : > { %2892 = vmatpush.msrb.mxu0 %v2863_v4 }
 0x856   : > { %2893 = vmatpush.msrb.mxu0 %v2862_v59 }
 0x858   : > { %2894 = vmatpush.msrb.mxu0 %v2861_v41 }
 0x8aa   : > { %v2813_v48 = vpop.f32.mrf.mxu3 }
 0x8ab   : > { %v2814_v51 = vadd.f32 %v4145_v18, %v2813_v48 }
 0x8ad   : > { %v2829_v10 = vmul.f32 0.044715, %v2814_v51  ;;  %v2825_v20 = vmul.f32 0.5, %v2814_v51 }
 0x8af   : > { %v2833_v23 = vmul.f32 %v2829_v10, %v2814_v51 }
 0x8b1   : > { %v2837_v15 = vmul.f32 %v2833_v23, %v2814_v51 }
 0x8b3   : > { %v2841_v12 = vadd.f32 %v2837_v15, %v2814_v51 }
 0x8b5   : > { %v2845_v62 = vmul.f32 0.7978846, %v2841_v12 }
 0x8b7   : > { %4198 = vtanh.f32 %v2845_v62 }
 0x8b9   : > { %v2816_v47 = vpop.f32.mrf.mxu3 }
 0x8ba   : > { %v2817_v54 = vadd.f32 %v4145_v18, %v2816_v47 }
 0x8bc   : > { %v2830_v7 = vmul.f32 0.044715, %v2817_v54  ;;  %v2826_v25 = vmul.f32 0.5, %v2817_v54 }
 0x8bd   : > { %v4199_v19 = vpop.eup %4198 }
 0x8be   : > { %v2853_v9 = vadd.f32 1.0, %v4199_v19  ;;  %v2834_v36 = vmul.f32 %v2830_v7, %v2817_v54  ;;  %v5751_v7 = vld [vmem:[#allocation2 + $0x220] ss:$0 sm:$0xff] }
 0x8c0   : > { %v2857_v30 = vmul.f32 %v2853_v9, %v2825_v20  ;;  %v2838_v42 = vmul.f32 %v2834_v36, %v2817_v54 }
 0x8c2   : > { %2895 = vmatmul.f32.vlgmr.msrb.gmra.mxu0 %v2857_v30  ;;  %v2842_v34 = vadd.f32 %v2838_v42, %v2817_v54 }
 0x8c4   : > { %v2846_v32 = vmul.f32 0.7978846, %v2842_v34 }
 0x8c6   : > { %4200 = vtanh.f32 %v2846_v32 }
 0x8c8   : > { %v2819_v35 = vpop.f32.mrf.mxu3 }
 0x8c9   : > { %v2820_v8 = vadd.f32 %v4145_v18, %v2819_v35 }
 0x8cb   : > { %v2831_v39 = vmul.f32 0.044715, %v2820_v8  ;;  %v2827_v51 = vmul.f32 0.5, %v2820_v8 }
 0x8cc   : > { %v4201_v0 = vpop.eup %4200 }
 0x8cd   : > { %v2854_v16 = vadd.f32 1.0, %v4201_v0  ;;  %v2835_v28 = vmul.f32 %v2831_v39, %v2820_v8 }
 0x8cf   : > { %v2858_v55 = vmul.f32 %v2854_v16, %v2826_v25  ;;  %v2839_v5 = vmul.f32 %v2835_v28, %v2820_v8 }
 0x8d1   : > { %2898 = vmatmul.f32.gmra.mxu0 %v2858_v55  ;;  %v2843_v58 = vadd.f32 %v2839_v5, %v2820_v8 }
 0x8d3   : > { %v2847_v27 = vmul.f32 0.7978846, %v2843_v58  ;;  %v2822_v17 = vpop.f32.mrf.mxu3 }
 0x8d4   : > { %v2823_v53 = vadd.f32 %v4145_v18, %v2822_v17 }
 0x8d5   : > { %4202 = vtanh.f32 %v2847_v27 }
 0x8d6   : > { %v2832_v49 = vmul.f32 0.044715, %v2823_v53  ;;  %v2828_v62 = vmul.f32 0.5, %v2823_v53 }
 0x8d8   : > { %v2836_v4 = vmul.f32 %v2832_v49, %v2823_v53 }
 0x8da   : > { %v2840_v10 = vmul.f32 %v2836_v4, %v2823_v53 }
 0x8db   : > { %v4203_v48 = vpop.eup %4202 }
 0x8dc   : > { %v2855_v59 = vadd.f32 1.0, %v4203_v48  ;;  %v2844_v23 = vadd.f32 %v2840_v10, %v2823_v53 }
 0x8de   : > { %v2859_v41 = vmul.f32 %v2855_v59, %v2827_v51  ;;  %v2848_v15 = vmul.f32 0.7978846, %v2844_v23 }
 0x8e0   : > { %2901 = vmatmul.f32.gmra.mxu0 %v2859_v41  ;;  %4204 = vtanh.f32 %v2848_v15 }
 0x8e6   : > { %v4205_v12 = vpop.eup %4204 }
 0x8e7   : > { %v2856_v47 = vadd.f32 1.0, %v4205_v12 }
 0x8e9   : > { %v2860_v54 = vmul.f32 %v2856_v47, %v2828_v62 }
 0x8eb   : > { %2904 = vmatmul.f32.gmra.mxu0 %v2860_v54 }
 0x93f   : > { %v2896_v19 = vpop.f32.mrf.mxu0 }
 0x940   : > { %v2897_v18 = vadd.f32 %v5751_v7, %v2896_v19 }
 0x942   : > { %v2912_v20 = vrot.slane %v2897_v18, 1  ;;  %v2913_v9 = vrot.slane %v2897_v18, 2  ;;  %v2914_v36 = vrot.slane %v2897_v18, 3  ;;  %v2915_v30 = vrot.slane %v2897_v18, 4 }
 0x943   : > { %v2916_v42 = vrot.slane %v2897_v18, 5  ;;  %v2917_v34 = vrot.slane %v2897_v18, 6  ;;  %v5755_v32 = vadd.f32 %v2897_v18, %v5578_v61  ;;  %v2918_v35 = vrot.slane %v2897_v18, 7 }
 0x944   : > { %v5758_v8 = vadd.f32 %v2912_v20, %v5601_v33  ;;  %v5761_v39 = vadd.f32 %v2913_v9, %v5607_v6  ;;  %v5764_v0 = vadd.f32 %v2914_v36, %v5611_v24  ;;  %v5767_v25 = vadd.f32 %v2915_v30, %v5585_v22  ;;  %v6147_v33 = vld [vmem:[#allocation9_spill] sm:$0xff] }
 0x945   : > { %3018 = vst [vmem:[#allocation1] ss:$9 sm:$0xff] %v5755_v32  ;;  %v5771_v16 = vadd.f32 %v2916_v42, %v5588_v29  ;;  %v5775_v61 = vadd.f32 %v2917_v34, %v5591_v11  ;;  %v5779_v6 = vadd.f32 %v2918_v35, %v6147_v33 }
 0x946   : > { %3020 = vst [vmem:[#allocation1 + $0x1] ss:$9 sm:$0xff] %v5758_v8 }
 0x947   : > { %3022 = vst [vmem:[#allocation1 + $0x2] ss:$9 sm:$0xff] %v5761_v39 }
 0x948   : > { %3024 = vst [vmem:[#allocation1 + $0x3] ss:$9 sm:$0xff] %v5764_v0 }
 0x949   : > { %3026 = vst [vmem:[#allocation1 + $0x4] ss:$9 sm:$0xff] %v5767_v25 }
 0x94a   : > { %3028 = vst [vmem:[#allocation1 + $0x5] ss:$9 sm:$0xff] %v5771_v16 }
 0x94b   : > { %3030 = vst [vmem:[#allocation1 + $0x6] ss:$9 sm:$0xff] %v5775_v61 }
 0x94c   : > { %3032 = vst [vmem:[#allocation1 + $0x7] ss:$9 sm:$0xff] %v5779_v6 }
 0x94e   : > { %v2899_v22 = vpop.f32.mrf.mxu0 }
 0x94f   : > { %v2900_v29 = vadd.f32 %v5751_v7, %v2899_v22 }
 0x951   : > { %v2919_v11 = vrot.slane %v2900_v29, 1  ;;  %v2920_v24 = vrot.slane %v2900_v29, 2  ;;  %v2921_v28 = vrot.slane %v2900_v29, 3  ;;  %v2922_v55 = vrot.slane %v2900_v29, 4 }
 0x952   : > { %v2923_v5 = vrot.slane %v2900_v29, 5  ;;  %v2924_v58 = vrot.slane %v2900_v29, 6  ;;  %v5788_v27 = vadd.f32 %v2900_v29, %v5634_v14  ;;  %v2925_v17 = vrot.slane %v2900_v29, 7 }
 0x953   : > { %v5791_v53 = vadd.f32 %v2919_v11, %v5643_v40  ;;  %v5794_v49 = vadd.f32 %v2920_v24, %v5646_v21  ;;  %v5797_v4 = vadd.f32 %v2921_v28, %v5649_v31  ;;  %v3033_v48 = vld [vmem:[#allocation1] sm:$0xff]  ;;  %v5800_v51 = vadd.f32 %v2922_v55, %v5640_v63 }
 0x954   : > { %v3061_v59 = vsel %vm482_vm2, %v3033_v48, 0.0  ;;  %3034 = vst [vmem:[#allocation1] ss:$9 sm:$0xff] %v5788_v27  ;;  %v5805_v14 = vadd.f32 %v2923_v5, %v5654_v52  ;;  %v5809_v40 = vadd.f32 %v2924_v58, %v5659_v26  ;;  %v5813_v21 = vadd.f32 %v2925_v17, %v5663_v2 }
 0x955   : > { %3062 = vadd.xlane.f32.xlu1 %v3061_v59  ;;  %3035 = vst [vmem:[#allocation1 + $0x1] ss:$9 sm:$0xff] %v5791_v53 }
 0x956   : > { %3036 = vst [vmem:[#allocation1 + $0x2] ss:$9 sm:$0xff] %v5794_v49 }
 0x957   : > { %3037 = vst [vmem:[#allocation1 + $0x3] ss:$9 sm:$0xff] %v5797_v4 }
 0x958   : > { %3038 = vst [vmem:[#allocation1 + $0x4] ss:$9 sm:$0xff] %v5800_v51 }
 0x959   : > { %3039 = vst [vmem:[#allocation1 + $0x5] ss:$9 sm:$0xff] %v5805_v14 }
 0x95a   : > { %3040 = vst [vmem:[#allocation1 + $0x6] ss:$9 sm:$0xff] %v5809_v40 }
 0x95b   : > { %3041 = vst [vmem:[#allocation1 + $0x7] ss:$9 sm:$0xff] %v5813_v21 }
 0x95d   : > { %v2902_v63 = vpop.f32.mrf.mxu0 }
 0x95e   : > { %v2903_v31 = vadd.f32 %v5751_v7, %v2902_v63 }
 0x960   : > { %v2926_v52 = vrot.slane %v2903_v31, 1  ;;  %v2927_v26 = vrot.slane %v2903_v31, 2  ;;  %v2928_v10 = vrot.slane %v2903_v31, 3  ;;  %v2929_v41 = vrot.slane %v2903_v31, 4 }
 0x961   : > { %v2930_v23 = vrot.slane %v2903_v31, 5  ;;  %v2931_v2 = vrot.slane %v2903_v31, 6  ;;  %v5822_v15 = vadd.f32 %v2903_v31, %v5690_v50  ;;  %v2932_v12 = vrot.slane %v2903_v31, 7 }
 0x962   : > { %v5825_v62 = vadd.f32 %v2926_v52, %v5694_v56  ;;  %v5828_v47 = vadd.f32 %v2927_v26, %v5701_v13  ;;  %v5831_v54 = vadd.f32 %v2928_v10, %v5704_v43  ;;  %v3042_v19 = vld [vmem:[#allocation1] sm:$0xff]  ;;  %v5834_v18 = vadd.f32 %v2929_v41, %v5698_v60 }
 0x963   : > { %v3064_v20 = vsel %vm482_vm2, %v3042_v19, 0.0  ;;  %3043 = vst [vmem:[#allocation1] ss:$9 sm:$0xff] %v5822_v15  ;;  %v5839_v50 = vadd.f32 %v2930_v23, %v5709_v37  ;;  %v5843_v56 = vadd.f32 %v2931_v2, %v5713_v44  ;;  %v5847_v13 = vadd.f32 %v2932_v12, %v5717_v3 }
 0x964   : > { %3065 = vadd.xlane.f32.xlu2 %v3064_v20  ;;  %3044 = vst [vmem:[#allocation1 + $0x1] ss:$9 sm:$0xff] %v5825_v62 }
 0x965   : > { %3045 = vst [vmem:[#allocation1 + $0x2] ss:$9 sm:$0xff] %v5828_v47 }
 0x966   : > { %3046 = vst [vmem:[#allocation1 + $0x3] ss:$9 sm:$0xff] %v5831_v54 }
 0x967   : > { %3047 = vst [vmem:[#allocation1 + $0x4] ss:$9 sm:$0xff] %v5834_v18 }
 0x968   : > { %3048 = vst [vmem:[#allocation1 + $0x5] ss:$9 sm:$0xff] %v5839_v50  ;;  %v2905_v60 = vpop.f32.mrf.mxu0 }
 0x969   : > { %3049 = vst [vmem:[#allocation1 + $0x6] ss:$9 sm:$0xff] %v5843_v56  ;;  %v2906_v43 = vadd.f32 %v5751_v7, %v2905_v60 }
 0x96a   : > { %3050 = vst [vmem:[#allocation1 + $0x7] ss:$9 sm:$0xff] %v5847_v13 }
 0x96b   : > { %v2933_v37 = vrot.slane %v2906_v43, 1  ;;  %v2934_v44 = vrot.slane %v2906_v43, 2  ;;  %v2935_v9 = vrot.slane %v2906_v43, 3  ;;  %v5859_v3 = vadd.f32 %v2906_v43, %v5734_v1 }
 0x96d   : > { %v5856_v36 = vadd.f32 %v2933_v37, %v5737_v45  ;;  %v5862_v30 = vadd.f32 %v2934_v44, %v5740_v46  ;;  %v5865_v42 = vadd.f32 %v2935_v9, %v5744_v57 }
 0x971   : > { %v3051_v34 = vld [vmem:[#allocation1] sm:$0xff] }
 0x972   : > { %v3067_v35 = vsel %vm482_vm2, %v3051_v34, 0.0  ;;  %3052 = vst [vmem:[#allocation1] ss:$9 sm:$0xff] %v5859_v3 }
 0x973   : > { %3068 = vadd.xlane.f32.xlu0 %v3067_v35  ;;  %3053 = vst [vmem:[#allocation1 + $0x1] ss:$9 sm:$0xff] %v5856_v36 }
 0x974   : > { %3054 = vst [vmem:[#allocation1 + $0x2] ss:$9 sm:$0xff] %v5862_v30 }
 0x975   : > { %3055 = vst [vmem:[#allocation1 + $0x3] ss:$9 sm:$0xff] %v5865_v42 }
 0x97c   : > { %v3056_v26 = vld [vmem:[#allocation1] sm:$0xff] }
 0x9c8   : > { %v3063_v1 = vpop.xlane.xlu1 %3062 }
 0x9c9   : > { %v3073_v45 = vmul.f32 %v3063_v1, %v5364_v38 }
 0x9cb   : > { %v3081_v46 = vperm.slane %v3073_v45, 0  ;;  %v3082_v7 = vperm.slane %v3073_v45, 1  ;;  %v3083_v33 = vperm.slane %v3073_v45, 2  ;;  %v3084_v57 = vperm.slane %v3073_v45, 3 }
 0x9cc   : > { %v3085_v22 = vperm.slane %v3073_v45, 4  ;;  %v3086_v29 = vperm.slane %v3073_v45, 5  ;;  %v3087_v11 = vperm.slane %v3073_v45, 6  ;;  %v3088_v24 = vperm.slane %v3073_v45, 7 }
 0x9cd   : > { %v5874_v28 = vsub.f32 %v5755_v32, %v3081_v46  ;;  %v3138_v55 = vsub.f32 %v5758_v8, %v3082_v7  ;;  %v3139_v5 = vsub.f32 %v5761_v39, %v3083_v33  ;;  %v3140_v58 = vsub.f32 %v5764_v0, %v3084_v57 }
 0x9ce   : > { %v3141_v17 = vsub.f32 %v5767_v25, %v3085_v22  ;;  %v3142_v48 = vsub.f32 %v5771_v16, %v3086_v29  ;;  %v3143_v59 = vsub.f32 %v5775_v61, %v3087_v11  ;;  %v5885_v32 = vsub.f32 %v5779_v6, %v3088_v24 }
 0x9cf   : > { %v3165_v63 = vmul.f32 %v5874_v28, %v5874_v28  ;;  %v3166_v31 = vmul.f32 %v3138_v55, %v3138_v55  ;;  %v3167_v52 = vmul.f32 %v3139_v5, %v3139_v5  ;;  %v3168_v8 = vmul.f32 %v3140_v58, %v3140_v58 }
 0x9d0   : > { %v3169_v10 = vmul.f32 %v3141_v17, %v3141_v17  ;;  %v3170_v39 = vmul.f32 %v3142_v48, %v3142_v48  ;;  %v3171_v0 = vmul.f32 %v3143_v59, %v3143_v59  ;;  %v3172_v25 = vmul.f32 %v5885_v32, %v5885_v32 }
 0x9d1   : > { %3221 = vst [vmem:[#allocation1] ss:$9 sm:$0xff] %v3165_v63  ;;  %v3070_v29 = vsel %vm563_vm3, %v3056_v26, 0.0 }
 0x9d2   : > { %3223 = vst [vmem:[#allocation1 + $0x1] ss:$9 sm:$0xff] %v3166_v31 }
 0x9d3   : > { %3225 = vst [vmem:[#allocation1 + $0x2] ss:$9 sm:$0xff] %v3167_v52 }
 0x9d4   : > { %3227 = vst [vmem:[#allocation1 + $0x3] ss:$9 sm:$0xff] %v3168_v8 }
 0x9d5   : > { %3229 = vst [vmem:[#allocation1 + $0x4] ss:$9 sm:$0xff] %v3169_v10 }
 0x9d6   : > { %3231 = vst [vmem:[#allocation1 + $0x5] ss:$9 sm:$0xff] %v3170_v39 }
 0x9d7   : > { %3233 = vst [vmem:[#allocation1 + $0x6] ss:$9 sm:$0xff] %v3171_v0  ;;  %v3066_v16 = vpop.xlane.xlu2 %3065 }
 0x9d8   : > { %3235 = vst [vmem:[#allocation1 + $0x7] ss:$9 sm:$0xff] %v3172_v25  ;;  %v3074_v61 = vmul.f32 %v3066_v16, %v5364_v38 }
 0x9da   : > { %v3089_v6 = vperm.slane %v3074_v61, 0  ;;  %v3090_v41 = vperm.slane %v3074_v61, 1  ;;  %v3091_v23 = vperm.slane %v3074_v61, 2  ;;  %v3092_v2 = vperm.slane %v3074_v61, 3 }
 0x9db   : > { %v3093_v12 = vperm.slane %v3074_v61, 4  ;;  %v3094_v19 = vperm.slane %v3074_v61, 5  ;;  %v3095_v20 = vperm.slane %v3074_v61, 6  ;;  %v3096_v60 = vperm.slane %v3074_v61, 7 }
 0x9dc   : > { %v3145_v43 = vsub.f32 %v5788_v27, %v3089_v6  ;;  %v3146_v37 = vsub.f32 %v5791_v53, %v3090_v41  ;;  %v3147_v44 = vsub.f32 %v5794_v49, %v3091_v23  ;;  %v3148_v9 = vsub.f32 %v5797_v4, %v3092_v2 }
 0x9dd   : > { %v3149_v34 = vsub.f32 %v5800_v51, %v3093_v12  ;;  %v3150_v35 = vsub.f32 %v5805_v14, %v3094_v19  ;;  %v5897_v1 = vsub.f32 %v5809_v40, %v3095_v20  ;;  %v3152_v33 = vsub.f32 %v5813_v21, %v3096_v60 }
 0x9de   : > { %v3173_v45 = vmul.f32 %v3145_v43, %v3145_v43  ;;  %v3174_v46 = vmul.f32 %v3146_v37, %v3146_v37  ;;  %v3175_v7 = vmul.f32 %v3147_v44, %v3147_v44  ;;  %v3176_v57 = vmul.f32 %v3148_v9, %v3148_v9 }
 0x9df   : > { %v3236_v27 = vld [vmem:[#allocation1] sm:$0xff]  ;;  %v3177_v22 = vmul.f32 %v3149_v34, %v3149_v34  ;;  %v3178_v49 = vmul.f32 %v3150_v35, %v3150_v35  ;;  %v4330_v4 = vmov 1   ;;  %v3179_v51 = vmul.f32 %v5897_v1, %v5897_v1 }
 0x9e0   : > { %v3262_v53 = vsel %vm482_vm2, %v3236_v27, 0.0  ;;  %3237 = vst [vmem:[#allocation1] ss:$9 sm:$0xff] %v3173_v45  ;;  %4137 = vset.pattern.permute.xlu0 %v4330_v4  ;;  %v3180_v14 = vmul.f32 %v3152_v33, %v3152_v33 }
 0x9e1   : > { %3263 = vadd.xlane.f32.xlu1 %v3262_v53  ;;  %3238 = vst [vmem:[#allocation1 + $0x1] ss:$9 sm:$0xff] %v3174_v46 }
 0x9e2   : > { %3239 = vst [vmem:[#allocation1 + $0x2] ss:$9 sm:$0xff] %v3175_v7 }
 0x9e3   : > { %3240 = vst [vmem:[#allocation1 + $0x3] ss:$9 sm:$0xff] %v3176_v57 }
 0x9e4   : > { %3241 = vst [vmem:[#allocation1 + $0x4] ss:$9 sm:$0xff] %v3177_v22 }
 0x9e5   : > { %3242 = vst [vmem:[#allocation1 + $0x5] ss:$9 sm:$0xff] %v3178_v49 }
 0x9e6   : > { %v3069_v40 = vpop.xlane.xlu0 %3068  ;;  %3243 = vst [vmem:[#allocation1 + $0x6] ss:$9 sm:$0xff] %v3179_v51 }
 0x9e7   : > { %v3075_v21 = vmul.f32 %v3069_v40, %v5364_v38  ;;  %3244 = vst [vmem:[#allocation1 + $0x7] ss:$9 sm:$0xff] %v3180_v14 }
 0x9e9   : > { %v3097_v11 = vperm.slane %v3075_v21, 0  ;;  %v3098_v24 = vperm.slane %v3075_v21, 1  ;;  %v3099_v55 = vperm.slane %v3075_v21, 2  ;;  %v3100_v5 = vperm.slane %v3075_v21, 3  ;;  %3071 = vadd.xlane.f32.xlu1 %v3070_v29 }
 0x9ea   : > { %v3101_v58 = vperm.slane %v3075_v21, 4  ;;  %v3102_v17 = vperm.slane %v3075_v21, 5  ;;  %v3103_v48 = vperm.slane %v3075_v21, 6  ;;  %v3104_v59 = vperm.slane %v3075_v21, 7 }
 0x9eb   : > { %v3153_v63 = vsub.f32 %v5822_v15, %v3097_v11  ;;  %v3154_v31 = vsub.f32 %v5825_v62, %v3098_v24  ;;  %v3155_v52 = vsub.f32 %v5828_v47, %v3099_v55  ;;  %v3156_v8 = vsub.f32 %v5831_v54, %v3100_v5 }
 0x9ec   : > { %v3157_v10 = vsub.f32 %v5834_v18, %v3101_v58  ;;  %v5911_v26 = vsub.f32 %v5839_v50, %v3102_v17  ;;  %v3159_v39 = vsub.f32 %v5843_v56, %v3103_v48  ;;  %v3160_v61 = vsub.f32 %v5847_v13, %v3104_v59  ;;  %v427_v13 = vld [vmem:[%s416_s20] sm:$0x1]  ;;  %s4270_s20 = sshra.s32 %s3845_s19, 4  ;;  %s4271_s20 = int_to_ptr.hbm [resolvable:$true] %s4270_s20 }
 0x9ed   : > { %v3181_v0 = vmul.f32 %v3153_v63, %v3153_v63  ;;  %v3182_v25 = vmul.f32 %v3154_v31, %v3154_v31  ;;  %v3183_v16 = vmul.f32 %v3155_v52, %v3155_v52  ;;  %v3184_v6 = vmul.f32 %v3156_v8, %v3156_v8  ;;  %v3349_v8 = vld [vmem:[#allocation2 + $0xa8] sm:$0xff]  ;;  %s4272_s21 = scalar_lea.hbm %s4271_s20, 8  ;;  %p4277_p3 = scmp.lt.s32.totalorder %s4271_s20, %s6032_s8 }
 0x9ee   : > { %v3245_v15 = vld [vmem:[#allocation1] sm:$0xff]  ;;  %v3185_v41 = vmul.f32 %v3157_v10, %v3157_v10  ;;  %v3186_v47 = vmul.f32 %v5911_v26, %v5911_v26  ;;  %v3187_v54 = vmul.f32 %v3159_v39, %v3159_v39  ;;  %v3188_v18 = vmul.f32 %v3160_v61, %v3160_v61  ;;  %v3348_v10 = vld [vmem:[#allocation2 + $0xa0] sm:$0xff]  ;;  %3378 = vmatpush.msra.mxu1 %v3349_v8  ;;  %v3346_v61 = vld [vmem:[#allocation2 + $0x90] sm:$0xff]  ;;  %p4273_p0 = scmp.ne.s32.totalorder %s4271_s20, %s4272_s21 }
 0x9ef   : > { %v3265_v62 = vsel %vm482_vm2, %v3245_v15, 0.0  ;;  %3246 = vst [vmem:[#allocation1] ss:$9 sm:$0xff] %v3181_v0 }
 0x9f0   : > { %3266 = vadd.xlane.f32.xlu2 %v3265_v62  ;;  %3247 = vst [vmem:[#allocation1 + $0x1] ss:$9 sm:$0xff] %v3182_v25  ;;  %3379 = vmatpush.msra.mxu1 %v3348_v10  ;;  %v3462_v62 = vld [vmem:[#allocation2 + $0x268] sm:$0xff]  ;;  %p4274_p1 = pnand %p4273_p0, %p4414_p5 }
 0x9f1   : > { %3248 = vst [vmem:[#allocation1 + $0x2] ss:$9 sm:$0xff] %v3183_v16 }
 0x9f2   : > { %3249 = vst [vmem:[#allocation1 + $0x3] ss:$9 sm:$0xff] %v3184_v6  ;;  %p4275_p2 = pneg %p4274_p1 }
 0x9f3   : > { %3250 = vst [vmem:[#allocation1 + $0x4] ss:$9 sm:$0xff] %v3185_v41  ;;  %v3463_v41 = vld [vmem:[#allocation2 + $0x270] sm:$0xff] }
 0x9f4   : > { %3251 = vst [vmem:[#allocation1 + $0x5] ss:$9 sm:$0xff] %v3186_v47  ;;  %3476 = vmatpush.msrb.mxu3 %v3463_v41 }
 0x9f5   : > { %3252 = vst [vmem:[#allocation1 + $0x6] ss:$9 sm:$0xff] %v3187_v54 }
 0x9f6   : > { %3253 = vst [vmem:[#allocation1 + $0x7] ss:$9 sm:$0xff] %v3188_v18  ;;  %v3436_v18 = vld [vmem:[#allocation2 + $0x250] sm:$0xff]  ;;  %3477 = vmatpush.msrb.mxu3 %v3462_v62 }
 0x9f7   : > { %3452 = vmatpush.msra.mxu2 %v3436_v18 }
 0x9fd   : > { %v3254_v50 = vld [vmem:[#allocation1] sm:$0xff] }
 0x9fe   : > { %v3268_v56 = vsel %vm482_vm2, %v3254_v50, 0.0  ;;  %v3487_v50 = vld [vmem:[#allocation2 + $0x290] sm:$0xff] }
 0x9ff   : > { %3269 = vadd.xlane.f32.xlu0 %v3268_v56  ;;  %v3461_v56 = vld [vmem:[#allocation2 + $0x260] sm:$0xff] }
 0xa00   : > { %3478 = vmatpush.msrb.mxu3 %v3461_v56 }
 0xa08   : > { %3389 = vperm.xlu2 %4136, %v427_v13  }
 0xa13   : > { %3398 = vperm.xlu0 %4137, %v427_v13  }
 0xa54   : > { %v3264_v23 = vpop.xlane.xlu1 %3263 }
 0xa55   : > { %v3271_v2 = vmul.f32 %v3264_v23, %v5364_v38 }
 0xa57   : > { %v3274_v12 = vadd.f32 1e-05, %v3271_v2 }
 0xa59   : > { %4206 = vrsqrt.f32 %v3274_v12  ;;  %vm3283_vm1 = vweird.f32 %v3274_v12 }
 0xa5c   : > { %v3072_v19 = vpop.xlane.xlu1 %3071 }
 0xa5d   : > { %v3076_v20 = vmul.f32 %v3072_v19, %v5364_v38 }
 0xa5f   : > { %v4207_v60 = vpop.eup %4206  ;;  %v3105_v43 = vperm.slane %v3076_v20, 0  ;;  %v3106_v37 = vperm.slane %v3076_v20, 1  ;;  %v3107_v44 = vperm.slane %v3076_v20, 2  ;;  %v3108_v9 = vperm.slane %v3076_v20, 3 }
 0xa60   : > { %v3278_v34 = vmul.f32 %v4207_v60, %v3274_v12  ;;  %vm3284_vm15 = vweird.f32 %v4207_v60 }
 0xa61   : > { %v3161_v35 = vsub.f32 %v5859_v3, %v3105_v43  ;;  %v3162_v45 = vsub.f32 %v5856_v36, %v3106_v37  ;;  %v3163_v46 = vsub.f32 %v5862_v30, %v3107_v44  ;;  %v3164_v7 = vsub.f32 %v5865_v42, %v3108_v9  ;;  %v5930_v3 = vld [vmem:[#allocation2 + $0x228] ss:$0 sm:$0xff]  ;;  %v5932_v30 = vld [vmem:[#allocation2 + $0x230] ss:$0 sm:$0xff]  ;;  %vm3285_vm8 = vmor %vm3283_vm1, %vm3284_vm15 }
 0xa62   : > { %v3279_v33 = vmul.f32 %v4207_v60, %v3278_v34  ;;  %v3324_v21 = vrot.slane %v5930_v3, 7  ;;  %v3336_v24 = vrot.slane %v5932_v30, 7  ;;  %v3325_v47 = vrot.slane %v5930_v3, 6 }
 0xa63   : > { %v3267_v57 = vpop.xlane.xlu2 %3266  ;;  %v3189_v27 = vmul.f32 %v3161_v35, %v3161_v35  ;;  %v3190_v22 = vmul.f32 %v3162_v45, %v3162_v45  ;;  %v3191_v53 = vmul.f32 %v3163_v46, %v3163_v46  ;;  %v3192_v51 = vmul.f32 %v3164_v7, %v3164_v7 }
 0xa64   : > { %v3280_v49 = vmul.f32 0.5, %v3279_v33  ;;  %v3272_v4 = vmul.f32 %v3267_v57, %v5364_v38  ;;  %v3337_v13 = vrot.slane %v5932_v30, 6  ;;  %v3326_v34 = vrot.slane %v5930_v3, 5  ;;  %v3405_v57 = vld [vmem:[#allocation2 + $0xd8] sm:$0xf] }
 0xa65   : > { %3255 = vst [vmem:[#allocation1] ss:$9 sm:$0xff] %v3189_v27  ;;  %v6148_v27 = vld [vmem:[#allocation8_spill] sm:$0xff] }
 0xa66   : > { %v3281_v14 = vsub.f32 1.5, %v3280_v49  ;;  %v3275_v40 = vadd.f32 1e-05, %v3272_v4  ;;  %3256 = vst [vmem:[#allocation1 + $0x1] ss:$9 sm:$0xff] %v3190_v22  ;;  %v3406_v22 = vmul.f32 %v3405_v57, %v6148_v27  ;;  %v3486_v49 = vld [vmem:[#allocation2 + $0x288] sm:$0xff] }
 0xa67   : > { %3257 = vst [vmem:[#allocation1 + $0x2] ss:$9 sm:$0xff] %v3191_v53  ;;  %v3435_v53 = vld [vmem:[#allocation2 + $0x248] sm:$0xff]  ;;  %v3434_v4 = vld [vmem:[#allocation2 + $0x240] sm:$0xff] }
 0xa68   : > { %v3282_v36 = vmul.f32 %v4207_v60, %v3281_v14  ;;  %4208 = vrsqrt.f32 %v3275_v40  ;;  %3258 = vst [vmem:[#allocation1 + $0x3] ss:$9 sm:$0xff] %v3192_v51  ;;  %vm3293_vm10 = vweird.f32 %v3275_v40  ;;  %3453 = vmatpush.msra.mxu2 %v3435_v53  ;;  %v3485_v51 = vld [vmem:[#allocation2 + $0x280] sm:$0xff]  ;;  %v3407_v14 = vsel %vm563_vm3, %v3406_v22, 0.0 }
 0xa6a   : > { %v3286_v42 = vsel %vm3285_vm8, %v4207_v60, %v3282_v36  ;;  %3454 = vmatpush.msra.mxu2 %v3434_v4  ;;  %v3408_v36 = vrot.slane %v3407_v14, 4 }
 0xa6b   : > { %v3310_v29 = vperm.slane %v3286_v42, 0  ;;  %v3311_v11 = vperm.slane %v3286_v42, 7  ;;  %v3390_v42 = vpop.permute.xlu2 %3389 }
 0xa6d   : > { %v3318_v55 = vmul.f32 %v3310_v29, %v5874_v28  ;;  %v3319_v5 = vmul.f32 %v3311_v11, %v5885_v32  ;;  %v3347_v28 = vld [vmem:[#allocation2 + $0x98] sm:$0xff]  ;;  %v3392_v29 = vperm.slane %v3390_v42, 0 }
 0xa6e   : > { %v4209_v58 = vpop.eup %4208  ;;  %3380 = vmatpush.msra.mxu1 %v3347_v28  ;;  %v3510_v42 = vld [vmem:[#allocation2 + $0x298] sm:$0xff] }
 0xa6f   : > { %v3330_v17 = vmul.f32 %v5930_v3, %v3318_v55  ;;  %v3331_v48 = vmul.f32 %v3324_v21, %v3319_v5  ;;  %v3288_v59 = vmul.f32 %v4209_v58, %v3275_v40  ;;  %vm3294_vm9 = vweird.f32 %v4209_v58  ;;  %v3433_v40 = vld [vmem:[#allocation2 + $0x238] sm:$0xff] }
 0xa70   : > { %vm3295_vm11 = vmor %vm3293_vm10, %vm3294_vm9  ;;  %3381 = vmatpush.msra.mxu1 %v3346_v61  ;;  %v3484_v3 = vld [vmem:[#allocation2 + $0x278] sm:$0xff]  ;;  %3455 = vmatpush.msra.mxu2 %v3433_v40 }
 0xa71   : > { %v3342_v63 = vadd.f32 %v5932_v30, %v3330_v17  ;;  %v3343_v31 = vadd.f32 %v3336_v24, %v3331_v48  ;;  %v3289_v52 = vmul.f32 %v4209_v58, %v3288_v59  ;;  %v3386_v24 = vld [vmem:[#allocation2 + $0xb8] sm:$0x1]  ;;  %v3396_v17 = vld [vmem:[#allocation2 + $0xc8] sm:$0x1]  ;;  %v3394_v48 = vld [vmem:[#allocation2 + $0xc0] sm:$0x1] }
 0xa72   : > { %v3270_v39 = vpop.xlane.xlu0 %3269  ;;  %3500 = vmatpush.msrb.mxu1 %v3487_v50 }
 0xa73   : > { %v3290_v0 = vmul.f32 0.5, %v3289_v52  ;;  %v3273_v25 = vmul.f32 %v3270_v39, %v5364_v38  ;;  %3356 = vst [vmem:[#allocation1] ss:$9 sm:$0xff] %v3342_v63  ;;  %v3403_v52 = vld [vmem:[#allocation2 + $0xd0] sm:$0x1] }
 0xa74   : > { %3358 = vst [vmem:[#allocation1 + $0x1] ss:$9 sm:$0xff] %v3343_v31  ;;  %3501 = vmatpush.msrb.mxu1 %v3486_v49 }
 0xa75   : > { %v3291_v32 = vsub.f32 1.5, %v3290_v0  ;;  %v3276_v16 = vadd.f32 1e-05, %v3273_v25  ;;  %v3414_v0 = vld [vmem:[#allocation2 + $0xe0] sm:$0x1] }
 0xa76   : > { %3502 = vmatpush.msrb.mxu1 %v3485_v51  ;;  %v3416_v25 = vld [vmem:[#allocation2 + $0x18] sm:$0x1] }
 0xa77   : > { %v3292_v6 = vmul.f32 %v4209_v58, %v3291_v32  ;;  %4210 = vrsqrt.f32 %v3276_v16  ;;  %vm3303_vm13 = vweird.f32 %v3276_v16  ;;  %v4149_v32 = vld [vmem:[#allocation2 + $0xb0] ss:$0 sm:$0xff] }
 0xa78   : > { %3503 = vmatpush.msrb.mxu1 %v3484_v3 }
 0xa79   : > { %v3296_v15 = vsel %vm3295_vm11, %v4209_v58, %v3292_v6  ;;  %v3393_v58 = vmul.f32 %v3392_v29, %v3386_v24 }
 0xa7a   : > { %v3312_v54 = vperm.slane %v3296_v15, 6 }
 0xa7b   : > { %v3395_v31 = vadd.f32 %v3394_v48, %v3393_v58 }
 0xa7c   : > { %v3320_v23 = vmul.f32 %v3312_v54, %v5897_v1  ;;  %v3338_v1 = vrot.slane %v5932_v30, 5  ;;  %v3409_v30 = vadd.f32 %v3408_v36, %v3407_v14  ;;  %v3511_v36 = vld [vmem:[#allocation2 + $0x2a0] sm:$0xff] }
 0xa7d   : > { %v4211_v2 = vpop.eup %4210  ;;  %v3418_v39 = vrot.slane %v3395_v31, 7 }
 0xa7e   : > { %v3332_v12 = vmul.f32 %v3325_v47, %v3320_v23  ;;  %v3298_v19 = vmul.f32 %v4211_v2, %v3276_v16  ;;  %vm3304_vm12 = vweird.f32 %v4211_v2  ;;  %v3410_v21 = vrot.slane %v3409_v30, 2 }
 0xa7f   : > { %vm3305_vm14 = vmor %vm3303_vm13, %vm3304_vm12  ;;  %v3429_v61 = vsel %vm639_vm4, %v3416_v25, %v3418_v39  ;;  %v3725_v25 = vld [vmem:[#allocation2 + $0x2d8] sm:$0xff] }
 0xa80   : > { %v3344_v20 = vadd.f32 %v3337_v13, %v3332_v12  ;;  %v3299_v60 = vmul.f32 %v4211_v2, %v3298_v19  ;;  %v3411_v5 = vadd.f32 %v3410_v21, %v3409_v30  ;;  %v428_v12 = vld [vmem:[%s419_s23] sm:$0x1]  ;;  %v3513_v21 = vld [vmem:[#allocation2 + $0x2b0] sm:$0xff] }
 0xa81   : > { %v3508_v19 = vsub.f32 1.0, %v428_v12 }
 0xa82   : > { %v3300_v43 = vmul.f32 0.5, %v3299_v60  ;;  %3360 = vst [vmem:[#allocation1 + $0x2] ss:$9 sm:$0xff] %v3344_v20  ;;  %v3412_v63 = vrot.slane %v3411_v5, 1 }
 0xa83   : > { %v3509_v20 = vmul.f32 -1e+09, %v3508_v19 }
 0xa84   : > { %v3301_v37 = vsub.f32 1.5, %v3300_v43  ;;  %v3413_v10 = vadd.f32 %v3412_v63, %v3411_v5 }
 0xa85   : > { %v3399_v11 = vpop.permute.xlu0 %3398  ;;  %v3542_v60 = vperm.slane %v3509_v20, 0  ;;  %v4151_v20 = vld [vmem:[#allocation2 + $0x2c0] ss:$0 sm:$0xff] }
 0xa86   : > { %v3302_v44 = vmul.f32 %v4211_v2, %v3301_v37  ;;  %v3401_v55 = vperm.slane %v3399_v11, 0  ;;  %v3415_v16 = vadd.f32 %v3414_v0, %v3413_v10  ;;  %v3726_v0 = vld [vmem:[#allocation2 + $0x2e0] sm:$0xff] }
 0xa88   : > { %v3306_v9 = vsel %vm3305_vm14, %v4211_v2, %v3302_v44  ;;  %v3402_v59 = vmul.f32 %v3401_v55, %v3396_v17  ;;  %v3424_v62 = vrot.slane %v3415_v16, 5  ;;  %v3512_v55 = vld [vmem:[#allocation2 + $0x2a8] sm:$0xff] }
 0xa89   : > { %v3313_v35 = vperm.slane %v3306_v9, 5  ;;  %v3776_v16 = vld [vmem:[#allocation2 + $0x368] sm:$0xff] }
 0xa8a   : > { %v3404_v8 = vadd.f32 %v3403_v52, %v3402_v59  ;;  %3779 = vmatpush.msra.mxu0 %v3776_v16 }
 0xa8b   : > { %v3321_v45 = vmul.f32 %v3313_v35, %v5911_v26  ;;  %v3460_v26 = vld [vmem:[#allocation2 + $0x258] sm:$0xff] }
 0xa8c   : > { %3479 = vmatpush.msrb.mxu3 %v3460_v26  ;;  %v3421_v28 = vrot.slane %v3404_v8, 6 }
 0xa8d   : > { %v3333_v46 = vmul.f32 %v3326_v34, %v3321_v45 }
 0xa8e   : > { %v3430_v15 = vsel %vm644_vm5, %v3429_v61, %v3421_v28  ;;  %v3724_v28 = vld [vmem:[#allocation2 + $0x2d0] sm:$0xff]  ;;  %v3775_v61 = vld [vmem:[#allocation2 + $0x360] sm:$0xff] }
 0xa8f   : > { %v3345_v7 = vadd.f32 %v3338_v1, %v3333_v46  ;;  %v3431_v54 = vsel %vm649_vm6, %v3430_v15, %v3424_v62  ;;  %3780 = vmatpush.msra.mxu0 %v3775_v61  ;;  %v3773_v62 = vld [vmem:[#allocation2 + $0x350] sm:$0xff]  ;;  %v4155_v61 = vld [vmem:[#allocation2 + $0x380] ss:$0 sm:$0xff] }
 0xa91   : > { %3362 = vst [vmem:[#allocation1 + $0x3] ss:$9 sm:$0xff] %v3345_v7 }
 0xa98   : > { %v3363_v33 = vld [vmem:[#allocation1] sm:$0xff] }
 0xa99   : > { %4058 = vmatmul.msk.f32.vlgmr.msra.gmra.mxu1 %vm482_vm2, %v3363_v33 }
 0xb16   : > { %v3383_v6 = vpop.f32.mrf.mxu1 }
 0xb17   : > { %v3384_v41 = vadd.f32 %v4149_v32, %v3383_v6  ;;  %v3723_v32 = vld [vmem:[#allocation2 + $0x2c8] sm:$0xff]  ;;  %v3774_v6 = vld [vmem:[#allocation2 + $0x358] sm:$0xff] }
 0xb18   : > { %3781 = vmatpush.msra.mxu0 %v3774_v6 }
 0xb19   : > { %v3427_v47 = vrot.slane %v3384_v41, 4 }
 0xb1a   : > { %3782 = vmatpush.msra.mxu0 %v3773_v62 }
 0xb1b   : > { %v5954_v18 = vsel %vm437_vm0, %v3431_v54, %v3427_v47  ;;  %vm3545_vm0 = vcmask 64512  }
 0xb1c   : > { %4059 = vmatmul.msk.f32.vlgmr.msra.gmra.mxu2 %vm482_vm2, %v5954_v18  ;;  %4060 = vmatmul.msk.f32.vlgmr.msrb.gmra.mxu3 %vm482_vm2, %v5954_v18 }
 0xb1d   : > { %4061 = vmatmul.msk.f32.vlgmr.msrb.gmra.mxu1 %vm482_vm2, %v5954_v18 }
 0xb9a   : > { %v3505_v50 = vpop.f32.mrf.mxu1 }
 0xb9b   : > { %3575 = vmatpush.msra.mxu3 %v3505_v50 }
 0xb9d   : > { %3665 = vmatpush.msrb.mxu3 %v3513_v21  ;;  %v4153_v21 = vld [vmem:[#allocation2 + $0x370] ss:$0 sm:$0xff] }
 0xb9f   : > { %v3457_v56 = vpop.f32.mrf.mxu2  ;;  %v3481_v13 = vpop.f32.mrf.mxu3  ;;  %3666 = vmatpush.msrb.mxu3 %v3512_v55 }
 0xba0   : > { %3582 = vrot.lane.b32.xlu1 %v3481_v13, %s4328_s26  ;;  %4062 = vmatpush.xpose.msk.msrb.mxu2 %vm1068_vm7, %v3481_v13 }
 0xba1   : > { %3580 = vrot.lane.b32.xlu2 %v3457_v56, %s4328_s26 }
 0xba3   : > { %4063 = vmatmul.msk.f32.vlgmr.msrb.gmra.mxu2 %vm1068_vm7, %v3457_v56 }
 0xbfb   : > { %v3581_v2 = vpop.permute.xlu2 %3580 }
 0xc12   : > { %v3583_v23 = vpop.permute.xlu1 %3582 }
 0xc13   : > { %4065 = vmatpush.xpose.msk.msra.mxu1 %vm1068_vm7, %v3583_v23 }
 0xc16   : > { %4066 = vmatmul.msk.f32.vlgmr.msra.gmra.mxu1 %vm1068_vm7, %v3581_v2  ;;  %v4150_v2 = vld [vmem:[#allocation2 + $0x2b8] ss:$0 sm:$0xff] }
 0xc17   : > { %3688 = vmatpush.msrb.mxu1 %v3511_v36 }
 0xc19   : > { %3689 = vmatpush.msrb.mxu1 %v3510_v42 }
 0xc26   : > { %v3537_v43 = vpop.f32.mrf.mxu2 }
 0xc27   : > { %v3540_v37 = vmul.f32 0.25, %v3537_v43 }
 0xc29   : > { %v3544_v44 = vadd.f32 %v3542_v60, %v3540_v37  ;;  %v3772_v37 = vld [vmem:[#allocation2 + $0x348] sm:$0xff] }
 0xc2a   : > { %3783 = vmatpush.msra.mxu0 %v3772_v37 }
 0xc2b   : > { %v3546_v9 = vsel %vm3545_vm0, %v3544_v44, -inf }
 0xc2c   : > { %3547 = vmax.xlane.f32.xlu2 %v3546_v9  ;;  %v3770_v9 = vld [vmem:[#allocation2 + $0x338] sm:$0xff] }
 0xc44   : > { %3622 = vrot.lane.b32.xlu2 %v3505_v50, %s4328_s26  ;;  %s391_s26 = scalar_lea.vmem [#allocation5], %s3988_s10  ;;  %s4276_s10 = scalar_lea.hbm %s6032_s8, 16 }
 0xc45   : > { %s3842_s18 = sshll.u32 %s391_s26, 4  ;;  %p4278_p4 = scmp.lt.s32.totalorder %s4276_s10, %s4272_s21  ;;  %s3843_s18 = int_to_ptr.vmem [resolvable:$true] %s3842_s18 }
 0xc47   : > { %p4279_p7 = por %p4278_p4, %p4277_p3 }
 0xc49   : > { %p4280_p8 = pnand %p4279_p7, %p4275_p2 }
 0xc93   : > { %v3605_v34 = vpop.f32.mrf.mxu1 }
 0xc94   : > { %v3608_v35 = vmul.f32 0.25, %v3605_v34  ;;  %v3769_v34 = vld [vmem:[#allocation2 + $0x330] sm:$0xff] }
 0xc96   : > { %v3609_v1 = vadd.f32 %v3608_v35, %v3542_v60  ;;  %v3768_v35 = vld [vmem:[#allocation2 + $0x328] sm:$0xff] }
 0xc98   : > { %v3610_v45 = vsel %vm3545_vm0, %v3609_v1, -inf }
 0xc99   : > { %3611 = vmax.xlane.f32.xlu1 %v3610_v45  ;;  %v3766_v45 = vld [vmem:[#allocation2 + $0x318] sm:$0xff] }
 0xc9f   : > { %v3548_v46 = vpop.xlane.xlu2 %3547 }
 0xca0   : > { %v3549_v7 = vsub.f32 %v3544_v44, %v3548_v46  ;;  %v3771_v44 = vld [vmem:[#allocation2 + $0x340] sm:$0xff]  ;;  %v3765_v46 = vld [vmem:[#allocation2 + $0x310] sm:$0xff] }
 0xca1   : > { %3784 = vmatpush.msra.mxu0 %v3771_v44 }
 0xca2   : > { %v3550_v33 = vmul.f32 1.442695, %v3549_v7  ;;  %v3764_v7 = vld [vmem:[#allocation2 + $0x308] sm:$0xff] }
 0xca3   : > { %3785 = vmatpush.msra.mxu0 %v3770_v9 }
 0xca4   : > { %4212 = vpow2.f32 %v3550_v33  ;;  %v3763_v33 = vld [vmem:[#allocation2 + $0x300] sm:$0xff] }
 0xca5   : > { %3786 = vmatpush.msra.mxu0 %v3769_v34 }
 0xca7   : > { %v3623_v57 = vpop.permute.xlu2 %3622  ;;  %3787 = vmatpush.msra.mxu0 %v3768_v35 }
 0xca8   : > { %3643 = vmatpush.msra.mxu2 %v3623_v57  ;;  %v3762_v57 = vld [vmem:[#allocation2 + $0x2f8] sm:$0xff] }
 0xcaa   : > { %v4213_v27 = vpop.eup %4212  ;;  %3744 = vmatpush.msrb.mxu2 %v3726_v0 }
 0xcab   : > { %v3552_v22 = vsel %vm3545_vm0, %v4213_v27, 0.0 }
 0xcac   : > { %3553 = vadd.xlane.f32.xlu1 %v3552_v22  ;;  %3745 = vmatpush.msrb.mxu2 %v3725_v25  ;;  %v4152_v22 = vld [vmem:[#allocation2 + $0x2e8] ss:$0 sm:$0xff] }
 0xcae   : > { %3746 = vmatpush.msrb.mxu2 %v3724_v28 }
 0xcb0   : > { %3747 = vmatpush.msrb.mxu2 %v3723_v32  ;;  %v4154_v32 = vld [vmem:[#allocation2 + $0x378] ss:$0 sm:$0xff] }
 0xd0c   : > { %v3612_v53 = vpop.xlane.xlu1 %3611 }
 0xd0d   : > { %v3613_v49 = vsub.f32 %v3609_v1, %v3612_v53  ;;  %v3767_v1 = vld [vmem:[#allocation2 + $0x320] sm:$0xff] }
 0xd0e   : > { %3788 = vmatpush.msra.mxu0 %v3767_v1 }
 0xd0f   : > { %v3614_v4 = vmul.f32 1.442695, %v3613_v49 }
 0xd10   : > { %3789 = vmatpush.msra.mxu0 %v3766_v45 }
 0xd11   : > { %4214 = vpow2.f32 %v3614_v4 }
 0xd12   : > { %3790 = vmatpush.msra.mxu0 %v3765_v46 }
 0xd14   : > { %3791 = vmatpush.msra.mxu0 %v3764_v7 }
 0xd16   : > { %3792 = vmatpush.msra.mxu0 %v3763_v33 }
 0xd17   : > { %v4215_v51 = vpop.eup %4214 }
 0xd18   : > { %v3616_v14 = vsel %vm3545_vm0, %v4215_v51, 0.0  ;;  %3793 = vmatpush.msra.mxu0 %v3762_v57 }
 0xd19   : > { %3617 = vadd.xlane.f32.xlu0 %v3616_v14 }
 0xd1f   : > { %v3554_v26 = vpop.xlane.xlu1 %3553 }
 0xd20   : > { %4216 = vrcp.f32 %v3554_v26 }
 0xd26   : > { %v4217_v40 = vpop.eup %4216 }
 0xd27   : > { %v3556_v3 = vmul.f32 %v4217_v40, %v4213_v27  ;;  %v3761_v27 = vld [vmem:[#allocation2 + $0x2f0] sm:$0xff] }
 0xd28   : > { %3794 = vmatpush.msra.mxu0 %v3761_v27 }
 0xd29   : > { %4064 = vmatmul.msk.f32.vlgmr.msra.gmra.mxu3 %vm3545_vm0, %v3556_v3 }
 0xd8c   : > { %v3618_v30 = vpop.xlane.xlu0 %3617 }
 0xd8d   : > { %4218 = vrcp.f32 %v3618_v30 }
 0xd93   : > { %v4219_v29 = vpop.eup %4218 }
 0xd94   : > { %v3620_v11 = vmul.f32 %v4219_v29, %v4215_v51 }
 0xd96   : > { %4067 = vmatmul.msk.f32.vlgmr.msra.gmra.mxu2 %vm3545_vm0, %v3620_v11 }
 0xdac   : > { %v3577_v24 = vpop.f32.mrf.mxu3 }
 0xdad   : > { %4069 = vmatmul.msk.f32.vlgmr.msrb.gmra.mxu1 %vm1068_vm7, %v3577_v24 }
 0xe19   : > { %v3645_v5 = vpop.f32.mrf.mxu2 }
 0xe1a   : > { %4068 = vmatmul.msk.f32.vlgmr.msrb.gmra.mxu3 %vm1068_vm7, %v3645_v5 }
 0xe2a   : > { %v3691_v58 = vpop.f32.mrf.mxu1 }
 0xe9d   : > { %v3668_v17 = vpop.f32.mrf.mxu3 }
 0xe9e   : > { %v3692_v48 = vadd.f32 %v3691_v58, %v3668_v17 }
 0xea0   : > { %v3694_v59 = vadd.f32 %v3692_v48, %v5954_v18 }
 0xea2   : > { %v3697_v63 = vsel %vm482_vm2, %v3694_v59, 0.0 }
 0xea3   : > { %3698 = vadd.xlane.f32.xlu1 %v3697_v63 }
 0xf16   : > { %v3699_v31 = vpop.xlane.xlu1 %3698 }
 0xf17   : > { %v3700_v52 = vmul.f32 %v3699_v31, %v5364_v38 }
 0xf19   : > { %v3701_v8 = vsub.f32 %v3694_v59, %v3700_v52 }
 0xf1b   : > { %v3702_v10 = vmul.f32 %v3701_v8, %v3701_v8 }
 0xf1d   : > { %v3703_v39 = vsel %vm482_vm2, %v3702_v10, 0.0 }
 0xf1e   : > { %3704 = vadd.xlane.f32.xlu0 %v3703_v39 }
 0xf91   : > { %v3705_v15 = vpop.xlane.xlu0 %3704 }
 0xf92   : > { %v3706_v41 = vmul.f32 %v3705_v15, %v5364_v38 }
 0xf94   : > { %v3707_v47 = vadd.f32 1e-05, %v3706_v41 }
 0xf96   : > { %4220 = vrsqrt.f32 %v3707_v47  ;;  %vm3714_vm4 = vweird.f32 %v3707_v47 }
 0xf9c   : > { %v4221_v54 = vpop.eup %4220 }
 0xf9d   : > { %v3709_v18 = vmul.f32 %v4221_v54, %v3707_v47  ;;  %vm3715_vm3 = vweird.f32 %v4221_v54 }
 0xf9e   : > { %vm3716_vm5 = vmor %vm3714_vm4, %vm3715_vm3 }
 0xf9f   : > { %v3710_v50 = vmul.f32 %v4221_v54, %v3709_v18 }
 0xfa1   : > { %v3711_v56 = vmul.f32 0.5, %v3710_v50 }
 0xfa3   : > { %v3712_v13 = vsub.f32 1.5, %v3711_v56 }
 0xfa5   : > { %v3713_v23 = vmul.f32 %v4221_v54, %v3712_v13 }
 0xfa7   : > { %v3717_v12 = vsel %vm3716_vm5, %v4221_v54, %v3713_v23 }
 0xfa8   : > { %v3718_v19 = vmul.f32 %v3717_v12, %v3701_v8 }
 0xfaa   : > { %v3720_v60 = vmul.f32 %v4150_v2, %v3718_v19 }
 0xfac   : > { %v3722_v43 = vadd.f32 %v4151_v20, %v3720_v60 }
 0xfae   : > { %4070 = vmatmul.msk.f32.vlgmr.msrb.gmra.mxu2 %vm482_vm2, %v3722_v43 }
0x1031   : > { %v3749_v53 = vpop.f32.mrf.mxu2 }
0x1032   : > { %v3750_v49 = vadd.f32 %v4152_v22, %v3749_v53 }
0x1034   : > { %v3753_v4 = vmul.f32 0.044715, %v3750_v49  ;;  %v3752_v36 = vmul.f32 0.5, %v3750_v49 }
0x1036   : > { %v3754_v51 = vmul.f32 %v3753_v4, %v3750_v49 }
0x1038   : > { %v3755_v14 = vmul.f32 %v3754_v51, %v3750_v49 }
0x103a   : > { %v3756_v26 = vadd.f32 %v3755_v14, %v3750_v49 }
0x103c   : > { %v3757_v40 = vmul.f32 0.7978846, %v3756_v26 }
0x103e   : > { %4222 = vtanh.f32 %v3757_v40 }
0x1044   : > { %v4223_v3 = vpop.eup %4222 }
0x1045   : > { %v3759_v30 = vadd.f32 1.0, %v4223_v3 }
0x1047   : > { %v3760_v42 = vmul.f32 %v3759_v30, %v3752_v36 }
0x1049   : > { %3795 = vmatmul.f32.vlgmr.msra.gmra.mxu0 %v3760_v42 }
0x10c6   : > { %v3796_v29 = vpop.f32.mrf.mxu0 }
0x10c7   : > { %v3797_v11 = vadd.f32 %v4153_v21, %v3796_v29 }
0x10c9   : > { %v3799_v24 = vadd.f32 %v3797_v11, %v3722_v43 }
0x10cb   : > { %v3802_v55 = vsel %vm482_vm2, %v3799_v24, 0.0 }
0x10cc   : > { %3803 = vadd.xlane.f32.xlu1 %v3802_v55 }
0x113f   : > { %v3804_v5 = vpop.xlane.xlu1 %3803 }
0x1140   : > { %v3805_v58 = vmul.f32 %v3804_v5, %v5364_v38 }
0x1142   : > { %v3806_v17 = vsub.f32 %v3799_v24, %v3805_v58 }
0x1144   : > { %v3807_v48 = vmul.f32 %v3806_v17, %v3806_v17 }
0x1146   : > { %v3808_v59 = vsel %vm482_vm2, %v3807_v48, 0.0 }
0x1147   : > { %3809 = vadd.xlane.f32.xlu0 %v3808_v59 }
0x11ba   : > { %v3810_v63 = vpop.xlane.xlu0 %3809 }
0x11bb   : > { %v3811_v31 = vmul.f32 %v3810_v63, %v5364_v38 }
0x11bd   : > { %v3812_v52 = vadd.f32 1e-05, %v3811_v31 }
0x11bf   : > { %4224 = vrsqrt.f32 %v3812_v52  ;;  %vm3819_vm7 = vweird.f32 %v3812_v52 }
0x11c5   : > { %v4225_v8 = vpop.eup %4224 }
0x11c6   : > { %v3814_v10 = vmul.f32 %v4225_v8, %v3812_v52  ;;  %vm3820_vm6 = vweird.f32 %v4225_v8 }
0x11c7   : > { %vm3821_vm15 = vmor %vm3819_vm7, %vm3820_vm6 }
0x11c8   : > { %v3815_v39 = vmul.f32 %v4225_v8, %v3814_v10 }
0x11ca   : > { %v3816_v0 = vmul.f32 0.5, %v3815_v39 }
0x11cc   : > { %v3817_v25 = vsub.f32 1.5, %v3816_v0 }
0x11ce   : > { %v3818_v28 = vmul.f32 %v4225_v8, %v3817_v25 }
0x11d0   : > { %v3822_v38 = vsel %vm3821_vm15, %v4225_v8, %v3818_v28 }
0x11d1   : > { %v3823_v16 = vmul.f32 %v3822_v38, %v3806_v17 }
0x11d3   : > { %v3825_v6 = vmul.f32 %v4154_v32, %v3823_v16 }
0x11d5   : > { %v3827_v15 = vadd.f32 %v4155_v61, %v3825_v6 }
0x11d7   : > { %3828 = vst.msk [vmem:[%s391_s26] sm:$0xff] %vm482_vm2, %v3827_v15 }
0x11d8   : > { %4283 = shalt.err (!%p4280_p8)
}
0x11d9   : > { %4082 = dma.vmem_to_hbm [thread:$0]  (%p4414_p5), %s3843_s18, 128, %s3845_s19, %s3830_s9  }
0x11da PF: > { %p4094_p9 = scmp.ge.s32.totalorder %s4322_s30, 2  ;;  %s3856_s24 = sand.u32 1, %s4310_s27  }
0x11db   : > { %s3857_s13 = scalar_lea.sflag [#allocation4], %s3856_s24 }
0x11dc   : > { %p4089_p10 = pnand %p4094_p9, %p4418_p6 }
0x11de   : > { %p4090_p11 = pneg %p4089_p10 }
0x11e0   : > { %4305 = dma.done.wait (%p4090_p11), %s3857_s13, 128  }
0x11e1   : > { %4307 = vsyncadd (%p4090_p11), %s3857_s13, 4294967168  ;;  %p19_p12 = scmp.ge.s32.totalorder %s4401_s11, 4   ;;  %s6149_s27 = smov %s4314_s28 }
0x11e2   : > { %s6150_s28 = smov %s4318_s29  ;;  %s6151_s29 = smov %s4412_s14 }
0x11e3   : > { %s6152_s30 = smov %s4401_s11  ;;  %21 = sbr.rel (!%p19_p12) target bundleno = 4 (0x4), region = 330 }
0x11e8   :  { %3863 = vsyncpa [#allocation3], 1 }
0x11e9   :  { %3865 = vsyncpa [#allocation3 + $0x1], 1 }
0x11ea   :  { %3866 = vsyncpa [#allocation4], 1 }
0x11eb   :  { %3868 = vsyncpa [#allocation4 + $0x1], 1 }

</bundles_post_ra>
